<compile_context>
chip_gen: v5e
topology: v5e:2x2
jax: 0.10.0
libtpu: 0.0.40
codegen_flags: <defaults>
</compile_context>

<pallas_src>
import math

import jax
import jax.numpy as jnp
import numpy as np
from jax.experimental import pallas as pl
from jax.experimental.pallas import tpu as pltpu

# ----------------------------- model config (small) -----------------------------
B = 2            # batch
L = 8            # sequence length
D = 32           # hidden size (bert_dim)
H = 2            # num attention heads   -> head_type_vec has length H
DH = D // H      # head dim
INTER = 64       # intermediate (FFN) size
N_LAYERS = 2     # encoder layers per BERT
VOCAB = 50
NUM_CLASS = 3
WIN_SIZE = 3
HEAD_TYPE_VEC = [1, 0]     # 1 -> local mask head, 0 -> all-ones mask head
LN_EPS = 1e-12
N_TOWERS = 2               # 0 = text_bert, 1 = aspect_bert


# ----------------------------- in-kernel helpers -----------------------------

def _layernorm(x, g, b):
    mu = jnp.mean(x, axis=-1, keepdims=True)
    var = jnp.mean(jnp.square(x - mu), axis=-1, keepdims=True)
    return (x - mu) * jax.lax.rsqrt(var + LN_EPS) * g + b


def _gelu(x):
    # TODO(synk): BERT's exact erf-gelu is replaced with the tanh approximation
    #             ("gelu_new") so the activation lowers cleanly inside Mosaic.
    c = math.sqrt(2.0 / math.pi)
    return 0.5 * x * (1.0 + jnp.tanh(c * (x + 0.044715 * x * x * x)))


def _softmax_last(s):
    s = s - jnp.max(s, axis=-1, keepdims=True)
    e = jnp.exp(s)
    return e * pl.reciprocal(jnp.sum(e, axis=-1, keepdims=True), approx=True)


# ============================ fused dual-tower BERT encoder ============================

def _encoder_kernel(emb_ref, bias_ref, eg_ref, eb_ref,
                    qkvw_ref, qkvb_ref, aow_ref, aob_ref,
                    l1g_ref, l1b_ref, iw_ref, ib_ref,
                    ow_ref, ob_ref, l2g_ref, l2b_ref,
                    out_ref):
    """One BERT tower per grid step: embedding LN + all encoder layers, fully in VMEM."""
    scale = 1.0 / math.sqrt(DH)
    h = _layernorm(emb_ref[...].reshape(B * L, D), eg_ref[...], eb_ref[...])

    for li in range(N_LAYERS):
        # Fused QKV projection: (B*L, 3D) in a single MXU pass.
        qkv = (jnp.dot(h, qkvw_ref[li], preferred_element_type=jnp.float32)
               + qkvb_ref[li])
        ctx_heads = []
        for hi in range(H):
            q = qkv[:, hi * DH:(hi + 1) * DH].reshape(B, L, DH)
            k = qkv[:, D + hi * DH:D + (hi + 1) * DH].reshape(B, L, DH)
            v = qkv[:, 2 * D + hi * DH:2 * D + (hi + 1) * DH].reshape(B, L, DH)
            s = jnp.einsum('bqd,bkd->bqk', q, k,
                           preferred_element_type=jnp.float32) * scale
            s = s + bias_ref[hi]                       # additive mask (B, L, L)
            p = _softmax_last(s)                       # probs never leave VMEM
            ctx_heads.append(jnp.einsum('bqk,bkd->bqd', p, v,
                                        preferred_element_type=jnp.float32))
        ctx = jnp.concatenate(ctx_heads, axis=-1).reshape(B * L, D)

        # BertSelfOutput: dense + residual + LN (fused epilogue)
        ao = (jnp.dot(ctx, aow_ref[li], preferred_element_type=jnp.float32)
              + aob_ref[li])
        h1 = _layernorm(ao + h, l1g_ref[li], l1b_ref[li])

        # FFN: intermediate (fused gelu) + output dense + residual + LN
        inter = _gelu(jnp.dot(h1, iw_ref[li], preferred_element_type=jnp.float32)
                      + ib_ref[li])
        out = (jnp.dot(inter, ow_ref[li], preferred_element_type=jnp.float32)
               + ob_ref[li])
        h = _layernorm(out + h1, l2g_ref[li], l2b_ref[li])

    out_ref[...] = h.reshape(B, L, D)

    @pl.when(pl.program_id(0) == 0)        # text tower: fuse its final tanh here
    def _():
        out_ref[...] = jnp.tanh(out_ref[...])


def _tower_spec(arr):
    """BlockSpec selecting one tower slice (leading dim squeezed) per grid step."""
    n = arr.ndim

    def index_map(t):
        return (t,) + (0,) * (n - 1)

    return pl.BlockSpec((None,) + arr.shape[1:], index_map)


def dual_tower_encoder(emb, bias, p):
    ins = [emb, bias, p["emb_ln_g"], p["emb_ln_b"],
           p["qkv_w"], p["qkv_b"], p["ao_w"], p["ao_b"],
           p["ln1_g"], p["ln1_b"], p["i_w"], p["i_b"],
           p["o_w"], p["o_b"], p["ln2_g"], p["ln2_b"]]
    return pl.pallas_call(
        _encoder_kernel,
        grid=(N_TOWERS,),
        in_specs=[_tower_spec(a) for a in ins],
        out_specs=pl.BlockSpec((None, B, L, D), lambda t: (t, 0, 0, 0)),
        out_shape=jax.ShapeDtypeStruct((N_TOWERS, B, L, D), jnp.float32),
        compiler_params=pltpu.CompilerParams(dimension_semantics=("parallel",)),
    )(*ins)


# ============================ fused model head ============================

def _head_kernel(text_ref, aspect_ref, span_ref,
                 saw_ref, sab_ref, pw_ref, pb_ref,
                 q_ref, wkw_ref, wkb_ref, wqw_ref, wqb_ref,
                 pjw_ref, pjb_ref, r1w_ref, r1b_ref, r2w_ref, r2b_ref,
                 out_ref, att_ref):
    scale = 1.0 / math.sqrt(DH)

    # ---- span-masked aspect sequence -> fused QKV for the pooler self-attention ----
    a2 = (aspect_ref[...] * span_ref[...]).reshape(B * L, D)
    qkv = (jnp.dot(a2, saw_ref[...], preferred_element_type=jnp.float32)
           + sab_ref[...])
    # BertPooler only consumes token 0 -> compute only that context row.
    pooled_rows = []
    for b in range(B):
        heads = []
        for hi in range(H):
            q0 = qkv[b * L:b * L + 1, hi * DH:(hi + 1) * DH]                 # (1, DH)
            k = qkv[b * L:(b + 1) * L, D + hi * DH:D + (hi + 1) * DH]        # (L, DH)
            v = qkv[b * L:(b + 1) * L, 2 * D + hi * DH:2 * D + (hi + 1) * DH]
            s = jax.lax.dot_general(q0, k, (((1,), (1,)), ((), ())),
                                    preferred_element_type=jnp.float32) * scale
            p = _softmax_last(s)                                             # (1, L)
            heads.append(jnp.dot(p, v, preferred_element_type=jnp.float32))  # (1, DH)
        pooled_rows.append(jnp.concatenate(heads, axis=-1))                  # (1, D)
    ctx0 = jnp.concatenate(pooled_rows, axis=0)                              # (B, D)
    pooled = jnp.tanh(ctx0)
    aspect_rep = jnp.tanh(jnp.dot(pooled, pw_ref[...],
                                  preferred_element_type=jnp.float32) + pb_ref[...])

    # ---- NoQueryAttention over cat([text, aspect_rep expand], -1) (concat decomposed) ----
    text2 = text_ref[...].reshape(B * L, D)
    wkw = wkw_ref[...]                                                       # (2D, D)
    kx_t = jnp.dot(text2, wkw[:D], preferred_element_type=jnp.float32)       # (B*L, D)
    kx_a = (jnp.dot(aspect_rep, wkw[D:], preferred_element_type=jnp.float32)
            + wkb_ref[...])                                                  # (B, D)
    qx = (jnp.dot(q_ref[...], wqw_ref[...], preferred_element_type=jnp.float32)
          + wqb_ref[...])                                                    # (1, D)
    att_rows, nq_ctx_rows = [], []
    for b in range(B):
        kx_b = kx_t[b * L:(b + 1) * L, :] + kx_a[b:b + 1, :]                 # (L, D)
        s = jax.lax.dot_general(qx, kx_b, (((1,), (1,)), ((), ())),
                                preferred_element_type=jnp.float32)          # (1, L)
        att = _softmax_last(s)
        att_rows.append(att)
        nq_ctx_rows.append(jnp.dot(att, kx_b,
                                   preferred_element_type=jnp.float32))      # (1, D)
    att_score = jnp.concatenate(att_rows, axis=0)                            # (B, L)
    out_ctx = jnp.concatenate(nq_ctx_rows, axis=0)                           # (B, D)
    emphasized = (jnp.dot(out_ctx, pjw_ref[...],
                          preferred_element_type=jnp.float32) + pjb_ref[...])

    # ---- classifier head: concat + dense(relu fused) + dense ----
    concat = jnp.concatenate([emphasized, aspect_rep], axis=-1)              # (B, 2D)
    hidden = jnp.maximum(jnp.dot(concat, r1w_ref[...],
                                 preferred_element_type=jnp.float32) + r1b_ref[...], 0.0)
    out_ref[...] = (jnp.dot(hidden, r2w_ref[...],
                            preferred_element_type=jnp.float32) + r2b_ref[...])
    att_ref[...] = att_score


def head_forward(text, aspect, span_mask3, p):
    return pl.pallas_call(
        _head_kernel,
        out_shape=(jax.ShapeDtypeStruct((B, NUM_CLASS), jnp.float32),
                   jax.ShapeDtypeStruct((B, L), jnp.float32)),
    )(text, aspect, span_mask3,
      p["sa_qkv_w"], p["sa_qkv_b"], p["pool_w"], p["pool_b"],
      p["nq_q"], p["wk_w"], p["wk_b"], p["wq_w"], p["wq_b"],
      p["proj_w"], p["proj_b"], p["red1_w"], p["red1_b"],
      p["red2_w"], p["red2_b"])


# ================================ attention masks ================================

def get_local_mask_map(Ll, win_size):
    assert win_size % 2 == 1
    half = win_size // 2
    ar = jnp.arange(Ll)
    in_window = jnp.abs(ar[:, None] - ar[None, :]) <= half
    return jnp.where(in_window, 0.0, 1.0).astype(jnp.float32)


def get_atten_mask(head_type_vec, Ll, win_size):
    local = get_local_mask_map(Ll, win_size)
    rows = [local if tp != 0 else jnp.ones((Ll, Ll), jnp.float32)
            for tp in head_type_vec]
    return jnp.stack(rows)          # (H, L, L)


# ================================ parameter init ================================

def init_params(key):
    keys = iter(jax.random.split(key, 40))

    def nrm(shape):
        return jax.random.normal(next(keys), shape, jnp.float32) * 0.02

    p = {}
    # stacked embeddings for the two towers (0 = text_bert, 1 = aspect_bert)
    p["word"] = nrm((N_TOWERS, VOCAB, D))
    p["pos"] = nrm((N_TOWERS, L, D))
    p["type"] = nrm((N_TOWERS, 2, D))
    p["emb_ln_g"] = jnp.ones((N_TOWERS, 1, D), jnp.float32)
    p["emb_ln_b"] = jnp.zeros((N_TOWERS, 1, D), jnp.float32)
    # stacked encoder layer weights: (tower, layer, ...) with fused QKV
    p["qkv_w"] = nrm((N_TOWERS, N_LAYERS, D, 3 * D))
    p["qkv_b"] = nrm((N_TOWERS, N_LAYERS, 1, 3 * D))
    p["ao_w"] = nrm((N_TOWERS, N_LAYERS, D, D))
    p["ao_b"] = nrm((N_TOWERS, N_LAYERS, 1, D))
    p["ln1_g"] = jnp.ones((N_TOWERS, N_LAYERS, 1, D), jnp.float32)
    p["ln1_b"] = jnp.zeros((N_TOWERS, N_LAYERS, 1, D), jnp.float32)
    p["i_w"] = nrm((N_TOWERS, N_LAYERS, D, INTER))
    p["i_b"] = nrm((N_TOWERS, N_LAYERS, 1, INTER))
    p["o_w"] = nrm((N_TOWERS, N_LAYERS, INTER, D))
    p["o_b"] = nrm((N_TOWERS, N_LAYERS, 1, D))
    p["ln2_g"] = jnp.ones((N_TOWERS, N_LAYERS, 1, D), jnp.float32)
    p["ln2_b"] = jnp.zeros((N_TOWERS, N_LAYERS, 1, D), jnp.float32)
    # aspect_self_att_pooler: BertSelfAttention (fused QKV) + BertPooler dense
    p["sa_qkv_w"] = nrm((D, 3 * D))
    p["sa_qkv_b"] = nrm((1, 3 * D))
    p["pool_w"] = nrm((D, D))
    p["pool_b"] = nrm((1, D))
    # NoQueryAttention(embed_dim=2D, hidden_dim=D, out_dim=D), dot_product score
    p["nq_q"] = nrm((1, 2 * D))
    p["wk_w"] = nrm((2 * D, D))
    p["wk_b"] = nrm((1, D))
    p["wq_w"] = nrm((2 * D, D))
    p["wq_b"] = nrm((1, D))
    p["proj_w"] = nrm((D, D))
    p["proj_b"] = nrm((1, D))
    # classifier head
    p["red1_w"] = nrm((2 * D, D))
    p["red1_b"] = nrm((1, D))
    p["red2_w"] = nrm((D, NUM_CLASS))
    p["red2_b"] = nrm((1, NUM_CLASS))
    p["att_mask"] = get_atten_mask(HEAD_TYPE_VEC, L, WIN_SIZE)   # (H, L, L)
    return p


# ================================ VH_BERT_TSA forward ================================

def vh_bert_tsa_forward(params, input_ids, attention_mask, pos):
    # embeddings for both towers (gather + adds in cheap XLA glue; LN fused in-kernel)
    emb = (jnp.take(params["word"], input_ids, axis=1)                 # (2, B, L, D)
           + params["pos"][:, None, :, :]
           + params["type"][:, 0][:, None, None, :])

    # compact additive attention biases, built once for the whole encoder stack
    att_mask = params["att_mask"]                                      # (H, L, L)
    text_bias = jnp.broadcast_to(((1.0 - att_mask) * -10000.0)[:, None, :, :],
                                 (H, B, L, L))                         # head-type mask
    am = attention_mask.astype(jnp.float32)
    asp_bias = jnp.broadcast_to(((1.0 - am) * -10000.0)[None, :, None, :],
                                (H, B, L, L))                          # token mask
    bias = jnp.stack([text_bias, asp_bias])                            # (2, H, B, L, L)

    # both BERT towers in ONE fused pallas_call (text tower tanh fused inside)
    seq = dual_tower_encoder(emb, bias, params)                        # (2, B, L, D)
    text = seq[0]
    aspect = seq[1]

    # span mask built from pos (replaces the python loop mask[i, s:e] = 1)
    ar = jnp.arange(L)
    span_mask = ((ar[None, :] >= pos[:, 0:1]) &
                 (ar[None, :] < pos[:, 1:2])).astype(jnp.float32)      # (B, L)

    # entire head (pooler SA + pooler + NoQueryAttention + classifier) in one kernel;
    # dropout prob 0.0 -> identity.
    out, att_score = head_forward(text, aspect, span_mask[:, :, None], params)
    return {"output": out,
            "aspect_emphasize_att_acore_BhL": att_score}               # (B, L)


# ================================ main ================================

if __name__ == "__main__":
    key = jax.random.PRNGKey(0)
    k_params, k_ids = jax.random.split(key)

    # TODO(synk): pretrained checkpoint loading (BertModel.from_pretrained) is replaced
    #             by deterministic random init.
    params = init_params(k_params)

    input_ids = jax.random.randint(k_ids, (B, L), 0, VOCAB, dtype=jnp.int32)
    attention_mask = jnp.array([[1, 1, 1, 1, 1, 1, 1, 1],
                                [1, 1, 1, 1, 1, 1, 0, 0]], dtype=jnp.int32)
    pos = jnp.array([[2, 5], [1, 3]], dtype=jnp.int32)

    fwd = jax.jit(vh_bert_tsa_forward)
    result = fwd(params, input_ids, attention_mask, pos)
    jax.block_until_ready(result)

    out = np.asarray(result["output"])                            # (B, num_class)
    score = np.asarray(result["aspect_emphasize_att_acore_BhL"])  # (B, L)
    assert out.shape == (B, NUM_CLASS) and score.shape == (B, L)
    assert np.all(np.isfinite(out)) and np.all(np.isfinite(score))
    print("KERNEL_OK")
</pallas_src>

<mosaic_0001>
module attributes {stable_mosaic.version = 11 : i64} {
  func.func @_encoder_kernel(%arg0: i32, %arg1: memref<1x2x8x32xf32, #tpu.memory_space<vmem>>, %arg2: memref<1x2x2x8x8xf32, #tpu.memory_space<vmem>>, %arg3: memref<1x1x32xf32, #tpu.memory_space<vmem>>, %arg4: memref<1x1x32xf32, #tpu.memory_space<vmem>>, %arg5: memref<1x2x32x96xf32, #tpu.memory_space<vmem>>, %arg6: memref<1x2x1x96xf32, #tpu.memory_space<vmem>>, %arg7: memref<1x2x32x32xf32, #tpu.memory_space<vmem>>, %arg8: memref<1x2x1x32xf32, #tpu.memory_space<vmem>>, %arg9: memref<1x2x1x32xf32, #tpu.memory_space<vmem>>, %arg10: memref<1x2x1x32xf32, #tpu.memory_space<vmem>>, %arg11: memref<1x2x32x64xf32, #tpu.memory_space<vmem>>, %arg12: memref<1x2x1x64xf32, #tpu.memory_space<vmem>>, %arg13: memref<1x2x64x32xf32, #tpu.memory_space<vmem>>, %arg14: memref<1x2x1x32xf32, #tpu.memory_space<vmem>>, %arg15: memref<1x2x1x32xf32, #tpu.memory_space<vmem>>, %arg16: memref<1x2x1x32xf32, #tpu.memory_space<vmem>>, %arg17: memref<1x2x8x32xf32, #tpu.memory_space<vmem>>) attributes {dimension_semantics = [#tpu.dimension_semantics<parallel>], iteration_bounds = array<i64: 2>, scalar_prefetch = 0 : i64, scratch_operands = 0 : i64, tpu.core_type = #tpu.core_type<tc>, window_params = [{transform_indices = @transform_0, window_bounds = array<i64: 1, 2, 8, 32>}, {transform_indices = @transform_1, window_bounds = array<i64: 1, 2, 2, 8, 8>}, {transform_indices = @transform_2, window_bounds = array<i64: 1, 1, 32>}, {transform_indices = @transform_3, window_bounds = array<i64: 1, 1, 32>}, {transform_indices = @transform_4, window_bounds = array<i64: 1, 2, 32, 96>}, {transform_indices = @transform_5, window_bounds = array<i64: 1, 2, 1, 96>}, {transform_indices = @transform_6, window_bounds = array<i64: 1, 2, 32, 32>}, {transform_indices = @transform_7, window_bounds = array<i64: 1, 2, 1, 32>}, {transform_indices = @transform_8, window_bounds = array<i64: 1, 2, 1, 32>}, {transform_indices = @transform_9, window_bounds = array<i64: 1, 2, 1, 32>}, {transform_indices = @transform_10, window_bounds = array<i64: 1, 2, 32, 64>}, {transform_indices = @transform_11, window_bounds = array<i64: 1, 2, 1, 64>}, {transform_indices = @transform_12, window_bounds = array<i64: 1, 2, 64, 32>}, {transform_indices = @transform_13, window_bounds = array<i64: 1, 2, 1, 32>}, {transform_indices = @transform_14, window_bounds = array<i64: 1, 2, 1, 32>}, {transform_indices = @transform_15, window_bounds = array<i64: 1, 2, 1, 32>}, {transform_indices = @transform_16, window_bounds = array<i64: 1, 2, 8, 32>}]} {
    %c0 = arith.constant 0 : index
    %c0_0 = arith.constant 0 : index
    %c0_1 = arith.constant 0 : index
    %c0_2 = arith.constant 0 : index
    %0 = vector.load %arg1[%c0, %c0_0, %c0_1, %c0_2] : memref<1x2x8x32xf32, #tpu.memory_space<vmem>>, vector<1x2x8x32xf32>
    %1 = vector.shape_cast %0 : vector<1x2x8x32xf32> to vector<2x8x32xf32>
    %2 = vector.shape_cast %1 : vector<2x8x32xf32> to vector<16x32xf32>
    %c0_3 = arith.constant 0 : index
    %c0_4 = arith.constant 0 : index
    %c0_5 = arith.constant 0 : index
    %3 = vector.load %arg3[%c0_3, %c0_4, %c0_5] : memref<1x1x32xf32, #tpu.memory_space<vmem>>, vector<1x1x32xf32>
    %4 = vector.shape_cast %3 : vector<1x1x32xf32> to vector<1x32xf32>
    %c0_6 = arith.constant 0 : index
    %c0_7 = arith.constant 0 : index
    %c0_8 = arith.constant 0 : index
    %5 = vector.load %arg4[%c0_6, %c0_7, %c0_8] : memref<1x1x32xf32, #tpu.memory_space<vmem>>, vector<1x1x32xf32>
    %6 = vector.shape_cast %5 : vector<1x1x32xf32> to vector<1x32xf32>
    %cst = arith.constant dense<0.000000e+00> : vector<16xf32>
    %7 = vector.multi_reduction <add>, %2, %cst [1] : vector<16x32xf32> to vector<16xf32>
    %8 = vector.shape_cast %7 : vector<16xf32> to vector<16x1xf32>
    %cst_9 = arith.constant 3.200000e+01 : f32
    %9 = vector.broadcast %cst_9 : f32 to vector<16x1xf32>
    %10 = arith.divf %8, %9 : vector<16x1xf32>
    %11 = vector.broadcast %10 : vector<16x1xf32> to vector<16x32xf32>
    %12 = arith.subf %2, %11 : vector<16x32xf32>
    %13 = arith.mulf %12, %12 : vector<16x32xf32>
    %cst_10 = arith.constant dense<0.000000e+00> : vector<16xf32>
    %14 = vector.multi_reduction <add>, %13, %cst_10 [1] : vector<16x32xf32> to vector<16xf32>
    %15 = vector.shape_cast %14 : vector<16xf32> to vector<16x1xf32>
    %cst_11 = arith.constant 3.200000e+01 : f32
    %16 = vector.broadcast %cst_11 : f32 to vector<16x1xf32>
    %17 = arith.divf %15, %16 : vector<16x1xf32>
    %18 = vector.broadcast %10 : vector<16x1xf32> to vector<16x32xf32>
    %19 = arith.subf %2, %18 : vector<16x32xf32>
    %cst_12 = arith.constant 9.99999996E-13 : f32
    %20 = vector.broadcast %cst_12 : f32 to vector<16x1xf32>
    %21 = arith.addf %17, %20 : vector<16x1xf32>
    %22 = math.rsqrt %21 : vector<16x1xf32>
    %23 = vector.broadcast %22 : vector<16x1xf32> to vector<16x32xf32>
    %24 = arith.mulf %19, %23 : vector<16x32xf32>
    %25 = vector.broadcast %4 : vector<1x32xf32> to vector<16x32xf32>
    %26 = arith.mulf %24, %25 : vector<16x32xf32>
    %27 = vector.broadcast %6 : vector<1x32xf32> to vector<16x32xf32>
    %28 = arith.addf %26, %27 : vector<16x32xf32>
    %c0_13 = arith.constant 0 : index
    %c0_14 = arith.constant 0 : index
    %c0_15 = arith.constant 0 : index
    %c0_16 = arith.constant 0 : index
    %29 = vector.load %arg5[%c0_13, %c0_14, %c0_15, %c0_16] : memref<1x2x32x96xf32, #tpu.memory_space<vmem>>, vector<1x1x32x96xf32>
    %30 = vector.shape_cast %29 : vector<1x1x32x96xf32> to vector<32x96xf32>
    %cst_17 = arith.constant dense<0.000000e+00> : vector<16x96xf32>
    %31 = tpu.matmul %28, %30, %cst_17 {dimension_numbers = #tpu.dot_dimension_numbers<[1], [0], [0], [1], [0, 0, 1, 1], [], []>} : vector<16x32xf32>, vector<32x96xf32>, vector<16x96xf32> -> vector<16x96xf32>
    %c0_18 = arith.constant 0 : index
    %c0_19 = arith.constant 0 : index
    %c0_20 = arith.constant 0 : index
    %c0_21 = arith.constant 0 : index
    %32 = vector.load %arg6[%c0_18, %c0_19, %c0_20, %c0_21] : memref<1x2x1x96xf32, #tpu.memory_space<vmem>>, vector<1x1x1x96xf32>
    %33 = vector.shape_cast %32 : vector<1x1x1x96xf32> to vector<1x96xf32>
    %34 = vector.broadcast %33 : vector<1x96xf32> to vector<16x96xf32>
    %35 = arith.addf %31, %34 : vector<16x96xf32>
    %36 = vector.extract_strided_slice %35 {offsets = [0, 0], sizes = [16, 16], strides = [1, 1]} : vector<16x96xf32> to vector<16x16xf32>
    %37 = vector.shape_cast %36 : vector<16x16xf32> to vector<2x8x16xf32>
    %38 = vector.extract_strided_slice %35 {offsets = [0, 32], sizes = [16, 16], strides = [1, 1]} : vector<16x96xf32> to vector<16x16xf32>
    %39 = vector.shape_cast %38 : vector<16x16xf32> to vector<2x8x16xf32>
    %40 = vector.extract_strided_slice %35 {offsets = [0, 64], sizes = [16, 16], strides = [1, 1]} : vector<16x96xf32> to vector<16x16xf32>
    %41 = vector.shape_cast %40 : vector<16x16xf32> to vector<2x8x16xf32>
    "tpu.trace_start"() <{level = 10 : i32, message = "bqd,bkd->bqk"}> : () -> ()
    %cst_22 = arith.constant dense<0.000000e+00> : vector<2x8x8xf32>
    %42 = tpu.matmul %37, %39, %cst_22 {dimension_numbers = #tpu.dot_dimension_numbers<[2], [2], [1], [1], [0, 0, 0, 1, 1, 1], [0], [0]>} : vector<2x8x16xf32>, vector<2x8x16xf32>, vector<2x8x8xf32> -> vector<2x8x8xf32>
    "tpu.trace_stop"() : () -> ()
    %cst_23 = arith.constant 2.500000e-01 : f32
    %43 = vector.broadcast %cst_23 : f32 to vector<2x8x8xf32>
    %44 = arith.mulf %42, %43 : vector<2x8x8xf32>
    %c0_24 = arith.constant 0 : index
    %c0_25 = arith.constant 0 : index
    %c0_26 = arith.constant 0 : index
    %c0_27 = arith.constant 0 : index
    %c0_28 = arith.constant 0 : index
    %45 = vector.load %arg2[%c0_24, %c0_25, %c0_26, %c0_27, %c0_28] : memref<1x2x2x8x8xf32, #tpu.memory_space<vmem>>, vector<1x1x2x8x8xf32>
    %46 = vector.shape_cast %45 : vector<1x1x2x8x8xf32> to vector<2x8x8xf32>
    %47 = arith.addf %44, %46 : vector<2x8x8xf32>
    %cst_29 = arith.constant dense<0xFF800000> : vector<2x8xf32>
    %48 = vector.multi_reduction <maximumf>, %47, %cst_29 [2] : vector<2x8x8xf32> to vector<2x8xf32>
    %49 = vector.shape_cast %48 : vector<2x8xf32> to vector<2x8x1xf32>
    %50 = vector.broadcast %49 : vector<2x8x1xf32> to vector<2x8x8xf32>
    %51 = arith.subf %47, %50 : vector<2x8x8xf32>
    %52 = math.exp %51 : vector<2x8x8xf32>
    %cst_30 = arith.constant dense<0.000000e+00> : vector<2x8xf32>
    %53 = vector.multi_reduction <add>, %52, %cst_30 [2] : vector<2x8x8xf32> to vector<2x8xf32>
    %54 = vector.shape_cast %53 : vector<2x8xf32> to vector<2x8x1xf32>
    %55 = tpu.reciprocal %54 {approx = true} : vector<2x8x1xf32> -> vector<2x8x1xf32>
    %56 = vector.broadcast %55 : vector<2x8x1xf32> to vector<2x8x8xf32>
    %57 = arith.mulf %52, %56 : vector<2x8x8xf32>
    "tpu.trace_start"() <{level = 10 : i32, message = "bqk,bkd->bqd"}> : () -> ()
    %cst_31 = arith.constant dense<0.000000e+00> : vector<2x8x16xf32>
    %58 = tpu.matmul %57, %41, %cst_31 {dimension_numbers = #tpu.dot_dimension_numbers<[2], [1], [1], [2], [0, 0, 0, 1, 1, 2], [0], [0]>} : vector<2x8x8xf32>, vector<2x8x16xf32>, vector<2x8x16xf32> -> vector<2x8x16xf32>
    "tpu.trace_stop"() : () -> ()
    %59 = vector.extract_strided_slice %35 {offsets = [0, 16], sizes = [16, 16], strides = [1, 1]} : vector<16x96xf32> to vector<16x16xf32>
    %60 = vector.shape_cast %59 : vector<16x16xf32> to vector<2x8x16xf32>
    %61 = vector.extract_strided_slice %35 {offsets = [0, 48], sizes = [16, 16], strides = [1, 1]} : vector<16x96xf32> to vector<16x16xf32>
    %62 = vector.shape_cast %61 : vector<16x16xf32> to vector<2x8x16xf32>
    %63 = vector.extract_strided_slice %35 {offsets = [0, 80], sizes = [16, 16], strides = [1, 1]} : vector<16x96xf32> to vector<16x16xf32>
    %64 = vector.shape_cast %63 : vector<16x16xf32> to vector<2x8x16xf32>
    "tpu.trace_start"() <{level = 10 : i32, message = "bqd,bkd->bqk"}> : () -> ()
    %cst_32 = arith.constant dense<0.000000e+00> : vector<2x8x8xf32>
    %65 = tpu.matmul %60, %62, %cst_32 {dimension_numbers = #tpu.dot_dimension_numbers<[2], [2], [1], [1], [0, 0, 0, 1, 1, 1], [0], [0]>} : vector<2x8x16xf32>, vector<2x8x16xf32>, vector<2x8x8xf32> -> vector<2x8x8xf32>
    "tpu.trace_stop"() : () -> ()
    %cst_33 = arith.constant 2.500000e-01 : f32
    %66 = vector.broadcast %cst_33 : f32 to vector<2x8x8xf32>
    %67 = arith.mulf %65, %66 : vector<2x8x8xf32>
    %c0_34 = arith.constant 0 : index
    %c1 = arith.constant 1 : index
    %c0_35 = arith.constant 0 : index
    %c0_36 = arith.constant 0 : index
    %c0_37 = arith.constant 0 : index
    %68 = vector.load %arg2[%c0_34, %c1, %c0_35, %c0_36, %c0_37] : memref<1x2x2x8x8xf32, #tpu.memory_space<vmem>>, vector<1x1x2x8x8xf32>
    %69 = vector.shape_cast %68 : vector<1x1x2x8x8xf32> to vector<2x8x8xf32>
    %70 = arith.addf %67, %69 : vector<2x8x8xf32>
    %cst_38 = arith.constant dense<0xFF800000> : vector<2x8xf32>
    %71 = vector.multi_reduction <maximumf>, %70, %cst_38 [2] : vector<2x8x8xf32> to vector<2x8xf32>
    %72 = vector.shape_cast %71 : vector<2x8xf32> to vector<2x8x1xf32>
    %73 = vector.broadcast %72 : vector<2x8x1xf32> to vector<2x8x8xf32>
    %74 = arith.subf %70, %73 : vector<2x8x8xf32>
    %75 = math.exp %74 : vector<2x8x8xf32>
    %cst_39 = arith.constant dense<0.000000e+00> : vector<2x8xf32>
    %76 = vector.multi_reduction <add>, %75, %cst_39 [2] : vector<2x8x8xf32> to vector<2x8xf32>
    %77 = vector.shape_cast %76 : vector<2x8xf32> to vector<2x8x1xf32>
    %78 = tpu.reciprocal %77 {approx = true} : vector<2x8x1xf32> -> vector<2x8x1xf32>
    %79 = vector.broadcast %78 : vector<2x8x1xf32> to vector<2x8x8xf32>
    %80 = arith.mulf %75, %79 : vector<2x8x8xf32>
    "tpu.trace_start"() <{level = 10 : i32, message = "bqk,bkd->bqd"}> : () -> ()
    %cst_40 = arith.constant dense<0.000000e+00> : vector<2x8x16xf32>
    %81 = tpu.matmul %80, %64, %cst_40 {dimension_numbers = #tpu.dot_dimension_numbers<[2], [1], [1], [2], [0, 0, 0, 1, 1, 2], [0], [0]>} : vector<2x8x8xf32>, vector<2x8x16xf32>, vector<2x8x16xf32> -> vector<2x8x16xf32>
    "tpu.trace_stop"() : () -> ()
    %82 = tpu.concatenate %58, %81 in 2 : vector<2x8x16xf32>, vector<2x8x16xf32> -> vector<2x8x32xf32>
    %83 = vector.shape_cast %82 : vector<2x8x32xf32> to vector<16x32xf32>
    %c0_41 = arith.constant 0 : index
    %c0_42 = arith.constant 0 : index
    %c0_43 = arith.constant 0 : index
    %c0_44 = arith.constant 0 : index
    %84 = vector.load %arg7[%c0_41, %c0_42, %c0_43, %c0_44] : memref<1x2x32x32xf32, #tpu.memory_space<vmem>>, vector<1x1x32x32xf32>
    %85 = vector.shape_cast %84 : vector<1x1x32x32xf32> to vector<32x32xf32>
    %cst_45 = arith.constant dense<0.000000e+00> : vector<16x32xf32>
    %86 = tpu.matmul %83, %85, %cst_45 {dimension_numbers = #tpu.dot_dimension_numbers<[1], [0], [0], [1], [0, 0, 1, 1], [], []>} : vector<16x32xf32>, vector<32x32xf32>, vector<16x32xf32> -> vector<16x32xf32>
    %c0_46 = arith.constant 0 : index
    %c0_47 = arith.constant 0 : index
    %c0_48 = arith.constant 0 : index
    %c0_49 = arith.constant 0 : index
    %87 = vector.load %arg8[%c0_46, %c0_47, %c0_48, %c0_49] : memref<1x2x1x32xf32, #tpu.memory_space<vmem>>, vector<1x1x1x32xf32>
    %88 = vector.shape_cast %87 : vector<1x1x1x32xf32> to vector<1x32xf32>
    %89 = vector.broadcast %88 : vector<1x32xf32> to vector<16x32xf32>
    %90 = arith.addf %86, %89 : vector<16x32xf32>
    %91 = arith.addf %90, %28 : vector<16x32xf32>
    %c0_50 = arith.constant 0 : index
    %c0_51 = arith.constant 0 : index
    %c0_52 = arith.constant 0 : index
    %c0_53 = arith.constant 0 : index
    %92 = vector.load %arg9[%c0_50, %c0_51, %c0_52, %c0_53] : memref<1x2x1x32xf32, #tpu.memory_space<vmem>>, vector<1x1x1x32xf32>
    %93 = vector.shape_cast %92 : vector<1x1x1x32xf32> to vector<1x32xf32>
    %c0_54 = arith.constant 0 : index
    %c0_55 = arith.constant 0 : index
    %c0_56 = arith.constant 0 : index
    %c0_57 = arith.constant 0 : index
    %94 = vector.load %arg10[%c0_54, %c0_55, %c0_56, %c0_57] : memref<1x2x1x32xf32, #tpu.memory_space<vmem>>, vector<1x1x1x32xf32>
    %95 = vector.shape_cast %94 : vector<1x1x1x32xf32> to vector<1x32xf32>
    %cst_58 = arith.constant dense<0.000000e+00> : vector<16xf32>
    %96 = vector.multi_reduction <add>, %91, %cst_58 [1] : vector<16x32xf32> to vector<16xf32>
    %97 = vector.shape_cast %96 : vector<16xf32> to vector<16x1xf32>
    %cst_59 = arith.constant 3.200000e+01 : f32
    %98 = vector.broadcast %cst_59 : f32 to vector<16x1xf32>
    %99 = arith.divf %97, %98 : vector<16x1xf32>
    %100 = vector.broadcast %99 : vector<16x1xf32> to vector<16x32xf32>
    %101 = arith.subf %91, %100 : vector<16x32xf32>
    %102 = arith.mulf %101, %101 : vector<16x32xf32>
    %cst_60 = arith.constant dense<0.000000e+00> : vector<16xf32>
    %103 = vector.multi_reduction <add>, %102, %cst_60 [1] : vector<16x32xf32> to vector<16xf32>
    %104 = vector.shape_cast %103 : vector<16xf32> to vector<16x1xf32>
    %cst_61 = arith.constant 3.200000e+01 : f32
    %105 = vector.broadcast %cst_61 : f32 to vector<16x1xf32>
    %106 = arith.divf %104, %105 : vector<16x1xf32>
    %107 = vector.broadcast %99 : vector<16x1xf32> to vector<16x32xf32>
    %108 = arith.subf %91, %107 : vector<16x32xf32>
    %cst_62 = arith.constant 9.99999996E-13 : f32
    %109 = vector.broadcast %cst_62 : f32 to vector<16x1xf32>
    %110 = arith.addf %106, %109 : vector<16x1xf32>
    %111 = math.rsqrt %110 : vector<16x1xf32>
    %112 = vector.broadcast %111 : vector<16x1xf32> to vector<16x32xf32>
    %113 = arith.mulf %108, %112 : vector<16x32xf32>
    %114 = vector.broadcast %93 : vector<1x32xf32> to vector<16x32xf32>
    %115 = arith.mulf %113, %114 : vector<16x32xf32>
    %116 = vector.broadcast %95 : vector<1x32xf32> to vector<16x32xf32>
    %117 = arith.addf %115, %116 : vector<16x32xf32>
    %c0_63 = arith.constant 0 : index
    %c0_64 = arith.constant 0 : index
    %c0_65 = arith.constant 0 : index
    %c0_66 = arith.constant 0 : index
    %118 = vector.load %arg11[%c0_63, %c0_64, %c0_65, %c0_66] : memref<1x2x32x64xf32, #tpu.memory_space<vmem>>, vector<1x1x32x64xf32>
    %119 = vector.shape_cast %118 : vector<1x1x32x64xf32> to vector<32x64xf32>
    %cst_67 = arith.constant dense<0.000000e+00> : vector<16x64xf32>
    %120 = tpu.matmul %117, %119, %cst_67 {dimension_numbers = #tpu.dot_dimension_numbers<[1], [0], [0], [1], [0, 0, 1, 1], [], []>} : vector<16x32xf32>, vector<32x64xf32>, vector<16x64xf32> -> vector<16x64xf32>
    %c0_68 = arith.constant 0 : index
    %c0_69 = arith.constant 0 : index
    %c0_70 = arith.constant 0 : index
    %c0_71 = arith.constant 0 : index
    %121 = vector.load %arg12[%c0_68, %c0_69, %c0_70, %c0_71] : memref<1x2x1x64xf32, #tpu.memory_space<vmem>>, vector<1x1x1x64xf32>
    %122 = vector.shape_cast %121 : vector<1x1x1x64xf32> to vector<1x64xf32>
    %123 = vector.broadcast %122 : vector<1x64xf32> to vector<16x64xf32>
    %124 = arith.addf %120, %123 : vector<16x64xf32>
    %cst_72 = arith.constant 5.000000e-01 : f32
    %125 = vector.broadcast %cst_72 : f32 to vector<16x64xf32>
    %126 = arith.mulf %125, %124 : vector<16x64xf32>
    %cst_73 = arith.constant 4.471500e-02 : f32
    %127 = vector.broadcast %cst_73 : f32 to vector<16x64xf32>
    %128 = arith.mulf %127, %124 : vector<16x64xf32>
    %129 = arith.mulf %128, %124 : vector<16x64xf32>
    %130 = arith.mulf %129, %124 : vector<16x64xf32>
    %131 = arith.addf %124, %130 : vector<16x64xf32>
    %cst_74 = arith.constant 0.797884583 : f32
    %132 = vector.broadcast %cst_74 : f32 to vector<16x64xf32>
    %133 = arith.mulf %132, %131 : vector<16x64xf32>
    %134 = math.tanh %133 : vector<16x64xf32>
    %cst_75 = arith.constant 1.000000e+00 : f32
    %135 = vector.broadcast %cst_75 : f32 to vector<16x64xf32>
    %136 = arith.addf %135, %134 : vector<16x64xf32>
    %137 = arith.mulf %126, %136 : vector<16x64xf32>
    %c0_76 = arith.constant 0 : index
    %c0_77 = arith.constant 0 : index
    %c0_78 = arith.constant 0 : index
    %c0_79 = arith.constant 0 : index
    %138 = vector.load %arg13[%c0_76, %c0_77, %c0_78, %c0_79] : memref<1x2x64x32xf32, #tpu.memory_space<vmem>>, vector<1x1x64x32xf32>
    %139 = vector.shape_cast %138 : vector<1x1x64x32xf32> to vector<64x32xf32>
    %cst_80 = arith.constant dense<0.000000e+00> : vector<16x32xf32>
    %140 = tpu.matmul %137, %139, %cst_80 {dimension_numbers = #tpu.dot_dimension_numbers<[1], [0], [0], [1], [0, 0, 1, 1], [], []>} : vector<16x64xf32>, vector<64x32xf32>, vector<16x32xf32> -> vector<16x32xf32>
    %c0_81 = arith.constant 0 : index
    %c0_82 = arith.constant 0 : index
    %c0_83 = arith.constant 0 : index
    %c0_84 = arith.constant 0 : index
    %141 = vector.load %arg14[%c0_81, %c0_82, %c0_83, %c0_84] : memref<1x2x1x32xf32, #tpu.memory_space<vmem>>, vector<1x1x1x32xf32>
    %142 = vector.shape_cast %141 : vector<1x1x1x32xf32> to vector<1x32xf32>
    %143 = vector.broadcast %142 : vector<1x32xf32> to vector<16x32xf32>
    %144 = arith.addf %140, %143 : vector<16x32xf32>
    %145 = arith.addf %144, %117 : vector<16x32xf32>
    %c0_85 = arith.constant 0 : index
    %c0_86 = arith.constant 0 : index
    %c0_87 = arith.constant 0 : index
    %c0_88 = arith.constant 0 : index
    %146 = vector.load %arg15[%c0_85, %c0_86, %c0_87, %c0_88] : memref<1x2x1x32xf32, #tpu.memory_space<vmem>>, vector<1x1x1x32xf32>
    %147 = vector.shape_cast %146 : vector<1x1x1x32xf32> to vector<1x32xf32>
    %c0_89 = arith.constant 0 : index
    %c0_90 = arith.constant 0 : index
    %c0_91 = arith.constant 0 : index
    %c0_92 = arith.constant 0 : index
    %148 = vector.load %arg16[%c0_89, %c0_90, %c0_91, %c0_92] : memref<1x2x1x32xf32, #tpu.memory_space<vmem>>, vector<1x1x1x32xf32>
    %149 = vector.shape_cast %148 : vector<1x1x1x32xf32> to vector<1x32xf32>
    %cst_93 = arith.constant dense<0.000000e+00> : vector<16xf32>
    %150 = vector.multi_reduction <add>, %145, %cst_93 [1] : vector<16x32xf32> to vector<16xf32>
    %151 = vector.shape_cast %150 : vector<16xf32> to vector<16x1xf32>
    %cst_94 = arith.constant 3.200000e+01 : f32
    %152 = vector.broadcast %cst_94 : f32 to vector<16x1xf32>
    %153 = arith.divf %151, %152 : vector<16x1xf32>
    %154 = vector.broadcast %153 : vector<16x1xf32> to vector<16x32xf32>
    %155 = arith.subf %145, %154 : vector<16x32xf32>
    %156 = arith.mulf %155, %155 : vector<16x32xf32>
    %cst_95 = arith.constant dense<0.000000e+00> : vector<16xf32>
    %157 = vector.multi_reduction <add>, %156, %cst_95 [1] : vector<16x32xf32> to vector<16xf32>
    %158 = vector.shape_cast %157 : vector<16xf32> to vector<16x1xf32>
    %cst_96 = arith.constant 3.200000e+01 : f32
    %159 = vector.broadcast %cst_96 : f32 to vector<16x1xf32>
    %160 = arith.divf %158, %159 : vector<16x1xf32>
    %161 = vector.broadcast %153 : vector<16x1xf32> to vector<16x32xf32>
    %162 = arith.subf %145, %161 : vector<16x32xf32>
    %cst_97 = arith.constant 9.99999996E-13 : f32
    %163 = vector.broadcast %cst_97 : f32 to vector<16x1xf32>
    %164 = arith.addf %160, %163 : vector<16x1xf32>
    %165 = math.rsqrt %164 : vector<16x1xf32>
    %166 = vector.broadcast %165 : vector<16x1xf32> to vector<16x32xf32>
    %167 = arith.mulf %162, %166 : vector<16x32xf32>
    %168 = vector.broadcast %147 : vector<1x32xf32> to vector<16x32xf32>
    %169 = arith.mulf %167, %168 : vector<16x32xf32>
    %170 = vector.broadcast %149 : vector<1x32xf32> to vector<16x32xf32>
    %171 = arith.addf %169, %170 : vector<16x32xf32>
    %c0_98 = arith.constant 0 : index
    %c1_99 = arith.constant 1 : index
    %c0_100 = arith.constant 0 : index
    %c0_101 = arith.constant 0 : index
    %172 = vector.load %arg5[%c0_98, %c1_99, %c0_100, %c0_101] : memref<1x2x32x96xf32, #tpu.memory_space<vmem>>, vector<1x1x32x96xf32>
    %173 = vector.shape_cast %172 : vector<1x1x32x96xf32> to vector<32x96xf32>
    %cst_102 = arith.constant dense<0.000000e+00> : vector<16x96xf32>
    %174 = tpu.matmul %171, %173, %cst_102 {dimension_numbers = #tpu.dot_dimension_numbers<[1], [0], [0], [1], [0, 0, 1, 1], [], []>} : vector<16x32xf32>, vector<32x96xf32>, vector<16x96xf32> -> vector<16x96xf32>
    %c0_103 = arith.constant 0 : index
    %c1_104 = arith.constant 1 : index
    %c0_105 = arith.constant 0 : index
    %c0_106 = arith.constant 0 : index
    %175 = vector.load %arg6[%c0_103, %c1_104, %c0_105, %c0_106] : memref<1x2x1x96xf32, #tpu.memory_space<vmem>>, vector<1x1x1x96xf32>
    %176 = vector.shape_cast %175 : vector<1x1x1x96xf32> to vector<1x96xf32>
    %177 = vector.broadcast %176 : vector<1x96xf32> to vector<16x96xf32>
    %178 = arith.addf %174, %177 : vector<16x96xf32>
    %179 = vector.extract_strided_slice %178 {offsets = [0, 0], sizes = [16, 16], strides = [1, 1]} : vector<16x96xf32> to vector<16x16xf32>
    %180 = vector.shape_cast %179 : vector<16x16xf32> to vector<2x8x16xf32>
    %181 = vector.extract_strided_slice %178 {offsets = [0, 32], sizes = [16, 16], strides = [1, 1]} : vector<16x96xf32> to vector<16x16xf32>
    %182 = vector.shape_cast %181 : vector<16x16xf32> to vector<2x8x16xf32>
    %183 = vector.extract_strided_slice %178 {offsets = [0, 64], sizes = [16, 16], strides = [1, 1]} : vector<16x96xf32> to vector<16x16xf32>
    %184 = vector.shape_cast %183 : vector<16x16xf32> to vector<2x8x16xf32>
    "tpu.trace_start"() <{level = 10 : i32, message = "bqd,bkd->bqk"}> : () -> ()
    %cst_107 = arith.constant dense<0.000000e+00> : vector<2x8x8xf32>
    %185 = tpu.matmul %180, %182, %cst_107 {dimension_numbers = #tpu.dot_dimension_numbers<[2], [2], [1], [1], [0, 0, 0, 1, 1, 1], [0], [0]>} : vector<2x8x16xf32>, vector<2x8x16xf32>, vector<2x8x8xf32> -> vector<2x8x8xf32>
    "tpu.trace_stop"() : () -> ()
    %cst_108 = arith.constant 2.500000e-01 : f32
    %186 = vector.broadcast %cst_108 : f32 to vector<2x8x8xf32>
    %187 = arith.mulf %185, %186 : vector<2x8x8xf32>
    %c0_109 = arith.constant 0 : index
    %c0_110 = arith.constant 0 : index
    %c0_111 = arith.constant 0 : index
    %c0_112 = arith.constant 0 : index
    %c0_113 = arith.constant 0 : index
    %188 = vector.load %arg2[%c0_109, %c0_110, %c0_111, %c0_112, %c0_113] : memref<1x2x2x8x8xf32, #tpu.memory_space<vmem>>, vector<1x1x2x8x8xf32>
    %189 = vector.shape_cast %188 : vector<1x1x2x8x8xf32> to vector<2x8x8xf32>
    %190 = arith.addf %187, %189 : vector<2x8x8xf32>
    %cst_114 = arith.constant dense<0xFF800000> : vector<2x8xf32>
    %191 = vector.multi_reduction <maximumf>, %190, %cst_114 [2] : vector<2x8x8xf32> to vector<2x8xf32>
    %192 = vector.shape_cast %191 : vector<2x8xf32> to vector<2x8x1xf32>
    %193 = vector.broadcast %192 : vector<2x8x1xf32> to vector<2x8x8xf32>
    %194 = arith.subf %190, %193 : vector<2x8x8xf32>
    %195 = math.exp %194 : vector<2x8x8xf32>
    %cst_115 = arith.constant dense<0.000000e+00> : vector<2x8xf32>
    %196 = vector.multi_reduction <add>, %195, %cst_115 [2] : vector<2x8x8xf32> to vector<2x8xf32>
    %197 = vector.shape_cast %196 : vector<2x8xf32> to vector<2x8x1xf32>
    %198 = tpu.reciprocal %197 {approx = true} : vector<2x8x1xf32> -> vector<2x8x1xf32>
    %199 = vector.broadcast %198 : vector<2x8x1xf32> to vector<2x8x8xf32>
    %200 = arith.mulf %195, %199 : vector<2x8x8xf32>
    "tpu.trace_start"() <{level = 10 : i32, message = "bqk,bkd->bqd"}> : () -> ()
    %cst_116 = arith.constant dense<0.000000e+00> : vector<2x8x16xf32>
    %201 = tpu.matmul %200, %184, %cst_116 {dimension_numbers = #tpu.dot_dimension_numbers<[2], [1], [1], [2], [0, 0, 0, 1, 1, 2], [0], [0]>} : vector<2x8x8xf32>, vector<2x8x16xf32>, vector<2x8x16xf32> -> vector<2x8x16xf32>
    "tpu.trace_stop"() : () -> ()
    %202 = vector.extract_strided_slice %178 {offsets = [0, 16], sizes = [16, 16], strides = [1, 1]} : vector<16x96xf32> to vector<16x16xf32>
    %203 = vector.shape_cast %202 : vector<16x16xf32> to vector<2x8x16xf32>
    %204 = vector.extract_strided_slice %178 {offsets = [0, 48], sizes = [16, 16], strides = [1, 1]} : vector<16x96xf32> to vector<16x16xf32>
    %205 = vector.shape_cast %204 : vector<16x16xf32> to vector<2x8x16xf32>
    %206 = vector.extract_strided_slice %178 {offsets = [0, 80], sizes = [16, 16], strides = [1, 1]} : vector<16x96xf32> to vector<16x16xf32>
    %207 = vector.shape_cast %206 : vector<16x16xf32> to vector<2x8x16xf32>
    "tpu.trace_start"() <{level = 10 : i32, message = "bqd,bkd->bqk"}> : () -> ()
    %cst_117 = arith.constant dense<0.000000e+00> : vector<2x8x8xf32>
    %208 = tpu.matmul %203, %205, %cst_117 {dimension_numbers = #tpu.dot_dimension_numbers<[2], [2], [1], [1], [0, 0, 0, 1, 1, 1], [0], [0]>} : vector<2x8x16xf32>, vector<2x8x16xf32>, vector<2x8x8xf32> -> vector<2x8x8xf32>
    "tpu.trace_stop"() : () -> ()
    %cst_118 = arith.constant 2.500000e-01 : f32
    %209 = vector.broadcast %cst_118 : f32 to vector<2x8x8xf32>
    %210 = arith.mulf %208, %209 : vector<2x8x8xf32>
    %c0_119 = arith.constant 0 : index
    %c1_120 = arith.constant 1 : index
    %c0_121 = arith.constant 0 : index
    %c0_122 = arith.constant 0 : index
    %c0_123 = arith.constant 0 : index
    %211 = vector.load %arg2[%c0_119, %c1_120, %c0_121, %c0_122, %c0_123] : memref<1x2x2x8x8xf32, #tpu.memory_space<vmem>>, vector<1x1x2x8x8xf32>
    %212 = vector.shape_cast %211 : vector<1x1x2x8x8xf32> to vector<2x8x8xf32>
    %213 = arith.addf %210, %212 : vector<2x8x8xf32>
    %cst_124 = arith.constant dense<0xFF800000> : vector<2x8xf32>
    %214 = vector.multi_reduction <maximumf>, %213, %cst_124 [2] : vector<2x8x8xf32> to vector<2x8xf32>
    %215 = vector.shape_cast %214 : vector<2x8xf32> to vector<2x8x1xf32>
    %216 = vector.broadcast %215 : vector<2x8x1xf32> to vector<2x8x8xf32>
    %217 = arith.subf %213, %216 : vector<2x8x8xf32>
    %218 = math.exp %217 : vector<2x8x8xf32>
    %cst_125 = arith.constant dense<0.000000e+00> : vector<2x8xf32>
    %219 = vector.multi_reduction <add>, %218, %cst_125 [2] : vector<2x8x8xf32> to vector<2x8xf32>
    %220 = vector.shape_cast %219 : vector<2x8xf32> to vector<2x8x1xf32>
    %221 = tpu.reciprocal %220 {approx = true} : vector<2x8x1xf32> -> vector<2x8x1xf32>
    %222 = vector.broadcast %221 : vector<2x8x1xf32> to vector<2x8x8xf32>
    %223 = arith.mulf %218, %222 : vector<2x8x8xf32>
    "tpu.trace_start"() <{level = 10 : i32, message = "bqk,bkd->bqd"}> : () -> ()
    %cst_126 = arith.constant dense<0.000000e+00> : vector<2x8x16xf32>
    %224 = tpu.matmul %223, %207, %cst_126 {dimension_numbers = #tpu.dot_dimension_numbers<[2], [1], [1], [2], [0, 0, 0, 1, 1, 2], [0], [0]>} : vector<2x8x8xf32>, vector<2x8x16xf32>, vector<2x8x16xf32> -> vector<2x8x16xf32>
    "tpu.trace_stop"() : () -> ()
    %225 = tpu.concatenate %201, %224 in 2 : vector<2x8x16xf32>, vector<2x8x16xf32> -> vector<2x8x32xf32>
    %226 = vector.shape_cast %225 : vector<2x8x32xf32> to vector<16x32xf32>
    %c0_127 = arith.constant 0 : index
    %c1_128 = arith.constant 1 : index
    %c0_129 = arith.constant 0 : index
    %c0_130 = arith.constant 0 : index
    %227 = vector.load %arg7[%c0_127, %c1_128, %c0_129, %c0_130] : memref<1x2x32x32xf32, #tpu.memory_space<vmem>>, vector<1x1x32x32xf32>
    %228 = vector.shape_cast %227 : vector<1x1x32x32xf32> to vector<32x32xf32>
    %cst_131 = arith.constant dense<0.000000e+00> : vector<16x32xf32>
    %229 = tpu.matmul %226, %228, %cst_131 {dimension_numbers = #tpu.dot_dimension_numbers<[1], [0], [0], [1], [0, 0, 1, 1], [], []>} : vector<16x32xf32>, vector<32x32xf32>, vector<16x32xf32> -> vector<16x32xf32>
    %c0_132 = arith.constant 0 : index
    %c1_133 = arith.constant 1 : index
    %c0_134 = arith.constant 0 : index
    %c0_135 = arith.constant 0 : index
    %230 = vector.load %arg8[%c0_132, %c1_133, %c0_134, %c0_135] : memref<1x2x1x32xf32, #tpu.memory_space<vmem>>, vector<1x1x1x32xf32>
    %231 = vector.shape_cast %230 : vector<1x1x1x32xf32> to vector<1x32xf32>
    %232 = vector.broadcast %231 : vector<1x32xf32> to vector<16x32xf32>
    %233 = arith.addf %229, %232 : vector<16x32xf32>
    %234 = arith.addf %233, %171 : vector<16x32xf32>
    %c0_136 = arith.constant 0 : index
    %c1_137 = arith.constant 1 : index
    %c0_138 = arith.constant 0 : index
    %c0_139 = arith.constant 0 : index
    %235 = vector.load %arg9[%c0_136, %c1_137, %c0_138, %c0_139] : memref<1x2x1x32xf32, #tpu.memory_space<vmem>>, vector<1x1x1x32xf32>
    %236 = vector.shape_cast %235 : vector<1x1x1x32xf32> to vector<1x32xf32>
    %c0_140 = arith.constant 0 : index
    %c1_141 = arith.constant 1 : index
    %c0_142 = arith.constant 0 : index
    %c0_143 = arith.constant 0 : index
    %237 = vector.load %arg10[%c0_140, %c1_141, %c0_142, %c0_143] : memref<1x2x1x32xf32, #tpu.memory_space<vmem>>, vector<1x1x1x32xf32>
    %238 = vector.shape_cast %237 : vector<1x1x1x32xf32> to vector<1x32xf32>
    %cst_144 = arith.constant dense<0.000000e+00> : vector<16xf32>
    %239 = vector.multi_reduction <add>, %234, %cst_144 [1] : vector<16x32xf32> to vector<16xf32>
    %240 = vector.shape_cast %239 : vector<16xf32> to vector<16x1xf32>
    %cst_145 = arith.constant 3.200000e+01 : f32
    %241 = vector.broadcast %cst_145 : f32 to vector<16x1xf32>
    %242 = arith.divf %240, %241 : vector<16x1xf32>
    %243 = vector.broadcast %242 : vector<16x1xf32> to vector<16x32xf32>
    %244 = arith.subf %234, %243 : vector<16x32xf32>
    %245 = arith.mulf %244, %244 : vector<16x32xf32>
    %cst_146 = arith.constant dense<0.000000e+00> : vector<16xf32>
    %246 = vector.multi_reduction <add>, %245, %cst_146 [1] : vector<16x32xf32> to vector<16xf32>
    %247 = vector.shape_cast %246 : vector<16xf32> to vector<16x1xf32>
    %cst_147 = arith.constant 3.200000e+01 : f32
    %248 = vector.broadcast %cst_147 : f32 to vector<16x1xf32>
    %249 = arith.divf %247, %248 : vector<16x1xf32>
    %250 = vector.broadcast %242 : vector<16x1xf32> to vector<16x32xf32>
    %251 = arith.subf %234, %250 : vector<16x32xf32>
    %cst_148 = arith.constant 9.99999996E-13 : f32
    %252 = vector.broadcast %cst_148 : f32 to vector<16x1xf32>
    %253 = arith.addf %249, %252 : vector<16x1xf32>
    %254 = math.rsqrt %253 : vector<16x1xf32>
    %255 = vector.broadcast %254 : vector<16x1xf32> to vector<16x32xf32>
    %256 = arith.mulf %251, %255 : vector<16x32xf32>
    %257 = vector.broadcast %236 : vector<1x32xf32> to vector<16x32xf32>
    %258 = arith.mulf %256, %257 : vector<16x32xf32>
    %259 = vector.broadcast %238 : vector<1x32xf32> to vector<16x32xf32>
    %260 = arith.addf %258, %259 : vector<16x32xf32>
    %c0_149 = arith.constant 0 : index
    %c1_150 = arith.constant 1 : index
    %c0_151 = arith.constant 0 : index
    %c0_152 = arith.constant 0 : index
    %261 = vector.load %arg11[%c0_149, %c1_150, %c0_151, %c0_152] : memref<1x2x32x64xf32, #tpu.memory_space<vmem>>, vector<1x1x32x64xf32>
    %262 = vector.shape_cast %261 : vector<1x1x32x64xf32> to vector<32x64xf32>
    %cst_153 = arith.constant dense<0.000000e+00> : vector<16x64xf32>
    %263 = tpu.matmul %260, %262, %cst_153 {dimension_numbers = #tpu.dot_dimension_numbers<[1], [0], [0], [1], [0, 0, 1, 1], [], []>} : vector<16x32xf32>, vector<32x64xf32>, vector<16x64xf32> -> vector<16x64xf32>
    %c0_154 = arith.constant 0 : index
    %c1_155 = arith.constant 1 : index
    %c0_156 = arith.constant 0 : index
    %c0_157 = arith.constant 0 : index
    %264 = vector.load %arg12[%c0_154, %c1_155, %c0_156, %c0_157] : memref<1x2x1x64xf32, #tpu.memory_space<vmem>>, vector<1x1x1x64xf32>
    %265 = vector.shape_cast %264 : vector<1x1x1x64xf32> to vector<1x64xf32>
    %266 = vector.broadcast %265 : vector<1x64xf32> to vector<16x64xf32>
    %267 = arith.addf %263, %266 : vector<16x64xf32>
    %cst_158 = arith.constant 5.000000e-01 : f32
    %268 = vector.broadcast %cst_158 : f32 to vector<16x64xf32>
    %269 = arith.mulf %268, %267 : vector<16x64xf32>
    %cst_159 = arith.constant 4.471500e-02 : f32
    %270 = vector.broadcast %cst_159 : f32 to vector<16x64xf32>
    %271 = arith.mulf %270, %267 : vector<16x64xf32>
    %272 = arith.mulf %271, %267 : vector<16x64xf32>
    %273 = arith.mulf %272, %267 : vector<16x64xf32>
    %274 = arith.addf %267, %273 : vector<16x64xf32>
    %cst_160 = arith.constant 0.797884583 : f32
    %275 = vector.broadcast %cst_160 : f32 to vector<16x64xf32>
    %276 = arith.mulf %275, %274 : vector<16x64xf32>
    %277 = math.tanh %276 : vector<16x64xf32>
    %cst_161 = arith.constant 1.000000e+00 : f32
    %278 = vector.broadcast %cst_161 : f32 to vector<16x64xf32>
    %279 = arith.addf %278, %277 : vector<16x64xf32>
    %280 = arith.mulf %269, %279 : vector<16x64xf32>
    %c0_162 = arith.constant 0 : index
    %c1_163 = arith.constant 1 : index
    %c0_164 = arith.constant 0 : index
    %c0_165 = arith.constant 0 : index
    %281 = vector.load %arg13[%c0_162, %c1_163, %c0_164, %c0_165] : memref<1x2x64x32xf32, #tpu.memory_space<vmem>>, vector<1x1x64x32xf32>
    %282 = vector.shape_cast %281 : vector<1x1x64x32xf32> to vector<64x32xf32>
    %cst_166 = arith.constant dense<0.000000e+00> : vector<16x32xf32>
    %283 = tpu.matmul %280, %282, %cst_166 {dimension_numbers = #tpu.dot_dimension_numbers<[1], [0], [0], [1], [0, 0, 1, 1], [], []>} : vector<16x64xf32>, vector<64x32xf32>, vector<16x32xf32> -> vector<16x32xf32>
    %c0_167 = arith.constant 0 : index
    %c1_168 = arith.constant 1 : index
    %c0_169 = arith.constant 0 : index
    %c0_170 = arith.constant 0 : index
    %284 = vector.load %arg14[%c0_167, %c1_168, %c0_169, %c0_170] : memref<1x2x1x32xf32, #tpu.memory_space<vmem>>, vector<1x1x1x32xf32>
    %285 = vector.shape_cast %284 : vector<1x1x1x32xf32> to vector<1x32xf32>
    %286 = vector.broadcast %285 : vector<1x32xf32> to vector<16x32xf32>
    %287 = arith.addf %283, %286 : vector<16x32xf32>
    %288 = arith.addf %287, %260 : vector<16x32xf32>
    %c0_171 = arith.constant 0 : index
    %c1_172 = arith.constant 1 : index
    %c0_173 = arith.constant 0 : index
    %c0_174 = arith.constant 0 : index
    %289 = vector.load %arg15[%c0_171, %c1_172, %c0_173, %c0_174] : memref<1x2x1x32xf32, #tpu.memory_space<vmem>>, vector<1x1x1x32xf32>
    %290 = vector.shape_cast %289 : vector<1x1x1x32xf32> to vector<1x32xf32>
    %c0_175 = arith.constant 0 : index
    %c1_176 = arith.constant 1 : index
    %c0_177 = arith.constant 0 : index
    %c0_178 = arith.constant 0 : index
    %291 = vector.load %arg16[%c0_175, %c1_176, %c0_177, %c0_178] : memref<1x2x1x32xf32, #tpu.memory_space<vmem>>, vector<1x1x1x32xf32>
    %292 = vector.shape_cast %291 : vector<1x1x1x32xf32> to vector<1x32xf32>
    %cst_179 = arith.constant dense<0.000000e+00> : vector<16xf32>
    %293 = vector.multi_reduction <add>, %288, %cst_179 [1] : vector<16x32xf32> to vector<16xf32>
    %294 = vector.shape_cast %293 : vector<16xf32> to vector<16x1xf32>
    %cst_180 = arith.constant 3.200000e+01 : f32
    %295 = vector.broadcast %cst_180 : f32 to vector<16x1xf32>
    %296 = arith.divf %294, %295 : vector<16x1xf32>
    %297 = vector.broadcast %296 : vector<16x1xf32> to vector<16x32xf32>
    %298 = arith.subf %288, %297 : vector<16x32xf32>
    %299 = arith.mulf %298, %298 : vector<16x32xf32>
    %cst_181 = arith.constant dense<0.000000e+00> : vector<16xf32>
    %300 = vector.multi_reduction <add>, %299, %cst_181 [1] : vector<16x32xf32> to vector<16xf32>
    %301 = vector.shape_cast %300 : vector<16xf32> to vector<16x1xf32>
    %cst_182 = arith.constant 3.200000e+01 : f32
    %302 = vector.broadcast %cst_182 : f32 to vector<16x1xf32>
    %303 = arith.divf %301, %302 : vector<16x1xf32>
    %304 = vector.broadcast %296 : vector<16x1xf32> to vector<16x32xf32>
    %305 = arith.subf %288, %304 : vector<16x32xf32>
    %cst_183 = arith.constant 9.99999996E-13 : f32
    %306 = vector.broadcast %cst_183 : f32 to vector<16x1xf32>
    %307 = arith.addf %303, %306 : vector<16x1xf32>
    %308 = math.rsqrt %307 : vector<16x1xf32>
    %309 = vector.broadcast %308 : vector<16x1xf32> to vector<16x32xf32>
    %310 = arith.mulf %305, %309 : vector<16x32xf32>
    %311 = vector.broadcast %290 : vector<1x32xf32> to vector<16x32xf32>
    %312 = arith.mulf %310, %311 : vector<16x32xf32>
    %313 = vector.broadcast %292 : vector<1x32xf32> to vector<16x32xf32>
    %314 = arith.addf %312, %313 : vector<16x32xf32>
    %315 = vector.shape_cast %314 : vector<16x32xf32> to vector<2x8x32xf32>
    %c0_184 = arith.constant 0 : index
    %c0_185 = arith.constant 0 : index
    %c0_186 = arith.constant 0 : index
    %c0_187 = arith.constant 0 : index
    %316 = vector.load %arg17[%c0_184, %c0_185, %c0_186, %c0_187] : memref<1x2x8x32xf32, #tpu.memory_space<vmem>>, vector<1x2x8x32xf32>
    %317 = vector.shape_cast %316 : vector<1x2x8x32xf32> to vector<2x8x32xf32>
    %318 = vector.shape_cast %315 : vector<2x8x32xf32> to vector<1x2x8x32xf32>
    tpu.vector_store %arg17[%c0_184, %c0_185, %c0_186, %c0_187], %318 {strides = array<i32>} : memref<1x2x8x32xf32, #tpu.memory_space<vmem>>, vector<1x2x8x32xf32>,
    %c0_i32 = arith.constant 0 : i32
    %319 = arith.cmpi eq, %arg0, %c0_i32 : i32
    %320 = arith.extui %319 : i1 to i32
    %c0_i32_188 = arith.constant 0 : i32
    %321 = arith.cmpi ne, %320, %c0_i32_188 : i32
    scf.if %321 {
      %c0_189 = arith.constant 0 : index
      %c0_190 = arith.constant 0 : index
      %c0_191 = arith.constant 0 : index
      %c0_192 = arith.constant 0 : index
      %322 = vector.load %arg17[%c0_189, %c0_190, %c0_191, %c0_192] : memref<1x2x8x32xf32, #tpu.memory_space<vmem>>, vector<1x2x8x32xf32>
      %323 = vector.shape_cast %322 : vector<1x2x8x32xf32> to vector<2x8x32xf32>
      %324 = math.tanh %323 : vector<2x8x32xf32>
      %c0_193 = arith.constant 0 : index
      %c0_194 = arith.constant 0 : index
      %c0_195 = arith.constant 0 : index
      %c0_196 = arith.constant 0 : index
      %325 = vector.load %arg17[%c0_193, %c0_194, %c0_195, %c0_196] : memref<1x2x8x32xf32, #tpu.memory_space<vmem>>, vector<1x2x8x32xf32>
      %326 = vector.shape_cast %325 : vector<1x2x8x32xf32> to vector<2x8x32xf32>
      %327 = vector.shape_cast %324 : vector<2x8x32xf32> to vector<1x2x8x32xf32>
      tpu.vector_store %arg17[%c0_193, %c0_194, %c0_195, %c0_196], %327 {strides = array<i32>} : memref<1x2x8x32xf32, #tpu.memory_space<vmem>>, vector<1x2x8x32xf32>,
    } else {
    }
    return
  }
  func.func @transform_0(%arg0: i32) -> (i32, i32, i32, i32) {
    %c0_i32 = arith.constant 0 : i32
    %c0_i32_0 = arith.constant 0 : i32
    %c0_i32_1 = arith.constant 0 : i32
    %c0_i32_2 = arith.constant 0 : i32
    return %arg0, %c0_i32, %c0_i32_0, %c0_i32_1 : i32, i32, i32, i32
  }
  func.func @transform_1(%arg0: i32) -> (i32, i32, i32, i32, i32) {
    %c0_i32 = arith.constant 0 : i32
    %c0_i32_0 = arith.constant 0 : i32
    %c0_i32_1 = arith.constant 0 : i32
    %c0_i32_2 = arith.constant 0 : i32
    %c0_i32_3 = arith.constant 0 : i32
    return %arg0, %c0_i32, %c0_i32_0, %c0_i32_1, %c0_i32_2 : i32, i32, i32, i32, i32
  }
  func.func @transform_2(%arg0: i32) -> (i32, i32, i32) {
    %c0_i32 = arith.constant 0 : i32
    %c0_i32_0 = arith.constant 0 : i32
    %c0_i32_1 = arith.constant 0 : i32
    return %arg0, %c0_i32, %c0_i32_0 : i32, i32, i32
  }
  func.func @transform_3(%arg0: i32) -> (i32, i32, i32) {
    %c0_i32 = arith.constant 0 : i32
    %c0_i32_0 = arith.constant 0 : i32
    %c0_i32_1 = arith.constant 0 : i32
    return %arg0, %c0_i32, %c0_i32_0 : i32, i32, i32
  }
  func.func @transform_4(%arg0: i32) -> (i32, i32, i32, i32) {
    %c0_i32 = arith.constant 0 : i32
    %c0_i32_0 = arith.constant 0 : i32
    %c0_i32_1 = arith.constant 0 : i32
    %c0_i32_2 = arith.constant 0 : i32
    return %arg0, %c0_i32, %c0_i32_0, %c0_i32_1 : i32, i32, i32, i32
  }
  func.func @transform_5(%arg0: i32) -> (i32, i32, i32, i32) {
    %c0_i32 = arith.constant 0 : i32
    %c0_i32_0 = arith.constant 0 : i32
    %c0_i32_1 = arith.constant 0 : i32
    %c0_i32_2 = arith.constant 0 : i32
    return %arg0, %c0_i32, %c0_i32_0, %c0_i32_1 : i32, i32, i32, i32
  }
  func.func @transform_6(%arg0: i32) -> (i32, i32, i32, i32) {
    %c0_i32 = arith.constant 0 : i32
    %c0_i32_0 = arith.constant 0 : i32
    %c0_i32_1 = arith.constant 0 : i32
    %c0_i32_2 = arith.constant 0 : i32
    return %arg0, %c0_i32, %c0_i32_0, %c0_i32_1 : i32, i32, i32, i32
  }
  func.func @transform_7(%arg0: i32) -> (i32, i32, i32, i32) {
    %c0_i32 = arith.constant 0 : i32
    %c0_i32_0 = arith.constant 0 : i32
    %c0_i32_1 = arith.constant 0 : i32
    %c0_i32_2 = arith.constant 0 : i32
    return %arg0, %c0_i32, %c0_i32_0, %c0_i32_1 : i32, i32, i32, i32
  }
  func.func @transform_8(%arg0: i32) -> (i32, i32, i32, i32) {
    %c0_i32 = arith.constant 0 : i32
    %c0_i32_0 = arith.constant 0 : i32
    %c0_i32_1 = arith.constant 0 : i32
    %c0_i32_2 = arith.constant 0 : i32
    return %arg0, %c0_i32, %c0_i32_0, %c0_i32_1 : i32, i32, i32, i32
  }
  func.func @transform_9(%arg0: i32) -> (i32, i32, i32, i32) {
    %c0_i32 = arith.constant 0 : i32
    %c0_i32_0 = arith.constant 0 : i32
    %c0_i32_1 = arith.constant 0 : i32
    %c0_i32_2 = arith.constant 0 : i32
    return %arg0, %c0_i32, %c0_i32_0, %c0_i32_1 : i32, i32, i32, i32
  }
  func.func @transform_10(%arg0: i32) -> (i32, i32, i32, i32) {
    %c0_i32 = arith.constant 0 : i32
    %c0_i32_0 = arith.constant 0 : i32
    %c0_i32_1 = arith.constant 0 : i32
    %c0_i32_2 = arith.constant 0 : i32
    return %arg0, %c0_i32, %c0_i32_0, %c0_i32_1 : i32, i32, i32, i32
  }
  func.func @transform_11(%arg0: i32) -> (i32, i32, i32, i32) {
    %c0_i32 = arith.constant 0 : i32
    %c0_i32_0 = arith.constant 0 : i32
    %c0_i32_1 = arith.constant 0 : i32
    %c0_i32_2 = arith.constant 0 : i32
    return %arg0, %c0_i32, %c0_i32_0, %c0_i32_1 : i32, i32, i32, i32
  }
  func.func @transform_12(%arg0: i32) -> (i32, i32, i32, i32) {
    %c0_i32 = arith.constant 0 : i32
    %c0_i32_0 = arith.constant 0 : i32
    %c0_i32_1 = arith.constant 0 : i32
    %c0_i32_2 = arith.constant 0 : i32
    return %arg0, %c0_i32, %c0_i32_0, %c0_i32_1 : i32, i32, i32, i32
  }
  func.func @transform_13(%arg0: i32) -> (i32, i32, i32, i32) {
    %c0_i32 = arith.constant 0 : i32
    %c0_i32_0 = arith.constant 0 : i32
    %c0_i32_1 = arith.constant 0 : i32
    %c0_i32_2 = arith.constant 0 : i32
    return %arg0, %c0_i32, %c0_i32_0, %c0_i32_1 : i32, i32, i32, i32
  }
  func.func @transform_14(%arg0: i32) -> (i32, i32, i32, i32) {
    %c0_i32 = arith.constant 0 : i32
    %c0_i32_0 = arith.constant 0 : i32
    %c0_i32_1 = arith.constant 0 : i32
    %c0_i32_2 = arith.constant 0 : i32
    return %arg0, %c0_i32, %c0_i32_0, %c0_i32_1 : i32, i32, i32, i32
  }
  func.func @transform_15(%arg0: i32) -> (i32, i32, i32, i32) {
    %c0_i32 = arith.constant 0 : i32
    %c0_i32_0 = arith.constant 0 : i32
    %c0_i32_1 = arith.constant 0 : i32
    %c0_i32_2 = arith.constant 0 : i32
    return %arg0, %c0_i32, %c0_i32_0, %c0_i32_1 : i32, i32, i32, i32
  }
  func.func @transform_16(%arg0: i32) -> (i32, i32, i32, i32) {
    %c0_i32 = arith.constant 0 : i32
    %c0_i32_0 = arith.constant 0 : i32
    %c0_i32_1 = arith.constant 0 : i32
    %c0_i32_2 = arith.constant 0 : i32
    return %arg0, %c0_i32, %c0_i32_0, %c0_i32_1 : i32, i32, i32, i32
  }
}

module attributes {stable_mosaic.version = 11 : i64} {
  func.func @_head_kernel(%arg0: memref<2x8x32xf32, #tpu.memory_space<vmem>>, %arg1: memref<2x8x32xf32, #tpu.memory_space<vmem>>, %arg2: memref<2x8x1xf32, #tpu.memory_space<vmem>>, %arg3: memref<32x96xf32, #tpu.memory_space<vmem>>, %arg4: memref<1x96xf32, #tpu.memory_space<vmem>>, %arg5: memref<32x32xf32, #tpu.memory_space<vmem>>, %arg6: memref<1x32xf32, #tpu.memory_space<vmem>>, %arg7: memref<1x64xf32, #tpu.memory_space<vmem>>, %arg8: memref<64x32xf32, #tpu.memory_space<vmem>>, %arg9: memref<1x32xf32, #tpu.memory_space<vmem>>, %arg10: memref<64x32xf32, #tpu.memory_space<vmem>>, %arg11: memref<1x32xf32, #tpu.memory_space<vmem>>, %arg12: memref<32x32xf32, #tpu.memory_space<vmem>>, %arg13: memref<1x32xf32, #tpu.memory_space<vmem>>, %arg14: memref<64x32xf32, #tpu.memory_space<vmem>>, %arg15: memref<1x32xf32, #tpu.memory_space<vmem>>, %arg16: memref<32x3xf32, #tpu.memory_space<vmem>>, %arg17: memref<1x3xf32, #tpu.memory_space<vmem>>, %arg18: memref<2x3xf32, #tpu.memory_space<vmem>>, %arg19: memref<2x8xf32, #tpu.memory_space<vmem>>) attributes {dimension_semantics = [], scalar_prefetch = 0 : i64, scratch_operands = 0 : i64, tpu.core_type = #tpu.core_type<tc>} {
    %c0 = arith.constant 0 : index
    %c0_0 = arith.constant 0 : index
    %c0_1 = arith.constant 0 : index
    %0 = vector.load %arg1[%c0, %c0_0, %c0_1] : memref<2x8x32xf32, #tpu.memory_space<vmem>>, vector<2x8x32xf32>
    %c0_2 = arith.constant 0 : index
    %c0_3 = arith.constant 0 : index
    %c0_4 = arith.constant 0 : index
    %1 = vector.load %arg2[%c0_2, %c0_3, %c0_4] : memref<2x8x1xf32, #tpu.memory_space<vmem>>, vector<2x8x1xf32>
    %2 = vector.broadcast %1 : vector<2x8x1xf32> to vector<2x8x32xf32>
    %3 = arith.mulf %0, %2 : vector<2x8x32xf32>
    %4 = vector.shape_cast %3 : vector<2x8x32xf32> to vector<16x32xf32>
    %c0_5 = arith.constant 0 : index
    %c0_6 = arith.constant 0 : index
    %5 = vector.load %arg3[%c0_5, %c0_6] : memref<32x96xf32, #tpu.memory_space<vmem>>, vector<32x96xf32>
    %cst = arith.constant dense<0.000000e+00> : vector<16x96xf32>
    %6 = tpu.matmul %4, %5, %cst {dimension_numbers = #tpu.dot_dimension_numbers<[1], [0], [0], [1], [0, 0, 1, 1], [], []>} : vector<16x32xf32>, vector<32x96xf32>, vector<16x96xf32> -> vector<16x96xf32>
    %c0_7 = arith.constant 0 : index
    %c0_8 = arith.constant 0 : index
    %7 = vector.load %arg4[%c0_7, %c0_8] : memref<1x96xf32, #tpu.memory_space<vmem>>, vector<1x96xf32>
    %8 = vector.broadcast %7 : vector<1x96xf32> to vector<16x96xf32>
    %9 = arith.addf %6, %8 : vector<16x96xf32>
    %10 = vector.extract_strided_slice %9 {offsets = [0, 0], sizes = [1, 16], strides = [1, 1]} : vector<16x96xf32> to vector<1x16xf32>
    %11 = vector.extract_strided_slice %9 {offsets = [0, 32], sizes = [8, 16], strides = [1, 1]} : vector<16x96xf32> to vector<8x16xf32>
    %12 = vector.extract_strided_slice %9 {offsets = [0, 64], sizes = [8, 16], strides = [1, 1]} : vector<16x96xf32> to vector<8x16xf32>
    %cst_9 = arith.constant dense<0.000000e+00> : vector<1x8xf32>
    %13 = tpu.matmul %10, %11, %cst_9 {dimension_numbers = #tpu.dot_dimension_numbers<[1], [1], [0], [0], [0, 0, 1, 0], [], []>} : vector<1x16xf32>, vector<8x16xf32>, vector<1x8xf32> -> vector<1x8xf32>
    %cst_10 = arith.constant 2.500000e-01 : f32
    %14 = vector.broadcast %cst_10 : f32 to vector<1x8xf32>
    %15 = arith.mulf %13, %14 : vector<1x8xf32>
    %cst_11 = arith.constant dense<0xFF800000> : vector<1xf32>
    %16 = vector.multi_reduction <maximumf>, %15, %cst_11 [1] : vector<1x8xf32> to vector<1xf32>
    %17 = vector.shape_cast %16 : vector<1xf32> to vector<1x1xf32>
    %18 = vector.broadcast %17 : vector<1x1xf32> to vector<1x8xf32>
    %19 = arith.subf %15, %18 : vector<1x8xf32>
    %20 = math.exp %19 : vector<1x8xf32>
    %cst_12 = arith.constant dense<0.000000e+00> : vector<1xf32>
    %21 = vector.multi_reduction <add>, %20, %cst_12 [1] : vector<1x8xf32> to vector<1xf32>
    %22 = vector.shape_cast %21 : vector<1xf32> to vector<1x1xf32>
    %23 = tpu.reciprocal %22 {approx = true} : vector<1x1xf32> -> vector<1x1xf32>
    %24 = vector.broadcast %23 : vector<1x1xf32> to vector<1x8xf32>
    %25 = arith.mulf %20, %24 : vector<1x8xf32>
    %cst_13 = arith.constant dense<0.000000e+00> : vector<1x16xf32>
    %26 = tpu.matmul %25, %12, %cst_13 {dimension_numbers = #tpu.dot_dimension_numbers<[1], [0], [0], [1], [0, 0, 1, 1], [], []>} : vector<1x8xf32>, vector<8x16xf32>, vector<1x16xf32> -> vector<1x16xf32>
    %27 = vector.extract_strided_slice %9 {offsets = [0, 16], sizes = [1, 16], strides = [1, 1]} : vector<16x96xf32> to vector<1x16xf32>
    %28 = vector.extract_strided_slice %9 {offsets = [0, 48], sizes = [8, 16], strides = [1, 1]} : vector<16x96xf32> to vector<8x16xf32>
    %29 = vector.extract_strided_slice %9 {offsets = [0, 80], sizes = [8, 16], strides = [1, 1]} : vector<16x96xf32> to vector<8x16xf32>
    %cst_14 = arith.constant dense<0.000000e+00> : vector<1x8xf32>
    %30 = tpu.matmul %27, %28, %cst_14 {dimension_numbers = #tpu.dot_dimension_numbers<[1], [1], [0], [0], [0, 0, 1, 0], [], []>} : vector<1x16xf32>, vector<8x16xf32>, vector<1x8xf32> -> vector<1x8xf32>
    %cst_15 = arith.constant 2.500000e-01 : f32
    %31 = vector.broadcast %cst_15 : f32 to vector<1x8xf32>
    %32 = arith.mulf %30, %31 : vector<1x8xf32>
    %cst_16 = arith.constant dense<0xFF800000> : vector<1xf32>
    %33 = vector.multi_reduction <maximumf>, %32, %cst_16 [1] : vector<1x8xf32> to vector<1xf32>
    %34 = vector.shape_cast %33 : vector<1xf32> to vector<1x1xf32>
    %35 = vector.broadcast %34 : vector<1x1xf32> to vector<1x8xf32>
    %36 = arith.subf %32, %35 : vector<1x8xf32>
    %37 = math.exp %36 : vector<1x8xf32>
    %cst_17 = arith.constant dense<0.000000e+00> : vector<1xf32>
    %38 = vector.multi_reduction <add>, %37, %cst_17 [1] : vector<1x8xf32> to vector<1xf32>
    %39 = vector.shape_cast %38 : vector<1xf32> to vector<1x1xf32>
    %40 = tpu.reciprocal %39 {approx = true} : vector<1x1xf32> -> vector<1x1xf32>
    %41 = vector.broadcast %40 : vector<1x1xf32> to vector<1x8xf32>
    %42 = arith.mulf %37, %41 : vector<1x8xf32>
    %cst_18 = arith.constant dense<0.000000e+00> : vector<1x16xf32>
    %43 = tpu.matmul %42, %29, %cst_18 {dimension_numbers = #tpu.dot_dimension_numbers<[1], [0], [0], [1], [0, 0, 1, 1], [], []>} : vector<1x8xf32>, vector<8x16xf32>, vector<1x16xf32> -> vector<1x16xf32>
    %44 = tpu.concatenate %26, %43 in 1 : vector<1x16xf32>, vector<1x16xf32> -> vector<1x32xf32>
    %45 = vector.extract_strided_slice %9 {offsets = [8, 0], sizes = [1, 16], strides = [1, 1]} : vector<16x96xf32> to vector<1x16xf32>
    %46 = vector.extract_strided_slice %9 {offsets = [8, 32], sizes = [8, 16], strides = [1, 1]} : vector<16x96xf32> to vector<8x16xf32>
    %47 = vector.extract_strided_slice %9 {offsets = [8, 64], sizes = [8, 16], strides = [1, 1]} : vector<16x96xf32> to vector<8x16xf32>
    %cst_19 = arith.constant dense<0.000000e+00> : vector<1x8xf32>
    %48 = tpu.matmul %45, %46, %cst_19 {dimension_numbers = #tpu.dot_dimension_numbers<[1], [1], [0], [0], [0, 0, 1, 0], [], []>} : vector<1x16xf32>, vector<8x16xf32>, vector<1x8xf32> -> vector<1x8xf32>
    %cst_20 = arith.constant 2.500000e-01 : f32
    %49 = vector.broadcast %cst_20 : f32 to vector<1x8xf32>
    %50 = arith.mulf %48, %49 : vector<1x8xf32>
    %cst_21 = arith.constant dense<0xFF800000> : vector<1xf32>
    %51 = vector.multi_reduction <maximumf>, %50, %cst_21 [1] : vector<1x8xf32> to vector<1xf32>
    %52 = vector.shape_cast %51 : vector<1xf32> to vector<1x1xf32>
    %53 = vector.broadcast %52 : vector<1x1xf32> to vector<1x8xf32>
    %54 = arith.subf %50, %53 : vector<1x8xf32>
    %55 = math.exp %54 : vector<1x8xf32>
    %cst_22 = arith.constant dense<0.000000e+00> : vector<1xf32>
    %56 = vector.multi_reduction <add>, %55, %cst_22 [1] : vector<1x8xf32> to vector<1xf32>
    %57 = vector.shape_cast %56 : vector<1xf32> to vector<1x1xf32>
    %58 = tpu.reciprocal %57 {approx = true} : vector<1x1xf32> -> vector<1x1xf32>
    %59 = vector.broadcast %58 : vector<1x1xf32> to vector<1x8xf32>
    %60 = arith.mulf %55, %59 : vector<1x8xf32>
    %cst_23 = arith.constant dense<0.000000e+00> : vector<1x16xf32>
    %61 = tpu.matmul %60, %47, %cst_23 {dimension_numbers = #tpu.dot_dimension_numbers<[1], [0], [0], [1], [0, 0, 1, 1], [], []>} : vector<1x8xf32>, vector<8x16xf32>, vector<1x16xf32> -> vector<1x16xf32>
    %62 = vector.extract_strided_slice %9 {offsets = [8, 16], sizes = [1, 16], strides = [1, 1]} : vector<16x96xf32> to vector<1x16xf32>
    %63 = vector.extract_strided_slice %9 {offsets = [8, 48], sizes = [8, 16], strides = [1, 1]} : vector<16x96xf32> to vector<8x16xf32>
    %64 = vector.extract_strided_slice %9 {offsets = [8, 80], sizes = [8, 16], strides = [1, 1]} : vector<16x96xf32> to vector<8x16xf32>
    %cst_24 = arith.constant dense<0.000000e+00> : vector<1x8xf32>
    %65 = tpu.matmul %62, %63, %cst_24 {dimension_numbers = #tpu.dot_dimension_numbers<[1], [1], [0], [0], [0, 0, 1, 0], [], []>} : vector<1x16xf32>, vector<8x16xf32>, vector<1x8xf32> -> vector<1x8xf32>
    %cst_25 = arith.constant 2.500000e-01 : f32
    %66 = vector.broadcast %cst_25 : f32 to vector<1x8xf32>
    %67 = arith.mulf %65, %66 : vector<1x8xf32>
    %cst_26 = arith.constant dense<0xFF800000> : vector<1xf32>
    %68 = vector.multi_reduction <maximumf>, %67, %cst_26 [1] : vector<1x8xf32> to vector<1xf32>
    %69 = vector.shape_cast %68 : vector<1xf32> to vector<1x1xf32>
    %70 = vector.broadcast %69 : vector<1x1xf32> to vector<1x8xf32>
    %71 = arith.subf %67, %70 : vector<1x8xf32>
    %72 = math.exp %71 : vector<1x8xf32>
    %cst_27 = arith.constant dense<0.000000e+00> : vector<1xf32>
    %73 = vector.multi_reduction <add>, %72, %cst_27 [1] : vector<1x8xf32> to vector<1xf32>
    %74 = vector.shape_cast %73 : vector<1xf32> to vector<1x1xf32>
    %75 = tpu.reciprocal %74 {approx = true} : vector<1x1xf32> -> vector<1x1xf32>
    %76 = vector.broadcast %75 : vector<1x1xf32> to vector<1x8xf32>
    %77 = arith.mulf %72, %76 : vector<1x8xf32>
    %cst_28 = arith.constant dense<0.000000e+00> : vector<1x16xf32>
    %78 = tpu.matmul %77, %64, %cst_28 {dimension_numbers = #tpu.dot_dimension_numbers<[1], [0], [0], [1], [0, 0, 1, 1], [], []>} : vector<1x8xf32>, vector<8x16xf32>, vector<1x16xf32> -> vector<1x16xf32>
    %79 = tpu.concatenate %61, %78 in 1 : vector<1x16xf32>, vector<1x16xf32> -> vector<1x32xf32>
    %80 = tpu.concatenate %44, %79 in 0 : vector<1x32xf32>, vector<1x32xf32> -> vector<2x32xf32>
    %81 = math.tanh %80 : vector<2x32xf32>
    %c0_29 = arith.constant 0 : index
    %c0_30 = arith.constant 0 : index
    %82 = vector.load %arg5[%c0_29, %c0_30] : memref<32x32xf32, #tpu.memory_space<vmem>>, vector<32x32xf32>
    %cst_31 = arith.constant dense<0.000000e+00> : vector<2x32xf32>
    %83 = tpu.matmul %81, %82, %cst_31 {dimension_numbers = #tpu.dot_dimension_numbers<[1], [0], [0], [1], [0, 0, 1, 1], [], []>} : vector<2x32xf32>, vector<32x32xf32>, vector<2x32xf32> -> vector<2x32xf32>
    %c0_32 = arith.constant 0 : index
    %c0_33 = arith.constant 0 : index
    %84 = vector.load %arg6[%c0_32, %c0_33] : memref<1x32xf32, #tpu.memory_space<vmem>>, vector<1x32xf32>
    %85 = vector.broadcast %84 : vector<1x32xf32> to vector<2x32xf32>
    %86 = arith.addf %83, %85 : vector<2x32xf32>
    %87 = math.tanh %86 : vector<2x32xf32>
    %c0_34 = arith.constant 0 : index
    %c0_35 = arith.constant 0 : index
    %c0_36 = arith.constant 0 : index
    %88 = vector.load %arg0[%c0_34, %c0_35, %c0_36] : memref<2x8x32xf32, #tpu.memory_space<vmem>>, vector<2x8x32xf32>
    %89 = vector.shape_cast %88 : vector<2x8x32xf32> to vector<16x32xf32>
    %c0_37 = arith.constant 0 : index
    %c0_38 = arith.constant 0 : index
    %90 = vector.load %arg8[%c0_37, %c0_38] : memref<64x32xf32, #tpu.memory_space<vmem>>, vector<64x32xf32>
    %91 = vector.extract_strided_slice %90 {offsets = [0, 0], sizes = [32, 32], strides = [1, 1]} : vector<64x32xf32> to vector<32x32xf32>
    %cst_39 = arith.constant dense<0.000000e+00> : vector<16x32xf32>
    %92 = tpu.matmul %89, %91, %cst_39 {dimension_numbers = #tpu.dot_dimension_numbers<[1], [0], [0], [1], [0, 0, 1, 1], [], []>} : vector<16x32xf32>, vector<32x32xf32>, vector<16x32xf32> -> vector<16x32xf32>
    %93 = vector.extract_strided_slice %90 {offsets = [32, 0], sizes = [32, 32], strides = [1, 1]} : vector<64x32xf32> to vector<32x32xf32>
    %cst_40 = arith.constant dense<0.000000e+00> : vector<2x32xf32>
    %94 = tpu.matmul %87, %93, %cst_40 {dimension_numbers = #tpu.dot_dimension_numbers<[1], [0], [0], [1], [0, 0, 1, 1], [], []>} : vector<2x32xf32>, vector<32x32xf32>, vector<2x32xf32> -> vector<2x32xf32>
    %c0_41 = arith.constant 0 : index
    %c0_42 = arith.constant 0 : index
    %95 = vector.load %arg9[%c0_41, %c0_42] : memref<1x32xf32, #tpu.memory_space<vmem>>, vector<1x32xf32>
    %96 = vector.broadcast %95 : vector<1x32xf32> to vector<2x32xf32>
    %97 = arith.addf %94, %96 : vector<2x32xf32>
    %c0_43 = arith.constant 0 : index
    %c0_44 = arith.constant 0 : index
    %98 = vector.load %arg7[%c0_43, %c0_44] : memref<1x64xf32, #tpu.memory_space<vmem>>, vector<1x64xf32>
    %c0_45 = arith.constant 0 : index
    %c0_46 = arith.constant 0 : index
    %99 = vector.load %arg10[%c0_45, %c0_46] : memref<64x32xf32, #tpu.memory_space<vmem>>, vector<64x32xf32>
    %cst_47 = arith.constant dense<0.000000e+00> : vector<1x32xf32>
    %100 = tpu.matmul %98, %99, %cst_47 {dimension_numbers = #tpu.dot_dimension_numbers<[1], [0], [0], [1], [0, 0, 1, 1], [], []>} : vector<1x64xf32>, vector<64x32xf32>, vector<1x32xf32> -> vector<1x32xf32>
    %c0_48 = arith.constant 0 : index
    %c0_49 = arith.constant 0 : index
    %101 = vector.load %arg11[%c0_48, %c0_49] : memref<1x32xf32, #tpu.memory_space<vmem>>, vector<1x32xf32>
    %102 = arith.addf %100, %101 : vector<1x32xf32>
    %103 = vector.extract_strided_slice %92 {offsets = [0, 0], sizes = [8, 32], strides = [1, 1]} : vector<16x32xf32> to vector<8x32xf32>
    %104 = vector.extract_strided_slice %97 {offsets = [0, 0], sizes = [1, 32], strides = [1, 1]} : vector<2x32xf32> to vector<1x32xf32>
    %105 = vector.broadcast %104 : vector<1x32xf32> to vector<8x32xf32>
    %106 = arith.addf %103, %105 : vector<8x32xf32>
    %cst_50 = arith.constant dense<0.000000e+00> : vector<1x8xf32>
    %107 = tpu.matmul %102, %106, %cst_50 {dimension_numbers = #tpu.dot_dimension_numbers<[1], [1], [0], [0], [0, 0, 1, 0], [], []>} : vector<1x32xf32>, vector<8x32xf32>, vector<1x8xf32> -> vector<1x8xf32>
    %cst_51 = arith.constant dense<0xFF800000> : vector<1xf32>
    %108 = vector.multi_reduction <maximumf>, %107, %cst_51 [1] : vector<1x8xf32> to vector<1xf32>
    %109 = vector.shape_cast %108 : vector<1xf32> to vector<1x1xf32>
    %110 = vector.broadcast %109 : vector<1x1xf32> to vector<1x8xf32>
    %111 = arith.subf %107, %110 : vector<1x8xf32>
    %112 = math.exp %111 : vector<1x8xf32>
    %cst_52 = arith.constant dense<0.000000e+00> : vector<1xf32>
    %113 = vector.multi_reduction <add>, %112, %cst_52 [1] : vector<1x8xf32> to vector<1xf32>
    %114 = vector.shape_cast %113 : vector<1xf32> to vector<1x1xf32>
    %115 = tpu.reciprocal %114 {approx = true} : vector<1x1xf32> -> vector<1x1xf32>
    %116 = vector.broadcast %115 : vector<1x1xf32> to vector<1x8xf32>
    %117 = arith.mulf %112, %116 : vector<1x8xf32>
    %cst_53 = arith.constant dense<0.000000e+00> : vector<1x32xf32>
    %118 = tpu.matmul %117, %106, %cst_53 {dimension_numbers = #tpu.dot_dimension_numbers<[1], [0], [0], [1], [0, 0, 1, 1], [], []>} : vector<1x8xf32>, vector<8x32xf32>, vector<1x32xf32> -> vector<1x32xf32>
    %119 = vector.extract_strided_slice %92 {offsets = [8, 0], sizes = [8, 32], strides = [1, 1]} : vector<16x32xf32> to vector<8x32xf32>
    %120 = vector.extract_strided_slice %97 {offsets = [1, 0], sizes = [1, 32], strides = [1, 1]} : vector<2x32xf32> to vector<1x32xf32>
    %121 = vector.broadcast %120 : vector<1x32xf32> to vector<8x32xf32>
    %122 = arith.addf %119, %121 : vector<8x32xf32>
    %cst_54 = arith.constant dense<0.000000e+00> : vector<1x8xf32>
    %123 = tpu.matmul %102, %122, %cst_54 {dimension_numbers = #tpu.dot_dimension_numbers<[1], [1], [0], [0], [0, 0, 1, 0], [], []>} : vector<1x32xf32>, vector<8x32xf32>, vector<1x8xf32> -> vector<1x8xf32>
    %cst_55 = arith.constant dense<0xFF800000> : vector<1xf32>
    %124 = vector.multi_reduction <maximumf>, %123, %cst_55 [1] : vector<1x8xf32> to vector<1xf32>
    %125 = vector.shape_cast %124 : vector<1xf32> to vector<1x1xf32>
    %126 = vector.broadcast %125 : vector<1x1xf32> to vector<1x8xf32>
    %127 = arith.subf %123, %126 : vector<1x8xf32>
    %128 = math.exp %127 : vector<1x8xf32>
    %cst_56 = arith.constant dense<0.000000e+00> : vector<1xf32>
    %129 = vector.multi_reduction <add>, %128, %cst_56 [1] : vector<1x8xf32> to vector<1xf32>
    %130 = vector.shape_cast %129 : vector<1xf32> to vector<1x1xf32>
    %131 = tpu.reciprocal %130 {approx = true} : vector<1x1xf32> -> vector<1x1xf32>
    %132 = vector.broadcast %131 : vector<1x1xf32> to vector<1x8xf32>
    %133 = arith.mulf %128, %132 : vector<1x8xf32>
    %cst_57 = arith.constant dense<0.000000e+00> : vector<1x32xf32>
    %134 = tpu.matmul %133, %122, %cst_57 {dimension_numbers = #tpu.dot_dimension_numbers<[1], [0], [0], [1], [0, 0, 1, 1], [], []>} : vector<1x8xf32>, vector<8x32xf32>, vector<1x32xf32> -> vector<1x32xf32>
    %135 = tpu.concatenate %117, %133 in 0 : vector<1x8xf32>, vector<1x8xf32> -> vector<2x8xf32>
    %136 = tpu.concatenate %118, %134 in 0 : vector<1x32xf32>, vector<1x32xf32> -> vector<2x32xf32>
    %c0_58 = arith.constant 0 : index
    %c0_59 = arith.constant 0 : index
    %137 = vector.load %arg12[%c0_58, %c0_59] : memref<32x32xf32, #tpu.memory_space<vmem>>, vector<32x32xf32>
    %cst_60 = arith.constant dense<0.000000e+00> : vector<2x32xf32>
    %138 = tpu.matmul %136, %137, %cst_60 {dimension_numbers = #tpu.dot_dimension_numbers<[1], [0], [0], [1], [0, 0, 1, 1], [], []>} : vector<2x32xf32>, vector<32x32xf32>, vector<2x32xf32> -> vector<2x32xf32>
    %c0_61 = arith.constant 0 : index
    %c0_62 = arith.constant 0 : index
    %139 = vector.load %arg13[%c0_61, %c0_62] : memref<1x32xf32, #tpu.memory_space<vmem>>, vector<1x32xf32>
    %140 = vector.broadcast %139 : vector<1x32xf32> to vector<2x32xf32>
    %141 = arith.addf %138, %140 : vector<2x32xf32>
    %142 = tpu.concatenate %141, %87 in 1 : vector<2x32xf32>, vector<2x32xf32> -> vector<2x64xf32>
    %c0_63 = arith.constant 0 : index
    %c0_64 = arith.constant 0 : index
    %143 = vector.load %arg14[%c0_63, %c0_64] : memref<64x32xf32, #tpu.memory_space<vmem>>, vector<64x32xf32>
    %cst_65 = arith.constant dense<0.000000e+00> : vector<2x32xf32>
    %144 = tpu.matmul %142, %143, %cst_65 {dimension_numbers = #tpu.dot_dimension_numbers<[1], [0], [0], [1], [0, 0, 1, 1], [], []>} : vector<2x64xf32>, vector<64x32xf32>, vector<2x32xf32> -> vector<2x32xf32>
    %c0_66 = arith.constant 0 : index
    %c0_67 = arith.constant 0 : index
    %145 = vector.load %arg15[%c0_66, %c0_67] : memref<1x32xf32, #tpu.memory_space<vmem>>, vector<1x32xf32>
    %146 = vector.broadcast %145 : vector<1x32xf32> to vector<2x32xf32>
    %147 = arith.addf %144, %146 : vector<2x32xf32>
    %cst_68 = arith.constant 0.000000e+00 : f32
    %148 = vector.broadcast %cst_68 : f32 to vector<2x32xf32>
    %149 = arith.maximumf %147, %148 : vector<2x32xf32>
    %c0_69 = arith.constant 0 : index
    %c0_70 = arith.constant 0 : index
    %150 = vector.load %arg16[%c0_69, %c0_70] : memref<32x3xf32, #tpu.memory_space<vmem>>, vector<32x3xf32>
    %cst_71 = arith.constant dense<0.000000e+00> : vector<2x3xf32>
    %151 = tpu.matmul %149, %150, %cst_71 {dimension_numbers = #tpu.dot_dimension_numbers<[1], [0], [0], [1], [0, 0, 1, 1], [], []>} : vector<2x32xf32>, vector<32x3xf32>, vector<2x3xf32> -> vector<2x3xf32>
    %c0_72 = arith.constant 0 : index
    %c0_73 = arith.constant 0 : index
    %152 = vector.load %arg17[%c0_72, %c0_73] : memref<1x3xf32, #tpu.memory_space<vmem>>, vector<1x3xf32>
    %153 = vector.broadcast %152 : vector<1x3xf32> to vector<2x3xf32>
    %154 = arith.addf %151, %153 : vector<2x3xf32>
    %c0_74 = arith.constant 0 : index
    %c0_75 = arith.constant 0 : index
    %155 = vector.load %arg18[%c0_74, %c0_75] : memref<2x3xf32, #tpu.memory_space<vmem>>, vector<2x3xf32>
    tpu.vector_store %arg18[%c0_74, %c0_75], %154 {strides = array<i32>} : memref<2x3xf32, #tpu.memory_space<vmem>>, vector<2x3xf32>,
    %c0_76 = arith.constant 0 : index
    %c0_77 = arith.constant 0 : index
    %156 = vector.load %arg19[%c0_76, %c0_77] : memref<2x8xf32, #tpu.memory_space<vmem>>, vector<2x8xf32>
    tpu.vector_store %arg19[%c0_76, %c0_77], %135 {strides = array<i32>} : memref<2x8xf32, #tpu.memory_space<vmem>>, vector<2x8xf32>,
    return
  }
}

</mosaic_0001>

<bundles_post_ra>
// kernel: vh_bert_tsa_forward.3
= control target key start
LH: loop header
LB: loop body
LE: loop exit
PB: predicated region body
PF: predicated region fallthrough
CT: control target
= control target key end

     0   :  { %s1263_s0 = inlined_call_operand.vmem [shape: f32[2,8,32], index: 0, kind: input, shape index: {}]   ;;  %s1264_s1 = inlined_call_operand.vmem [shape: f32[2,8,32], index: 1, kind: input, shape index: {}]   ;;  %s1265_s2 = inlined_call_operand.vmem [shape: f32[2,8,1], index: 2, kind: input, shape index: {}]   ;;  %s1266_s3 = inlined_call_operand.vmem [shape: f32[32,96], index: 3, kind: input, shape index: {}]   ;;  %s1267_s4 = inlined_call_operand.vmem [shape: f32[1,96], index: 4, kind: input, shape index: {}]   ;;  %s1268_s5 = inlined_call_operand.vmem [shape: f32[32,32], index: 5, kind: input, shape index: {}]   ;;  %s1269_s6 = inlined_call_operand.vmem [shape: f32[1,32], index: 6, kind: input, shape index: {}]   ;;  %s1270_s7 = inlined_call_operand.vmem [shape: f32[1,64], index: 7, kind: input, shape index: {}]   ;;  %s1271_s8 = inlined_call_operand.vmem [shape: f32[64,32], index: 8, kind: input, shape index: {}]   ;;  %s1272_s9 = inlined_call_operand.vmem [shape: f32[1,32], index: 9, kind: input, shape index: {}]   ;;  %s1273_s10 = inlined_call_operand.vmem [shape: f32[64,32], index: 10, kind: input, shape index: {}]   ;;  %s1274_s11 = inlined_call_operand.vmem [shape: f32[1,32], index: 11, kind: input, shape index: {}]   ;;  %s1275_s12 = inlined_call_operand.vmem [shape: f32[32,32], index: 12, kind: input, shape index: {}]   ;;  %s1276_s13 = inlined_call_operand.vmem [shape: f32[1,32], index: 13, kind: input, shape index: {}]   ;;  %s1277_s14 = inlined_call_operand.vmem [shape: f32[64,32], index: 14, kind: input, shape index: {}]   ;;  %s1278_s15 = inlined_call_operand.vmem [shape: f32[1,32], index: 15, kind: input, shape index: {}]   ;;  %s1279_s16 = inlined_call_operand.vmem [shape: f32[32,3], index: 16, kind: input, shape index: {}]   ;;  %s1280_s17 = inlined_call_operand.vmem [shape: f32[1,3], index: 17, kind: input, shape index: {}]   ;;  %s1281_s18 = inlined_call_operand.hbm [shape: f32[2,3], index: 18, kind: output, shape index: {0}]   ;;  %s1282_s19 = inlined_call_operand.hbm [shape: f32[2,8], index: 19, kind: output, shape index: {1}]  }
   0x1   :  { %1287 = sst [smem:[#allocation8_spill]] %s1263_s0 }
   0x2   :  { %1288 = sst [smem:[#allocation9_spill]] %s1264_s1 }
   0x3   :  { %1289 = sst [smem:[#allocation10_spill]] %s1265_s2 }
   0x4   :  { %1290 = sst [smem:[#allocation11_spill]] %s1266_s3 }
   0x5   :  { %25 = vsyncpa [#allocation3], 0  ;;  %s1291_s20 = sld [smem:[#allocation10_spill]]  ;;  %v921_v2 = vmov 0  }
   0x6   :  { %s1292_s22 = sld [smem:[#allocation11_spill]]  ;;  %834 = vset.pattern.permute.xlu0 %v921_v2 }
   0xb   :  { %v65_v0 = vld [vmem:[%s1291_s20] sm:$0xff] }
   0xc   :  { %v82_v1 = vld [vmem:[%s1292_s22 + $0x18] sm:$0xff]  ;;  %v81_v3 = vld [vmem:[%s1292_s22 + $0x10] sm:$0xff]  ;;  %v80_v4 = vld [vmem:[%s1292_s22 + $0x8] sm:$0xff]  ;;  %69 = vperm.xlu0 %834, %v65_v0  }
   0xd   :  { %106 = vmatpush.msra.mxu0 %v82_v1 }
   0xf   :  { %107 = vmatpush.msra.mxu0 %v81_v3 }
  0x10   :  { %26 = vsyncpa [#allocation5], 0  ;;  %v66_v5 = vld [vmem:[%s1291_s20 + $0x8] sm:$0xff]  ;;  %v79_v6 = vld [vmem:[%s1292_s22] sm:$0xff]  ;;  %s1293_s30 = sld [smem:[#allocation9_spill]]  ;;  %vm87_vm0 = vcmask 261120  }
  0x11   :  { %108 = vmatpush.msra.mxu0 %v80_v4  ;;  %v835_v13 = vld [vmem:[%s1267_s4] ss:$0 sm:$0xff]  ;;  %s922_s2 = smov 112   ;;  %s923_s23 = smov 96   ;;  %vm120_vm1 = vcmask 130048   ;;  %vm146_vm2 = vcmask 57344  }
  0x12   :  { %s924_s24 = smov 80   ;;  %s925_s4 = smov 48   ;;  %vm161_vm3 = vcmask 64512   ;;  %vm395_vm4 = vcmask 1040384   ;;  %vm506_vm5 = vcmask 523264   ;;  %vm762_vm6 = vcmask 58368  }
  0x13   :  { %109 = vmatpush.msra.mxu0 %v79_v6  ;;  %s926_s25 = smov 64   ;;  %s927_s3 = smov 16   ;;  %vm760_vm7 = vcmask 17408  }
  0x14   :  { %74 = vperm.xlu0 %834, %v66_v5   ;;  %s929_s21 = smov [#allocation4]  }
  0x15   :  { %s780_s1 = sshll.u32 %s929_s21, 4  ;;  %s781_s1 = int_to_ptr.vmem [resolvable:$true] %s780_s1 }
  0x16   :  { %v63_v7 = vld [vmem:[%s1293_s30] sm:$0xff]  ;;  %v64_v10 = vld [vmem:[%s1293_s30 + $0x8] sm:$0xff] }
  0x7e   :  { %v70_v8 = vpop.permute.xlu0 %69 }
  0x7f   :  { %v77_v9 = vmul.f32 %v70_v8, %v63_v7 }
  0x81   :  { %796 = vmatmul.msk.f32.vlgmr.msra.gmra.mxu0 %vm87_vm0, %v77_v9 }
  0x86   :  { %v75_v11 = vpop.permute.xlu0 %74 }
  0x87   :  { %v78_v12 = vmul.f32 %v75_v11, %v64_v10  ;;  %v401_v11 = vld [vmem:[%s1268_s5 + $0x18] sm:$0xff] }
  0x89   :  { %797 = vmatmul.msk.f32.gmra.mxu0 %vm87_vm0, %v78_v12  ;;  %v400_v12 = vld [vmem:[%s1268_s5 + $0x10] sm:$0xff] }
  0xfe   :  { %v111_v14 = vpop.f32.mrf.mxu0 }
  0xff   :  { %v112_v15 = vadd.f32 %v835_v13, %v111_v14  ;;  %v398_v14 = vld [vmem:[%s1268_s5] sm:$0xff] }
 0x101   :  { %185 = vrot.lane.b32.xlu2 %v112_v15, %s922_s2  ;;  %118 = vrot.lane.b32.xlu1 %v112_v15, %s923_s23 }
 0x106   :  { %v114_v19 = vpop.f32.mrf.mxu0 }
 0x107   :  { %v1069_v26 = vadd.f32 %v835_v13, %v114_v19  ;;  %v399_v13 = vld [vmem:[%s1268_s5 + $0x8] sm:$0xff]  ;;  %s782_s5 = sshll.u32 %s1282_s19, 4  ;;  %s783_s5 = int_to_ptr.hbm [resolvable:$true] %s782_s5 }
 0x109   :  { %187 = vrot.lane.b32.xlu1 %v112_v15, %s924_s24 }
 0x15b   :  { %v186_v18 = vpop.permute.xlu2 %185 }
 0x173   :  { %v119_v16 = vpop.permute.xlu1 %118 }
 0x174   :  { %798 = vmatpush.xpose.msk.msrb.mxu0 %vm120_vm1, %v119_v16 }
 0x177   :  { %799 = vmatmul.msk.f32.vlgmr.msrb.gmra.mxu0 %vm120_vm1, %v112_v15 }
 0x17b   :  { %v188_v17 = vpop.permute.xlu1 %187 }
 0x17c   :  { %801 = vmatpush.xpose.msk.msra.mxu3 %vm120_vm1, %v188_v17 }
 0x17f   :  { %802 = vmatmul.msk.f32.vlgmr.msra.gmra.mxu3 %vm120_vm1, %v186_v18 }
 0x1f4   :  { %v142_v20 = vpop.f32.mrf.mxu0 }
 0x1f5   :  { %v145_v21 = vmul.f32 0.25, %v142_v20 }
 0x1f7   :  { %v147_v22 = vsel %vm146_vm2, %v145_v21, -inf }
 0x1f8   :  { %148 = vmax.xlane.f32.xlu2 %v147_v22 }
 0x202   :  { %v210_v23 = vpop.f32.mrf.mxu3 }
 0x203   :  { %v213_v24 = vmul.f32 0.25, %v210_v23  ;;  %v439_v23 = vld [vmem:[%s1271_s8 + $0x38] sm:$0xff] }
 0x205   :  { %v214_v25 = vsel %vm146_vm2, %v213_v24, -inf }
 0x206   :  { %215 = vmax.xlane.f32.xlu0 %v214_v25  ;;  %v438_v25 = vld [vmem:[%s1271_s8 + $0x30] sm:$0xff] }
 0x21a   :  { %225 = vrot.lane.b32.xlu0 %v112_v15, %s925_s4 }
 0x222   :  { %321 = vrot.lane.b32.xlu0 %v1069_v26, %s922_s2 }
 0x26b   :  { %v149_v27 = vpop.xlane.xlu2 %148 }
 0x26c   :  { %v150_v28 = vsub.f32 %v145_v21, %v149_v27  ;;  %v504_v27 = vld [vmem:[%s1273_s10 + $0x38] sm:$0xff] }
 0x26e   :  { %v151_v29 = vmul.f32 1.442695, %v150_v28  ;;  %v437_v28 = vld [vmem:[%s1271_s8 + $0x28] sm:$0xff] }
 0x270   :  { %841 = vpow2.f32 %v151_v29  ;;  %v433_v29 = vld [vmem:[%s1271_s8 + $0x8] sm:$0xff] }
 0x276   :  { %v842_v30 = vpop.eup %841 }
 0x277   :  { %v153_v31 = vsel %vm146_vm2, %v842_v30, 0.0 }
 0x278   :  { %154 = vadd.xlane.f32.xlu1 %v153_v31  ;;  %v503_v31 = vld [vmem:[%s1273_s10 + $0x30] sm:$0xff] }
 0x279   :  { %v216_v32 = vpop.xlane.xlu0 %215 }
 0x27a   :  { %v217_v33 = vsub.f32 %v213_v24, %v216_v32  ;;  %v435_v24 = vld [vmem:[%s1271_s8 + $0x18] sm:$0xff]  ;;  %v432_v32 = vld [vmem:[%s1271_s8] sm:$0xff] }
 0x27b   :  { %458 = vmatpush.msra.mxu0 %v435_v24  ;;  %v696_v24 = vld [vmem:[%s1277_s14 + $0x18] sm:$0xff] }
 0x27c   :  { %v218_v34 = vmul.f32 1.442695, %v217_v33 }
 0x27e   :  { %843 = vpow2.f32 %v218_v34  ;;  %v502_v34 = vld [vmem:[%s1273_s10 + $0x28] sm:$0xff] }
 0x284   :  { %v844_v35 = vpop.eup %843 }
 0x285   :  { %v220_v36 = vsel %vm146_vm2, %v844_v35, 0.0 }
 0x286   :  { %221 = vadd.xlane.f32.xlu2 %v220_v36  ;;  %v500_v36 = vld [vmem:[%s1273_s10 + $0x18] sm:$0xff] }
 0x28c   :  { %v226_v42 = vpop.permute.xlu0 %225 }
 0x291   :  { %323 = vrot.lane.b32.xlu1 %v1069_v26, %s924_s24  ;;  %s1294_s24 = sld [smem:[#allocation8_spill]] }
 0x294   :  { %v322_v47 = vpop.permute.xlu0 %321 }
 0x297   :  { %v430_v33 = vld [vmem:[%s1294_s24] sm:$0xff] }
 0x29e   :  { %158 = vrot.lane.b32.xlu2 %v112_v15, %s926_s25 }
 0x2a6   :  { %257 = vrot.lane.b32.xlu2 %v1069_v26, %s923_s23 }
 0x2eb   :  { %v155_v37 = vpop.xlane.xlu1 %154 }
 0x2ec   :  { %845 = vrcp.f32 %v155_v37  ;;  %v499_v37 = vld [vmem:[%s1273_s10 + $0x10] sm:$0xff] }
 0x2f2   :  { %v846_v39 = vpop.eup %845 }
 0x2f3   :  { %v157_v41 = vmul.f32 %v846_v39, %v842_v30  ;;  %v436_v30 = vld [vmem:[%s1271_s8 + $0x20] sm:$0xff]  ;;  %v498_v39 = vld [vmem:[%s1273_s10 + $0x8] sm:$0xff] }
 0x2f9   :  { %v222_v38 = vpop.xlane.xlu2 %221 }
 0x2fa   :  { %847 = vrcp.f32 %v222_v38  ;;  %v431_v38 = vld [vmem:[%s1294_s24 + $0x8] sm:$0xff] }
 0x300   :  { %v848_v44 = vpop.eup %847 }
 0x301   :  { %v159_v40 = vpop.permute.xlu2 %158  ;;  %v224_v46 = vmul.f32 %v848_v44, %v844_v35  ;;  %v501_v35 = vld [vmem:[%s1273_s10 + $0x20] sm:$0xff] }
 0x302   :  { %180 = vmatpush.msra.mxu2 %v159_v40  ;;  %v497_v40 = vld [vmem:[%s1273_s10] sm:$0xff]  ;;  %s771_s10 = sshll.u32 %s1281_s18, 4  ;;  %s772_s10 = int_to_ptr.hbm [resolvable:$true] %s771_s10 }
 0x303   :  { %800 = vmatmul.msk.f32.vlgmr.msra.gmra.mxu2 %vm161_vm3, %v157_v41  ;;  %v324_v43 = vpop.permute.xlu1 %323  ;;  %v496_v41 = vld [vmem:[%s1270_s7] sm:$0x1] }
 0x304   :  { %246 = vmatpush.msrb.mxu2 %v226_v42  ;;  %v836_v42 = vld [vmem:[%s1269_s6] ss:$0 sm:$0xff]  ;;  %s928_s6 = smov 32  }
 0x306   :  { %807 = vmatpush.xpose.msk.msra.mxu2 %vm120_vm1, %v324_v43 }
 0x309   :  { %v258_v45 = vpop.permute.xlu2 %257 }
 0x30a   :  { %804 = vmatpush.xpose.msk.msra.mxu1 %vm120_vm1, %v258_v45 }
 0x30b   :  { %803 = vmatmul.msk.f32.vlgmr.msrb.gmra.mxu2 %vm161_vm3, %v224_v46 }
 0x30c   :  { %488 = vmatpush.msrb.mxu2 %v439_v23  ;;  %v697_v23 = vld [vmem:[%s1277_s14 + $0x20] sm:$0xff] }
 0x30d   :  { %805 = vmatmul.msk.f32.vlgmr.msra.gmra.mxu1 %vm120_vm1, %v1069_v26 }
 0x30e   :  { %489 = vmatpush.msrb.mxu2 %v438_v25  ;;  %v695_v25 = vld [vmem:[%s1277_s14 + $0x10] sm:$0xff] }
 0x310   :  { %490 = vmatpush.msrb.mxu2 %v437_v28 }
 0x312   :  { %491 = vmatpush.msrb.mxu2 %v436_v30  ;;  %v694_v30 = vld [vmem:[%s1277_s14 + $0x8] sm:$0xff] }
 0x313   :  { %808 = vmatmul.msk.f32.vlgmr.msra.gmra.mxu2 %vm120_vm1, %v322_v47  ;;  %v837_v47 = vld [vmem:[%s1272_s9] ss:$0 sm:$0xff] }
 0x386   :  { %v182_v48 = vpop.f32.mrf.mxu2 }
 0x38a   :  { %v280_v49 = vpop.f32.mrf.mxu1 }
 0x38b   :  { %v283_v50 = vmul.f32 0.25, %v280_v49 }
 0x38d   :  { %v284_v51 = vsel %vm146_vm2, %v283_v50, -inf }
 0x38e   :  { %285 = vmax.xlane.f32.xlu0 %v284_v51  ;;  %v248_v52 = vpop.f32.mrf.mxu2 }
 0x396   :  { %v346_v53 = vpop.f32.mrf.mxu2 }
 0x397   :  { %v349_v54 = vmul.f32 0.25, %v346_v53  ;;  %v505_v53 = vld [vmem:[%s1274_s11] sm:$0x1] }
 0x399   :  { %v350_v55 = vsel %vm146_vm2, %v349_v54, -inf }
 0x39a   :  { %351 = vmax.xlane.f32.xlu1 %v350_v55 }
 0x3b3   :  { %361 = vrot.lane.b32.xlu1 %v1069_v26, %s925_s4 }
 0x3bb   :  { %252 = vrot.lane.b32.xlu1 %v248_v52, %s927_s3 }
 0x401   :  { %v286_v56 = vpop.xlane.xlu0 %285 }
 0x402   :  { %v287_v57 = vsub.f32 %v283_v50, %v286_v56 }
 0x404   :  { %v288_v58 = vmul.f32 1.442695, %v287_v57 }
 0x406   :  { %849 = vpow2.f32 %v288_v58 }
 0x40c   :  { %v850_v59 = vpop.eup %849 }
 0x40d   :  { %v352_v60 = vpop.xlane.xlu1 %351  ;;  %v290_v61 = vsel %vm146_vm2, %v850_v59, 0.0 }
 0x40e   :  { %v353_v62 = vsub.f32 %v349_v54, %v352_v60  ;;  %291 = vadd.xlane.f32.xlu0 %v290_v61 }
 0x410   :  { %v354_v63 = vmul.f32 1.442695, %v353_v62 }
 0x412   :  { %851 = vpow2.f32 %v354_v63 }
 0x418   :  { %v852_v0 = vpop.eup %851 }
 0x419   :  { %v356_v1 = vsel %vm146_vm2, %v852_v0, 0.0 }
 0x41a   :  { %357 = vadd.xlane.f32.xlu2 %v356_v1 }
 0x425   :  { %v362_v2 = vpop.permute.xlu1 %361 }
 0x426   :  { %382 = vmatpush.msrb.mxu1 %v362_v2 }
 0x428   :  { %518 = vmatpush.msra.mxu1 %v504_v27 }
 0x42a   :  { %519 = vmatpush.msra.mxu1 %v503_v31  ;;  %v693_v31 = vld [vmem:[%s1277_s14] sm:$0xff] }
 0x42c   :  { %520 = vmatpush.msra.mxu1 %v502_v34 }
 0x42d   :  { %v253_v15 = vpop.permute.xlu1 %252 }
 0x42e   :  { %v255_v20 = vsel %vm120_vm1, %v182_v48, %v253_v15  ;;  %521 = vmatpush.msra.mxu1 %v501_v35 }
 0x430   :  { %522 = vmatpush.msra.mxu1 %v500_v36 }
 0x432   :  { %295 = vrot.lane.b32.xlu2 %v1069_v26, %s926_s25  ;;  %v434_v26 = vld [vmem:[%s1271_s8 + $0x10] sm:$0xff]  ;;  %523 = vmatpush.msra.mxu1 %v499_v37 }
 0x433   :  { %459 = vmatpush.msra.mxu0 %v434_v26 }
 0x434   :  { %524 = vmatpush.msra.mxu1 %v498_v39  ;;  %v730_v39 = vld [vmem:[%s1279_s16 + $0x8] sm:$0xff] }
 0x435   :  { %460 = vmatpush.msra.mxu0 %v433_v29 }
 0x436   :  { %525 = vmatpush.msra.mxu1 %v497_v40  ;;  %v729_v40 = vld [vmem:[%s1279_s16] sm:$0xff] }
 0x437   :  { %461 = vmatpush.msra.mxu0 %v432_v32  ;;  %v732_v32 = vld [vmem:[%s1279_s16 + $0x18] sm:$0xff] }
 0x438   :  { %811 = vmatmul.msk.f32.vlgmr.msra.gmra.mxu0 %vm87_vm0, %v430_v33  ;;  %v838_v33 = vld [vmem:[%s1276_s13] ss:$0 sm:$0xff] }
 0x440   :  { %812 = vmatmul.msk.f32.gmra.mxu0 %vm87_vm0, %v431_v38  ;;  %v731_v38 = vld [vmem:[%s1279_s16 + $0x10] sm:$0xff] }
 0x481   :  { %v292_v3 = vpop.xlane.xlu0 %291 }
 0x482   :  { %853 = vrcp.f32 %v292_v3 }
 0x488   :  { %v854_v5 = vpop.eup %853 }
 0x489   :  { %v294_v8 = vmul.f32 %v854_v5, %v850_v59 }
 0x48d   :  { %v358_v4 = vpop.xlane.xlu2 %357 }
 0x48e   :  { %855 = vrcp.f32 %v358_v4 }
 0x494   :  { %v856_v6 = vpop.eup %855 }
 0x495   :  { %v296_v7 = vpop.permute.xlu2 %295  ;;  %v360_v9 = vmul.f32 %v856_v6, %v852_v0 }
 0x496   :  { %316 = vmatpush.msrb.mxu3 %v296_v7 }
 0x497   :  { %806 = vmatmul.msk.f32.vlgmr.msrb.gmra.mxu3 %vm161_vm3, %v294_v8  ;;  %809 = vmatmul.msk.f32.vlgmr.msrb.gmra.mxu1 %vm161_vm3, %v360_v9  ;;  %v661_v8 = vld [vmem:[%s1275_s12 + $0x18] sm:$0xff] }
 0x498   :  { %421 = vmatpush.msra.mxu3 %v401_v11 }
 0x49a   :  { %422 = vmatpush.msra.mxu3 %v400_v12 }
 0x49c   :  { %423 = vmatpush.msra.mxu3 %v399_v13 }
 0x49e   :  { %424 = vmatpush.msra.mxu3 %v398_v14 }
 0x49f   :  { %814 = vmatmul.msk.f32.vlgmr.msra.gmra.mxu1 %vm506_vm5, %v496_v41  ;;  %v839_v41 = vld [vmem:[%s1278_s15] ss:$0 sm:$0xff] }
 0x4b5   :  { %v463_v46 = vpop.f32.mrf.mxu0 }
 0x4bd   :  { %v466_v50 = vpop.f32.mrf.mxu0 }
 0x514   :  { %v384_v10 = vpop.f32.mrf.mxu1 }
 0x515   :  { %388 = vrot.lane.b32.xlu0 %v384_v10, %s927_s3 }
 0x51a   :  { %v318_v16 = vpop.f32.mrf.mxu3 }
 0x51c   :  { %v527_v54 = vpop.f32.mrf.mxu1 }
 0x51d   :  { %v528_v57 = vadd.f32 %v527_v54, %v505_v53 }
 0x587   :  { %v389_v17 = vpop.permute.xlu0 %388 }
 0x588   :  { %v391_v18 = vsel %vm120_vm1, %v318_v16, %v389_v17  ;;  %v660_v17 = vld [vmem:[%s1275_s12 + $0x10] sm:$0xff] }
 0x589   :  { %v393_v19 = vrot.slane %v391_v18, 7  ;;  %v659_v18 = vld [vmem:[%s1275_s12 + $0x8] sm:$0xff] }
 0x58b   :  { %v396_v21 = vsel %vm395_vm4, %v255_v20, %v393_v19  ;;  %v658_v19 = vld [vmem:[%s1275_s12] sm:$0xff]  ;;  %v700_v20 = vld [vmem:[%s1277_s14 + $0x38] sm:$0xff]  ;;  %s930_s12 = smov [#allocation2]  }
 0x58c   :  { %857 = vtanh.f32 %v396_v21  ;;  %v699_v21 = vld [vmem:[%s1277_s14 + $0x30] sm:$0xff]  ;;  %716 = vmatpush.msrb.mxu1 %v700_v20  ;;  %s769_s15 = sshll.u32 %s930_s12, 4  ;;  %s770_s15 = int_to_ptr.vmem [resolvable:$true] %s769_s15 }
 0x58e   :  { %717 = vmatpush.msrb.mxu1 %v699_v21 }
 0x592   :  { %v858_v22 = vpop.eup %857 }
 0x593   :  { %810 = vmatmul.msk.f32.vlgmr.msra.gmra.mxu3 %vm87_vm0, %v858_v22  ;;  %v698_v22 = vld [vmem:[%s1277_s14 + $0x28] sm:$0xff] }
 0x594   :  { %718 = vmatpush.msrb.mxu1 %v698_v22 }
 0x596   :  { %719 = vmatpush.msrb.mxu1 %v697_v23 }
 0x598   :  { %720 = vmatpush.msrb.mxu1 %v696_v24 }
 0x59a   :  { %721 = vmatpush.msrb.mxu1 %v695_v25 }
 0x59c   :  { %722 = vmatpush.msrb.mxu1 %v694_v30 }
 0x59e   :  { %723 = vmatpush.msrb.mxu1 %v693_v31 }
 0x616   :  { %v426_v43 = vpop.f32.mrf.mxu3 }
 0x617   :  { %v427_v44 = vadd.f32 %v836_v42, %v426_v43 }
 0x619   :  { %859 = vtanh.f32 %v427_v44 }
 0x61f   :  { %v860_v45 = vpop.eup %859 }
 0x620   :  { %813 = vmatmul.msk.f32.vlgmr.msrb.gmra.mxu2 %vm87_vm0, %v860_v45 }
 0x6a3   :  { %v493_v48 = vpop.f32.mrf.mxu2 }
 0x6a4   :  { %v494_v49 = vadd.f32 %v837_v47, %v493_v48 }
 0x6a6   :  { %v530_v51 = vperm.slane %v494_v49, 0  ;;  %v592_v52 = vperm.slane %v494_v49, 1 }
 0x6a8   :  { %v531_v55 = vadd.f32 %v530_v51, %v463_v46  ;;  %v593_v56 = vadd.f32 %v592_v52, %v466_v50 }
 0x6aa   :  { %815 = vmatpush.xpose.msk.msrb.mxu3 %vm87_vm0, %v531_v55  ;;  %587 = vmatpush.msra.mxu2 %v531_v55 }
 0x6ab   :  { %646 = vmatpush.msrb.mxu0 %v593_v56 }
 0x6ac   :  { %681 = vmatpush.msrb.mxu2 %v661_v8 }
 0x6ad   :  { %816 = vmatmul.msk.f32.vlgmr.msrb.gmra.mxu3 %vm87_vm0, %v528_v57 }
 0x6ae   :  { %818 = vmatpush.xpose.msk.msra.mxu3 %vm87_vm0, %v593_v56  ;;  %682 = vmatpush.msrb.mxu2 %v660_v17 }
 0x6b0   :  { %683 = vmatpush.msrb.mxu2 %v659_v18 }
 0x6b2   :  { %684 = vmatpush.msrb.mxu2 %v658_v19  ;;  %752 = vmatpush.msrb.mxu3 %v732_v32 }
 0x6b4   :  { %753 = vmatpush.msrb.mxu3 %v731_v38 }
 0x6b5   :  { %819 = vmatmul.msk.f32.vlgmr.msra.gmra.mxu3 %vm87_vm0, %v528_v57 }
 0x6b6   :  { %754 = vmatpush.msrb.mxu3 %v730_v39 }
 0x6b8   :  { %755 = vmatpush.msrb.mxu3 %v729_v40 }
 0x730   :  { %v555_v58 = vpop.f32.mrf.mxu3 }
 0x731   :  { %v558_v59 = vsel %vm146_vm2, %v555_v58, -inf }
 0x732   :  { %559 = vmax.xlane.f32.xlu2 %v558_v59 }
 0x738   :  { %v614_v60 = vpop.f32.mrf.mxu3 }
 0x739   :  { %v617_v61 = vsel %vm146_vm2, %v614_v60, -inf }
 0x73a   :  { %618 = vmax.xlane.f32.xlu0 %v617_v61 }
 0x74e   :  { %689 = vrot.lane.b32.xlu0 %v860_v45, %s928_s6  ;;  %v840_v45 = vld [vmem:[%s1280_s17] ss:$0 sm:$0xff] }
 0x7a5   :  { %v560_v62 = vpop.xlane.xlu2 %559 }
 0x7a6   :  { %v561_v63 = vsub.f32 %v555_v58, %v560_v62 }
 0x7a8   :  { %v562_v0 = vmul.f32 1.442695, %v561_v63 }
 0x7aa   :  { %861 = vpow2.f32 %v562_v0 }
 0x7ad   :  { %v619_v1 = vpop.xlane.xlu0 %618 }
 0x7ae   :  { %v620_v2 = vsub.f32 %v614_v60, %v619_v1 }
 0x7b0   :  { %v862_v3 = vpop.eup %861  ;;  %v621_v4 = vmul.f32 1.442695, %v620_v2 }
 0x7b1   :  { %v564_v5 = vsel %vm146_vm2, %v862_v3, 0.0 }
 0x7b2   :  { %863 = vpow2.f32 %v621_v4  ;;  %565 = vadd.xlane.f32.xlu1 %v564_v5 }
 0x7b8   :  { %v864_v6 = vpop.eup %863 }
 0x7b9   :  { %v623_v7 = vsel %vm146_vm2, %v864_v6, 0.0 }
 0x7ba   :  { %624 = vadd.xlane.f32.xlu2 %v623_v7 }
 0x7c0   :  { %v690_v36 = vpop.permute.xlu0 %689 }
 0x825   :  { %v566_v9 = vpop.xlane.xlu1 %565 }
 0x826   :  { %865 = vrcp.f32 %v566_v9 }
 0x82c   :  { %v866_v10 = vpop.eup %865 }
 0x82d   :  { %v568_v11 = vmul.f32 %v866_v10, %v862_v3  ;;  %v625_v12 = vpop.xlane.xlu2 %624 }
 0x82e   :  { %867 = vrcp.f32 %v625_v12 }
 0x82f   :  { %817 = vmatmul.msk.f32.vlgmr.msra.gmra.mxu2 %vm161_vm3, %v568_v11 }
 0x834   :  { %v868_v13 = vpop.eup %867 }
 0x835   :  { %v627_v14 = vmul.f32 %v868_v13, %v864_v6 }
 0x837   :  { %v651_v15 = vrot.slane %v627_v14, 7  ;;  %820 = vmatmul.msk.f32.vlgmr.msrb.gmra.mxu0 %vm161_vm3, %v627_v14 }
 0x839   :  { %v653_v16 = vsel %vm395_vm4, %v568_v11, %v651_v15 }
 0x83a   :  { %763 = vst.msk [vmem:[#allocation4] sm:$0x3] %vm762_vm6, %v653_v16 }
 0x83b   :  { %785 = dma.vmem_to_hbm [thread:$0]  %s781_s1, 32, %s783_s5, [#allocation5]  }
 0x8b2   :  { %v589_v28 = vpop.f32.mrf.mxu2 }
 0x8b4   :  { %v648_v26 = vpop.f32.mrf.mxu0 }
 0x8b5   :  { %v655_v27 = vrot.slane %v648_v26, 7 }
 0x8b7   :  { %v657_v29 = vsel %vm395_vm4, %v589_v28, %v655_v27 }
 0x8b8   :  { %821 = vmatmul.msk.f32.vlgmr.msrb.gmra.mxu2 %vm87_vm0, %v657_v29 }
 0x93b   :  { %v686_v34 = vpop.f32.mrf.mxu2 }
 0x93c   :  { %v687_v35 = vadd.f32 %v838_v33, %v686_v34 }
 0x93e   :  { %v692_v37 = vsel %vm87_vm0, %v687_v35, %v690_v36 }
 0x93f   :  { %822 = vmatmul.msk.f32.vlgmr.msrb.gmra.mxu1 %vm506_vm5, %v692_v37 }
 0x9bc   :  { %v725_v42 = vpop.f32.mrf.mxu1 }
 0x9bd   :  { %v726_v43 = vadd.f32 %v839_v41, %v725_v42 }
 0x9bf   :  { %v728_v44 = vmax.f32 %v726_v43, 0.0 }
 0x9c1   :  { %823 = vmatmul.msk.f32.vlgmr.msrb.gmra.mxu3 %vm87_vm0, %v728_v44 }
 0xa44   :  { %v757_v46 = vpop.f32.mrf.mxu3 }
 0xa45   :  { %v758_v47 = vadd.f32 %v840_v45, %v757_v46 }
 0xa47   :  { %761 = vst.msk [vmem:[#allocation2] sm:$0x3] %vm760_vm7, %v758_v47 }
 0xa48   :  { %774 = dma.vmem_to_hbm [thread:$0]  %s770_s15, 32, %s772_s10, [#allocation3]  }
 0xa49   :  { %917 = dma.done.wait [#allocation3], 32  }
 0xa4a   :  { %918 = vsyncadd [#allocation3], 4294967264 }
 0xa4b   :  { %919 = dma.done.wait [#allocation5], 32  }
 0xa4c   :  { %920 = vsyncadd [#allocation5], 4294967264 }
 0xa4d   :  { %794 = vsyncpa [#allocation3], 1 }
 0xa4e   :  { %795 = vsyncpa [#allocation5], 1 }

// kernel: vh_bert_tsa_forward.2
= control target key start
LH: loop header
LB: loop body
LE: loop exit
PB: predicated region body
PF: predicated region fallthrough
CT: control target
= control target key end

     0   :  { %s2564_s21 = smov 0   ;;  %s2938_s0 = inlined_call_operand.vmem [shape: f32[2,2,8,32], index: 0, kind: input, shape index: {}]   ;;  %s2939_s1 = inlined_call_operand.vmem [shape: f32[2,2,2,8,8], index: 1, kind: input, shape index: {}]   ;;  %s2940_s2 = inlined_call_operand.vmem [shape: f32[2,1,32], index: 2, kind: input, shape index: {}]   ;;  %s2941_s3 = inlined_call_operand.vmem [shape: f32[2,1,32], index: 3, kind: input, shape index: {}]   ;;  %s2942_s4 = inlined_call_operand.vmem [shape: f32[2,2,32,96], index: 4, kind: input, shape index: {}]   ;;  %s2943_s5 = inlined_call_operand.vmem [shape: f32[2,2,1,96], index: 5, kind: input, shape index: {}]   ;;  %s2944_s6 = inlined_call_operand.vmem [shape: f32[2,2,32,32], index: 6, kind: input, shape index: {}]   ;;  %s2945_s7 = inlined_call_operand.vmem [shape: f32[2,2,1,32], index: 7, kind: input, shape index: {}]   ;;  %s2946_s8 = inlined_call_operand.vmem [shape: f32[2,2,1,32], index: 8, kind: input, shape index: {}]   ;;  %s2947_s9 = inlined_call_operand.vmem [shape: f32[2,2,1,32], index: 9, kind: input, shape index: {}]   ;;  %s2948_s10 = inlined_call_operand.vmem [shape: f32[2,2,32,64], index: 10, kind: input, shape index: {}]   ;;  %s2949_s11 = inlined_call_operand.vmem [shape: f32[2,2,1,64], index: 11, kind: input, shape index: {}]   ;;  %s2950_s12 = inlined_call_operand.vmem [shape: f32[2,2,64,32], index: 12, kind: input, shape index: {}]   ;;  %s2951_s13 = inlined_call_operand.vmem [shape: f32[2,2,1,32], index: 13, kind: input, shape index: {}]   ;;  %s2952_s14 = inlined_call_operand.vmem [shape: f32[2,2,1,32], index: 14, kind: input, shape index: {}]   ;;  %s2953_s15 = inlined_call_operand.vmem [shape: f32[2,2,1,32], index: 15, kind: input, shape index: {}]   ;;  %s2954_s16 = inlined_call_operand.vmem [shape: f32[2,2,8,32], index: 16, kind: output, shape index: {}]  }
   0x1   :  { %2967 = sst [smem:[#allocation3_spill]] %s2938_s0 }
   0x2   :  { %2968 = sst [smem:[#allocation4_spill]] %s2939_s1 }
   0x3   :  { %2969 = sst [smem:[#allocation5_spill]] %s2940_s2 }
   0x4   :  { %2970 = sst [smem:[#allocation6_spill]] %s2941_s3 }
   0x5   :  { %2971 = sst [smem:[#allocation7_spill]] %s2942_s4 }
   0x6   :  { %2972 = sst [smem:[#allocation8_spill]] %s2943_s5 }
   0x7 LB: > { %2973 = sst [smem:[#allocation2_spill]] %s2470_s21  ;;  %s2570_s22 = sadd.s32 4294967295, %s2470_s21   ;;  %s2470_s21 = sphi %s2564_s21, %s26_s21  }
   0x8   : > { %p2245_p0 = scmp.ge.s32.totalorder %s2470_s21, 1  ;;  %p600_p1 = scmp.lt.s32.totalorder %s2470_s21, 3 }
   0xa   : > { %p601_p2 = pnand %p2245_p0, %p600_p1 }
   0xb   : > { %p713_p3 = scmp.lt.s32.totalorder (!%p601_p2), %s2570_s22, 1  ;;  %s2974_s27 = sld [smem:[#allocation3_spill]] (!%p601_p2) }
   0xc   : > { %604 = sbr.rel (%p601_p2) target bundleno = 4028 (0xfbc), region = 84  ;;  %s2975_s2 = sld [smem:[#allocation5_spill]] (!%p601_p2) }
   0xd   : > { %s2976_s3 = sld [smem:[#allocation6_spill]] (!%p601_p2)  ;;  %s2965_s18 = smov (!%p601_p2), 96  }
   0xe   : > { %s2977_s5 = sld [smem:[#allocation8_spill]] (!%p601_p2)  ;;  %s2958_s30 = smov (!%p601_p2), 64  }
   0xf   : > { %s2978_s4 = sld [smem:[#allocation7_spill]] (!%p601_p2)  ;;  %s2957_s17 = smov (!%p601_p2), 48  }
  0x10   : > { %s2979_s1 = sld [smem:[#allocation4_spill]] (!%p601_p2)  ;;  %s2985_s26 = smov (!%p601_p2), 16  }
  0x11   : > { %s2576_s23 = scalar_select %p713_p3, %s2570_s22, 1  ;;  %vm790_vm0 = vcmask 261120   ;;  %v2472_v4 = vmov 32.0   ;;  %vm892_vm8 = vcmask 130048   ;;  %vm950_vm9 = vcmask 64512  }
  0x12   : > { %2398 = vrcp.f32 %v2472_v4  ;;  %p2340_p4 = scmp.ne.s32.totalorder %s2570_s22, 0 }
  0x13   : > { %s2955_s24 = sshll.u32 %s2576_s23, 4  ;;  %s725_s0 = scalar_lea.vmem %s2975_s2, %s2576_s23 }
  0x14   : > { %s717_s28 = scalar_lea.vmem %s2974_s27, %s2955_s24  ;;  %s728_s19 = scalar_lea.vmem %s2976_s3, %s2576_s23  ;;  %v2380_v39 = vld [vmem:[%s725_s0] ss:$0 sm:$0xff] }
  0x15   : > { %v786_v0 = vld [vmem:[%s717_s28] sm:$0xff]  ;;  %v787_v2 = vld [vmem:[%s717_s28 + $0x8] sm:$0xff]  ;;  %s2601_s20 = sshll.u32 %s2576_s23, 1  ;;  %s2610_s28 = sshll.u32 %s2576_s23, 6 }
  0x16   : > { %v791_v1 = vsel %vm790_vm0, %v786_v0, 0.0  ;;  %v794_v3 = vsel %vm790_vm0, %v787_v2, 0.0  ;;  %s2607_s27 = scalar_lea.vmem %s2977_s5, %s2601_s20  ;;  %s2616_s29 = scalar_lea.vmem %s2978_s4, %s2610_s28  ;;  %v2381_v43 = vld [vmem:[%s728_s19] ss:$0 sm:$0xff] }
  0x17   : > { %792 = vadd.xlane.f32.xlu0 %v791_v1  ;;  %v855_v21 = vld [vmem:[%s2616_s29 + $0x18] sm:$0xff]  ;;  %v854_v22 = vld [vmem:[%s2616_s29 + $0x10] sm:$0xff]  ;;  %v853_v23 = vld [vmem:[%s2616_s29 + $0x8] sm:$0xff]  ;;  %s2959_s0 = smov 80   ;;  %s2963_s19 = smov 112  }
  0x18   : > { %v2399_v5 = vpop.eup %2398  ;;  %878 = vmatpush.msra.mxu0 %v855_v21  ;;  %v852_v24 = vld [vmem:[%s2616_s29] sm:$0xff]  ;;  %s2344_s25 = sshll.u32 %s2576_s23, 5  ;;  %s2708_s21 = scalar_lea.vmem %s2945_s7, %s2601_s20 }
  0x19   : > { %v798_v6 = vmul.f32 32.0, %v2399_v5  ;;  %vm802_vm1 = vweird.f32 %v2399_v5  ;;  %v2382_v53 = vld [vmem:[%s2607_s27] ss:$0 sm:$0xff]  ;;  %s722_s24 = scalar_lea.vmem %s2979_s1, %s2344_s25  ;;  %s2739_s25 = scalar_lea.vmem %s2946_s8, %s2601_s20 }
  0x1a   : > { %879 = vmatpush.msra.mxu0 %v854_v22  ;;  %v2673_v1 = vld [vmem:[%s722_s24] sm:$0xff]  ;;  %s2751_s2 = scalar_lea.vmem %s2949_s11, %s2601_s20  ;;  %s2757_s5 = scalar_lea.vmem %s2948_s10, %s2610_s28 }
  0x1b   : > { %v799_v7 = vsub.f32 1.0, %v798_v6  ;;  %v2677_v6 = vld [vmem:[%s722_s24 + $0x8] sm:$0xff]  ;;  %s2773_s4 = scalar_lea.vmem %s2951_s13, %s2601_s20  ;;  %s2798_s1 = scalar_lea.vmem %s2952_s14, %s2601_s20 }
  0x1c   : > { %880 = vmatpush.msra.mxu0 %v853_v23 }
  0x1d   : > { %v800_v8 = vmul.f32 %v2399_v5, %v799_v7 }
  0x1e   : > { %881 = vmatpush.msra.mxu0 %v852_v24 }
  0x1f   : > { %795 = vadd.xlane.f32.xlu0 %v794_v3  ;;  %v801_v9 = vadd.f32 %v2399_v5, %v800_v8 }
  0x21   : > { %v2586_v10 = vsel %vm802_vm1, %v2399_v5, %v801_v9  ;;  %vm1334_vm1 = vcmask 523264  }
  0x8a   : > { %v793_v11 = vpop.xlane.xlu0 %792 }
  0x8b   : > { %v804_v12 = vmul.f32 %v2586_v10, %v793_v11 }
  0x8d   : > { %v806_v13 = vsub.f32 %v786_v0, %v804_v12  ;;  %v2681_v12 = vld [vmem:[%s722_s24 + $0x10] sm:$0xff] }
  0x8f   : > { %v808_v14 = vmul.f32 %v806_v13, %v806_v13 }
  0x91   : > { %v810_v15 = vsel %vm790_vm0, %v808_v14, 0.0 }
  0x92   : > { %811 = vadd.xlane.f32.xlu1 %v810_v15  ;;  %v796_v16 = vpop.xlane.xlu0 %795 }
  0x93   : > { %v805_v17 = vmul.f32 %v2586_v10, %v796_v16  ;;  %v2684_v16 = vld [vmem:[%s722_s24 + $0x18] sm:$0xff]  ;;  %s2961_s24 = smov 16  }
  0x95   : > { %v807_v18 = vsub.f32 %v787_v2, %v805_v17 }
  0x97   : > { %v809_v19 = vmul.f32 %v807_v18, %v807_v18 }
  0x99   : > { %v813_v20 = vsel %vm790_vm0, %v809_v19, 0.0 }
  0x9a   : > { %814 = vadd.xlane.f32.xlu1 %v813_v20 }
 0x105   : > { %v812_v25 = vpop.xlane.xlu1 %811 }
 0x106   : > { %v816_v26 = vmul.f32 %v812_v25, %v2586_v10 }
 0x108   : > { %v818_v27 = vadd.f32 1e-12, %v816_v26 }
 0x10a   : > { %2400 = vrsqrt.f32 %v818_v27  ;;  %vm826_vm3 = vweird.f32 %v818_v27 }
 0x10d   : > { %v815_v28 = vpop.xlane.xlu1 %814 }
 0x10e   : > { %v817_v29 = vmul.f32 %v815_v28, %v2586_v10 }
 0x110   : > { %v2401_v30 = vpop.eup %2400  ;;  %v819_v31 = vadd.f32 1e-12, %v817_v29 }
 0x111   : > { %v821_v32 = vmul.f32 %v2401_v30, %v818_v27  ;;  %vm827_vm2 = vweird.f32 %v2401_v30 }
 0x112   : > { %2402 = vrsqrt.f32 %v819_v31  ;;  %vm828_vm4 = vmor %vm826_vm3, %vm827_vm2  ;;  %vm836_vm5 = vweird.f32 %v819_v31 }
 0x113   : > { %v822_v33 = vmul.f32 %v2401_v30, %v821_v32 }
 0x115   : > { %v823_v34 = vmul.f32 0.5, %v822_v33 }
 0x117   : > { %v824_v35 = vsub.f32 1.5, %v823_v34 }
 0x118   : > { %v2403_v36 = vpop.eup %2402 }
 0x119   : > { %v825_v37 = vmul.f32 %v2401_v30, %v824_v35  ;;  %v831_v38 = vmul.f32 %v2403_v36, %v819_v31  ;;  %vm837_vm6 = vweird.f32 %v2403_v36 }
 0x11a   : > { %vm838_vm7 = vmor %vm836_vm5, %vm837_vm6 }
 0x11b   : > { %v829_v40 = vsel %vm828_vm4, %v2401_v30, %v825_v37  ;;  %v832_v41 = vmul.f32 %v2403_v36, %v831_v38 }
 0x11c   : > { %v840_v42 = vmul.f32 %v829_v40, %v806_v13 }
 0x11d   : > { %v833_v44 = vmul.f32 0.5, %v832_v41 }
 0x11e   : > { %v845_v45 = vmul.f32 %v2380_v39, %v840_v42 }
 0x11f   : > { %v834_v46 = vsub.f32 1.5, %v833_v44 }
 0x120   : > { %v2634_v47 = vadd.f32 %v2381_v43, %v845_v45 }
 0x121   : > { %v835_v48 = vmul.f32 %v2403_v36, %v834_v46 }
 0x122   : > { %2268 = vmatmul.msk.f32.vlgmr.msra.gmra.mxu0 %vm790_vm0, %v2634_v47 }
 0x123   : > { %v839_v49 = vsel %vm838_vm7, %v2403_v36, %v835_v48 }
 0x124   : > { %v841_v50 = vmul.f32 %v839_v49, %v807_v18 }
 0x126   : > { %v846_v51 = vmul.f32 %v2380_v39, %v841_v50 }
 0x128   : > { %v2638_v52 = vadd.f32 %v2381_v43, %v846_v51 }
 0x12a   : > { %2269 = vmatmul.msk.f32.gmra.mxu0 %vm790_vm0, %v2638_v52 }
 0x19f   : > { %v883_v54 = vpop.f32.mrf.mxu0 }
 0x1a0   : > { %v2643_v55 = vadd.f32 %v2382_v53, %v883_v54 }
 0x1a2   : > { %1027 = vrot.lane.b32.xlu0 %v2643_v55, %s2959_s0  ;;  %890 = vrot.lane.b32.xlu2 %v2643_v55, %s2965_s18 }
 0x1a3   : > { %1025 = vrot.lane.b32.xlu1 %v2643_v55, %s2963_s19 }
 0x1a7   : > { %v886_v56 = vpop.f32.mrf.mxu0 }
 0x1a8   : > { %v2651_v57 = vadd.f32 %v2382_v53, %v886_v56 }
 0x1aa   : > { %918 = vrot.lane.b32.xlu2 %v2651_v57, %s2965_s18  ;;  %v2365_v21 = vpack.i.bf16 %v2651_v57, %v2643_v55  ;;  %s2809_s18 = scalar_lea.vmem %s2953_s15, %s2601_s20 }
 0x1b2   : > { %1055 = vrot.lane.b32.xlu2 %v2651_v57, %s2959_s0  ;;  %s2716_s0 = scalar_lea.vmem %s2944_s6, %s2610_s28  ;;  %s2348_s28 = sshll.u32 %s2576_s23, 7 }
 0x1ba   : > { %1053 = vrot.lane.b32.xlu2 %v2651_v57, %s2963_s19  ;;  %s2745_s19 = scalar_lea.vmem %s2947_s9, %s2601_s20  ;;  %s2980_s20 = smov 96  }
 0x1fc   : > { %v891_v58 = vpop.permute.xlu2 %890 }
 0x1fd   : > { %2270 = vmatpush.xpose.msk.msra.mxu2 %vm892_vm8, %v891_v58 }
 0x200   : > { %2271 = vmatmul.msk.f32.vlgmr.msra.gmra.mxu2 %vm892_vm8, %v2643_v55 }
 0x204   : > { %v919_v59 = vpop.permute.xlu2 %918 }
 0x205   : > { %2272 = vmatpush.xpose.msk.msrb.mxu2 %vm892_vm8, %v919_v59 }
 0x208   : > { %2273 = vmatmul.msk.f32.vlgmr.msrb.gmra.mxu2 %vm892_vm8, %v2651_v57 }
 0x20c   : > { %v1056_v60 = vpop.permute.xlu2 %1055 }
 0x20d   : > { %2278 = vmatpush.xpose.msk.msra.mxu2 %vm892_vm8, %v1056_v60 }
 0x214   : > { %v1054_v61 = vpop.permute.xlu2 %1053  ;;  %v1028_v62 = vpop.permute.xlu0 %1027 }
 0x215   : > { %2276 = vmatpush.xpose.msk.msra.mxu1 %vm892_vm8, %v1028_v62  ;;  %2279 = vmatmul.msk.f32.vlgmr.msra.gmra.mxu2 %vm892_vm8, %v1054_v61  ;;  %v1026_v63 = vpop.permute.xlu1 %1025 }
 0x218   : > { %2277 = vmatmul.msk.f32.vlgmr.msra.gmra.mxu1 %vm892_vm8, %v1026_v63 }
 0x283   : > { %v914_v0 = vpop.f32.mrf.mxu2 }
 0x284   : > { %v944_v2 = vmul.f32 0.25, %v914_v0 }
 0x286   : > { %v948_v3 = vadd.f32 %v2673_v1, %v944_v2  ;;  %v1175_v2 = vld [vmem:[%s2716_s0 + $0x18] sm:$0xff] }
 0x287   : > { %1198 = vmatpush.msrb.mxu2 %v1175_v2 }
 0x288   : > { %v951_v4 = vsel %vm950_vm9, %v948_v3, -inf }
 0x289   : > { %952 = vmax.xlane.f32.xlu2 %v951_v4  ;;  %v1173_v4 = vld [vmem:[%s2716_s0 + $0x8] sm:$0xff] }
 0x28b   : > { %v941_v5 = vpop.f32.mrf.mxu2 }
 0x28c   : > { %v945_v7 = vmul.f32 0.25, %v941_v5  ;;  %v1172_v5 = vld [vmem:[%s2716_s0] sm:$0xff] }
 0x28e   : > { %v949_v8 = vadd.f32 %v2677_v6, %v945_v7 }
 0x290   : > { %v954_v9 = vsel %vm950_vm9, %v949_v8, -inf }
 0x291   : > { %955 = vmax.xlane.f32.xlu0 %v954_v9 }
 0x295   : > { %v1050_v11 = vpop.f32.mrf.mxu1 }
 0x296   : > { %v1081_v13 = vmul.f32 0.25, %v1050_v11 }
 0x298   : > { %v1078_v14 = vpop.f32.mrf.mxu2  ;;  %v1086_v15 = vadd.f32 %v2681_v12, %v1081_v13  ;;  %v2383_v13 = vld [vmem:[%s2708_s21] ss:$0 sm:$0xff] }
 0x299   : > { %v1082_v17 = vmul.f32 0.25, %v1078_v14 }
 0x29a   : > { %v1088_v18 = vsel %vm950_vm9, %v1086_v15, -inf }
 0x29b   : > { %1089 = vmax.xlane.f32.xlu1 %v1088_v18  ;;  %v1087_v19 = vadd.f32 %v2684_v16, %v1082_v17 }
 0x29d   : > { %v1091_v20 = vsel %vm950_vm9, %v1087_v19, -inf }
 0x29e   : > { %1092 = vmax.xlane.f32.xlu2 %v1091_v20 }
 0x2b4   : > { %2366 = vrot.lane.b32.xlu1 %v2365_v21, %s2958_s30  ;;  %s2779_s30 = scalar_lea.vmem %s2950_s12, %s2348_s28 }
 0x2b5   : > { %v1329_v2 = vld [vmem:[%s2779_s30 + $0x38] sm:$0xff] }
 0x2fc   : > { %v953_v25 = vpop.xlane.xlu2 %952 }
 0x2fd   : > { %v957_v30 = vsub.f32 %v948_v3, %v953_v25  ;;  %v1174_v3 = vld [vmem:[%s2716_s0 + $0x10] sm:$0xff] }
 0x2fe   : > { %1199 = vmatpush.msrb.mxu2 %v1174_v3  ;;  %v1328_v3 = vld [vmem:[%s2779_s30 + $0x30] sm:$0xff] }
 0x2ff   : > { %v959_v32 = vmul.f32 1.442695, %v957_v30 }
 0x300   : > { %1200 = vmatpush.msrb.mxu2 %v1173_v4  ;;  %v1327_v4 = vld [vmem:[%s2779_s30 + $0x28] sm:$0xff] }
 0x302   : > { %1201 = vmatpush.msrb.mxu2 %v1172_v5  ;;  %v1326_v5 = vld [vmem:[%s2779_s30 + $0x20] sm:$0xff] }
 0x304   : > { %v956_v22 = vpop.xlane.xlu0 %955 }
 0x305   : > { %v958_v23 = vsub.f32 %v949_v8, %v956_v22 }
 0x307   : > { %v961_v24 = vmul.f32 1.442695, %v958_v23 }
 0x309   : > { %2404 = vpow2.f32 %v961_v24 }
 0x30e   : > { %v1090_v26 = vpop.xlane.xlu1 %1089 }
 0x30f   : > { %v2405_v27 = vpop.eup %2404  ;;  %v1094_v28 = vsub.f32 %v1086_v15, %v1090_v26 }
 0x310   : > { %v966_v29 = vsel %vm950_vm9, %v2405_v27, 0.0 }
 0x311   : > { %v1096_v31 = vmul.f32 1.442695, %v1094_v28  ;;  %967 = vadd.xlane.f32.xlu2 %v966_v29  ;;  %v1093_v33 = vpop.xlane.xlu2 %1092 }
 0x312   : > { %v1095_v35 = vsub.f32 %v1087_v19, %v1093_v33  ;;  %v1268_v33 = vld [vmem:[%s2757_s5 + $0x8] sm:$0xff] }
 0x313   : > { %2406 = vpow2.f32 %v1096_v31  ;;  %v1270_v31 = vld [vmem:[%s2757_s5 + $0x18] sm:$0xff] }
 0x314   : > { %2408 = vpow2.f32 %v959_v32  ;;  %v1098_v37 = vmul.f32 1.442695, %v1095_v35  ;;  %1293 = vmatpush.msrb.mxu0 %v1270_v31  ;;  %v1269_v32 = vld [vmem:[%s2757_s5 + $0x10] sm:$0xff] }
 0x316   : > { %2410 = vpow2.f32 %v1098_v37  ;;  %1294 = vmatpush.msrb.mxu0 %v1269_v32 }
 0x318   : > { %1295 = vmatpush.msrb.mxu0 %v1268_v33 }
 0x319   : > { %v2407_v34 = vpop.eup %2406 }
 0x31a   : > { %v1100_v36 = vsel %vm950_vm9, %v2407_v34, 0.0  ;;  %v2409_v38 = vpop.eup %2408 }
 0x31b   : > { %1101 = vadd.xlane.f32.xlu0 %v1100_v36  ;;  %v963_v39 = vsel %vm950_vm9, %v2409_v38, 0.0 }
 0x31c   : > { %v2411_v41 = vpop.eup %2410 }
 0x31d   : > { %v1103_v44 = vsel %vm950_vm9, %v2411_v41, 0.0 }
 0x323   : > { %964 = vadd.xlane.f32.xlu0 %v963_v39 }
 0x326   : > { %v2367_v40 = vpop.permute.xlu1 %2366 }
 0x327   : > { %v2368_v42 = vunpack.i.l.bf16 %v2367_v40  ;;  %v2369_v43 = vunpack.i.h.bf16 %v2367_v40 }
 0x329   : > { %994 = vmatpush.msra.mxu3 %v2368_v42  ;;  %1110 = vrot.lane.b32.xlu2 %v2643_v55, %s2957_s17 }
 0x32b   : > { %1020 = vmatpush.msrb.mxu3 %v2369_v43  ;;  %1104 = vadd.xlane.f32.xlu0 %v1103_v44 }
 0x33f   : > { %1136 = vrot.lane.b32.xlu0 %v2651_v57, %s2957_s17  ;;  %s2984_s17 = smov 48  }
 0x384   : > { %v968_v46 = vpop.xlane.xlu2 %967 }
 0x38c   : > { %v1111_v51 = vpop.permute.xlu2 %1110 }
 0x38e   : > { %v1102_v45 = vpop.xlane.xlu0 %1101 }
 0x396   : > { %v965_v48 = vpop.xlane.xlu0 %964 }
 0x397   : > { %2412 = vrcp.f32 %v965_v48 }
 0x398   : > { %2414 = vrcp.f32 %v968_v46 }
 0x399   : > { %2416 = vrcp.f32 %v1102_v45 }
 0x39d   : > { %v2413_v49 = vpop.eup %2412 }
 0x39e   : > { %v971_v50 = vmul.f32 %v2413_v49, %v2409_v38  ;;  %v2415_v53 = vpop.eup %2414  ;;  %v1105_v54 = vpop.xlane.xlu0 %1104 }
 0x39f   : > { %v972_v55 = vmul.f32 %v2415_v53, %v2405_v27  ;;  %2418 = vrcp.f32 %v1105_v54  ;;  %v2417_v56 = vpop.eup %2416 }
 0x3a0   : > { %2274 = vmatmul.msk.f32.vlgmr.msra.gmra.mxu3 %vm950_vm9, %v971_v50  ;;  %v1108_v58 = vmul.f32 %v2417_v56, %v2407_v34  ;;  %v1267_v34 = vld [vmem:[%s2757_s5] sm:$0xff] }
 0x3a1   : > { %1131 = vmatpush.msra.mxu3 %v1111_v51  ;;  %1296 = vmatpush.msrb.mxu0 %v1267_v34  ;;  %v2384_v50 = vld [vmem:[%s2739_s25] ss:$0 sm:$0xff] }
 0x3a5   : > { %v2419_v57 = vpop.eup %2418 }
 0x3a6   : > { %v1109_v60 = vmul.f32 %v2419_v57, %v2411_v41 }
 0x3a8   : > { %2275 = vmatmul.msk.f32.vlgmr.msrb.gmra.mxu3 %vm950_vm9, %v972_v55  ;;  %v2385_v55 = vld [vmem:[%s2745_s19] ss:$0 sm:$0xff] }
 0x3a9   : > { %1349 = vmatpush.msrb.mxu3 %v1329_v2 }
 0x3ab   : > { %1350 = vmatpush.msrb.mxu3 %v1328_v3 }
 0x3ad   : > { %1351 = vmatpush.msrb.mxu3 %v1327_v4 }
 0x3af   : > { %1352 = vmatpush.msrb.mxu3 %v1326_v5 }
 0x3b0   : > { %2282 = vmatmul.msk.f32.vlgmr.msra.gmra.mxu3 %vm950_vm9, %v1108_v58 }
 0x3b1   : > { %v1137_v59 = vpop.permute.xlu0 %1136 }
 0x3b2   : > { %1157 = vmatpush.msrb.mxu1 %v1137_v59 }
 0x3b3   : > { %2283 = vmatmul.msk.f32.vlgmr.msrb.gmra.mxu1 %vm950_vm9, %v1109_v60 }
 0x423   : > { %v996_v61 = vpop.f32.mrf.mxu3 }
 0x42b   : > { %v1022_v62 = vpop.f32.mrf.mxu3 }
 0x430   : > { %v1159_v63 = vpop.f32.mrf.mxu1 }
 0x431   : > { %1166 = vrot.lane.b32.xlu2 %v1159_v63, %s2961_s24 }
 0x433   : > { %v1133_v0 = vpop.f32.mrf.mxu3 }
 0x434   : > { %1164 = vrot.lane.b32.xlu1 %v1133_v0, %s2961_s24  ;;  %s2982_s24 = smov 80  }
 0x48b   : > { %v1167_v9 = vpop.permute.xlu2 %1166 }
 0x48c   : > { %v1171_v11 = vsel %vm892_vm8, %v1022_v62, %v1167_v9  ;;  %v1323_v9 = vld [vmem:[%s2779_s30 + $0x8] sm:$0xff] }
 0x4a6   : > { %v1165_v7 = vpop.permute.xlu1 %1164 }
 0x4a7   : > { %v1170_v8 = vsel %vm892_vm8, %v996_v61, %v1165_v7  ;;  %v1325_v7 = vld [vmem:[%s2779_s30 + $0x18] sm:$0xff] }
 0x4a8   : > { %2284 = vmatmul.msk.f32.vlgmr.msrb.gmra.mxu2 %vm790_vm0, %v1170_v8  ;;  %v1324_v8 = vld [vmem:[%s2779_s30 + $0x10] sm:$0xff]  ;;  %1353 = vmatpush.msrb.mxu3 %v1325_v7 }
 0x4aa   : > { %1354 = vmatpush.msrb.mxu3 %v1324_v8 }
 0x4ac   : > { %1355 = vmatpush.msrb.mxu3 %v1323_v9 }
 0x4b0   : > { %2285 = vmatmul.msk.f32.gmra.mxu2 %vm790_vm0, %v1171_v11  ;;  %v1322_v11 = vld [vmem:[%s2779_s30] sm:$0xff] }
 0x4b1   : > { %1356 = vmatpush.msrb.mxu3 %v1322_v11 }
 0x52b   : > { %v1203_v14 = vpop.f32.mrf.mxu2 }
 0x52c   : > { %v1204_v15 = vadd.f32 %v2383_v13, %v1203_v14 }
 0x52e   : > { %v1209_v17 = vadd.f32 %v1204_v15, %v2634_v47 }
 0x530   : > { %v1213_v18 = vsel %vm790_vm0, %v1209_v17, 0.0 }
 0x531   : > { %1214 = vadd.xlane.f32.xlu1 %v1213_v18 }
 0x533   : > { %v1206_v19 = vpop.f32.mrf.mxu2 }
 0x534   : > { %v1207_v20 = vadd.f32 %v2383_v13, %v1206_v19  ;;  %v2387_v13 = vld [vmem:[%s2751_s2] ss:$0 sm:$0xff] }
 0x536   : > { %v1210_v21 = vadd.f32 %v1207_v20, %v2638_v52 }
 0x538   : > { %v1216_v22 = vsel %vm790_vm0, %v1210_v21, 0.0 }
 0x539   : > { %1217 = vadd.xlane.f32.xlu2 %v1216_v22 }
 0x5a4   : > { %v1215_v23 = vpop.xlane.xlu1 %1214 }
 0x5a5   : > { %v1219_v24 = vmul.f32 %v1215_v23, %v2586_v10 }
 0x5a7   : > { %v1221_v25 = vsub.f32 %v1209_v17, %v1219_v24 }
 0x5a9   : > { %v1223_v26 = vmul.f32 %v1221_v25, %v1221_v25 }
 0x5ab   : > { %v1225_v47 = vsel %vm790_vm0, %v1223_v26, 0.0 }
 0x5ac   : > { %1226 = vadd.xlane.f32.xlu0 %v1225_v47  ;;  %v1218_v27 = vpop.xlane.xlu2 %1217 }
 0x5ad   : > { %v1220_v28 = vmul.f32 %v1218_v27, %v2586_v10 }
 0x5af   : > { %v1222_v29 = vsub.f32 %v1210_v21, %v1220_v28 }
 0x5b1   : > { %v1224_v30 = vmul.f32 %v1222_v29, %v1222_v29 }
 0x5b3   : > { %v1228_v52 = vsel %vm790_vm0, %v1224_v30, 0.0 }
 0x5b4   : > { %1229 = vadd.xlane.f32.xlu1 %v1228_v52 }
 0x61f   : > { %v1227_v35 = vpop.xlane.xlu0 %1226 }
 0x620   : > { %v1231_v36 = vmul.f32 %v1227_v35, %v2586_v10  ;;  %v2388_v35 = vld [vmem:[%s2773_s4] ss:$0 sm:$0xff] }
 0x622   : > { %v1233_v37 = vadd.f32 1e-12, %v1231_v36 }
 0x624   : > { %2420 = vrsqrt.f32 %v1233_v37  ;;  %vm1241_vm11 = vweird.f32 %v1233_v37 }
 0x627   : > { %v1230_v38 = vpop.xlane.xlu1 %1229 }
 0x628   : > { %v1232_v39 = vmul.f32 %v1230_v38, %v2586_v10 }
 0x62a   : > { %v2421_v40 = vpop.eup %2420  ;;  %v1234_v41 = vadd.f32 1e-12, %v1232_v39 }
 0x62b   : > { %v1236_v42 = vmul.f32 %v2421_v40, %v1233_v37  ;;  %vm1242_vm10 = vweird.f32 %v2421_v40 }
 0x62c   : > { %2422 = vrsqrt.f32 %v1234_v41  ;;  %vm1243_vm12 = vmor %vm1241_vm11, %vm1242_vm10  ;;  %vm1251_vm14 = vweird.f32 %v1234_v41 }
 0x62d   : > { %v1237_v43 = vmul.f32 %v2421_v40, %v1236_v42 }
 0x62f   : > { %v1238_v44 = vmul.f32 0.5, %v1237_v43 }
 0x631   : > { %v1239_v45 = vsub.f32 1.5, %v1238_v44 }
 0x632   : > { %v2423_v46 = vpop.eup %2422 }
 0x633   : > { %v1240_v48 = vmul.f32 %v2421_v40, %v1239_v45  ;;  %v1246_v49 = vmul.f32 %v2423_v46, %v1234_v41  ;;  %vm1252_vm13 = vweird.f32 %v2423_v46 }
 0x634   : > { %vm1253_vm15 = vmor %vm1251_vm14, %vm1252_vm13 }
 0x635   : > { %v1244_v51 = vsel %vm1243_vm12, %v2421_v40, %v1240_v48  ;;  %v1247_v53 = vmul.f32 %v2423_v46, %v1246_v49 }
 0x636   : > { %v1255_v54 = vmul.f32 %v1244_v51, %v1221_v25 }
 0x637   : > { %v1248_v56 = vmul.f32 0.5, %v1247_v53 }
 0x638   : > { %v1260_v57 = vmul.f32 %v2384_v50, %v1255_v54 }
 0x639   : > { %v1249_v58 = vsub.f32 1.5, %v1248_v56  ;;  %v2293_v56 = vld [vmem:[%s2616_s29 + $0x38] sm:$0xff] }
 0x63a   : > { %v1265_v59 = vadd.f32 %v2385_v55, %v1260_v57  ;;  %1450 = vmatpush.msra.mxu1 %v2293_v56  ;;  %v2292_v57 = vld [vmem:[%s2616_s29 + $0x30] sm:$0xff] }
 0x63b   : > { %v1250_v60 = vmul.f32 %v2423_v46, %v1249_v58  ;;  %v2291_v58 = vld [vmem:[%s2616_s29 + $0x28] sm:$0xff] }
 0x63c   : > { %2286 = vmatmul.msk.f32.vlgmr.msrb.gmra.mxu0 %vm790_vm0, %v1265_v59  ;;  %1451 = vmatpush.msra.mxu1 %v2292_v57 }
 0x63d   : > { %v1254_v61 = vsel %vm1253_vm15, %v2423_v46, %v1250_v60 }
 0x63e   : > { %v1256_v62 = vmul.f32 %v1254_v61, %v1222_v29  ;;  %1452 = vmatpush.msra.mxu1 %v2291_v58 }
 0x640   : > { %v1261_v63 = vmul.f32 %v2384_v50, %v1256_v62 }
 0x642   : > { %v1266_v0 = vadd.f32 %v2385_v55, %v1261_v63 }
 0x644   : > { %2287 = vmatmul.msk.f32.gmra.mxu0 %vm790_vm0, %v1266_v0 }
 0x6b9   : > { %v1298_v14 = vpop.f32.mrf.mxu0 }
 0x6ba   : > { %v1299_v15 = vadd.f32 %v2387_v13, %v1298_v14  ;;  %v2389_v14 = vld [vmem:[%s2798_s1] ss:$0 sm:$0xff] }
 0x6bc   : > { %v1306_v17 = vmul.f32 0.044715, %v1299_v15  ;;  %v1304_v29 = vmul.f32 0.5, %v1299_v15 }
 0x6be   : > { %v1308_v18 = vmul.f32 %v1306_v17, %v1299_v15 }
 0x6c0   : > { %v1310_v19 = vmul.f32 %v1308_v18, %v1299_v15 }
 0x6c1   : > { %v1301_v20 = vpop.f32.mrf.mxu0 }
 0x6c2   : > { %v1312_v21 = vadd.f32 %v1310_v19, %v1299_v15  ;;  %v1302_v22 = vadd.f32 %v2387_v13, %v1301_v20  ;;  %v2390_v19 = vld [vmem:[%s2809_s18] ss:$0 sm:$0xff] }
 0x6c4   : > { %v1314_v23 = vmul.f32 0.7978846, %v1312_v21  ;;  %v1307_v24 = vmul.f32 0.044715, %v1302_v22  ;;  %v1305_v32 = vmul.f32 0.5, %v1302_v22 }
 0x6c6   : > { %2424 = vtanh.f32 %v1314_v23  ;;  %v1309_v25 = vmul.f32 %v1307_v24, %v1302_v22 }
 0x6c8   : > { %v1311_v26 = vmul.f32 %v1309_v25, %v1302_v22 }
 0x6ca   : > { %v1313_v47 = vadd.f32 %v1311_v26, %v1302_v22 }
 0x6cc   : > { %v2425_v27 = vpop.eup %2424  ;;  %v1315_v28 = vmul.f32 0.7978846, %v1313_v47 }
 0x6cd   : > { %v1318_v30 = vadd.f32 1.0, %v2425_v27 }
 0x6ce   : > { %2426 = vtanh.f32 %v1315_v28  ;;  %v2391_v28 = vld [vmem:[%s2607_s27 + $0x1] ss:$0 sm:$0xff]  ;;  %s2983_s27 = smov 64  }
 0x6cf   : > { %v1320_v52 = vmul.f32 %v1318_v30, %v1304_v29 }
 0x6d1   : > { %2288 = vmatmul.msk.f32.vlgmr.msrb.gmra.mxu3 %vm1334_vm1, %v1320_v52 }
 0x6d4   : > { %v2427_v31 = vpop.eup %2426 }
 0x6d5   : > { %v1319_v33 = vadd.f32 1.0, %v2427_v31 }
 0x6d7   : > { %v1321_v34 = vmul.f32 %v1319_v33, %v1305_v32 }
 0x6d9   : > { %2289 = vmatmul.msk.f32.gmra.mxu3 %vm1334_vm1, %v1321_v34 }
 0x754   : > { %v1358_v36 = vpop.f32.mrf.mxu3 }
 0x755   : > { %v1359_v37 = vadd.f32 %v2388_v35, %v1358_v36 }
 0x757   : > { %v1364_v38 = vadd.f32 %v1359_v37, %v1265_v59  ;;  %v2290_v59 = vld [vmem:[%s2616_s29 + $0x20] sm:$0xff]  ;;  %s2981_s29 = smov 112  }
 0x758   : > { %1453 = vmatpush.msra.mxu1 %v2290_v59 }
 0x759   : > { %v1368_v39 = vsel %vm790_vm0, %v1364_v38, 0.0 }
 0x75a   : > { %1369 = vadd.xlane.f32.xlu2 %v1368_v39 }
 0x75c   : > { %v1361_v40 = vpop.f32.mrf.mxu3 }
 0x75d   : > { %v1362_v41 = vadd.f32 %v2388_v35, %v1361_v40 }
 0x75f   : > { %v1365_v42 = vadd.f32 %v1362_v41, %v1266_v0 }
 0x761   : > { %v1371_v43 = vsel %vm790_vm0, %v1365_v42, 0.0 }
 0x762   : > { %1372 = vadd.xlane.f32.xlu0 %v1371_v43 }
 0x7cd   : > { %v1370_v44 = vpop.xlane.xlu2 %1369 }
 0x7ce   : > { %v1374_v45 = vmul.f32 %v1370_v44, %v2586_v10 }
 0x7d0   : > { %v1376_v46 = vsub.f32 %v1364_v38, %v1374_v45 }
 0x7d2   : > { %v1378_v48 = vmul.f32 %v1376_v46, %v1376_v46 }
 0x7d4   : > { %v1380_v49 = vsel %vm790_vm0, %v1378_v48, 0.0 }
 0x7d5   : > { %v1373_v50 = vpop.xlane.xlu0 %1372  ;;  %1381 = vadd.xlane.f32.xlu1 %v1380_v49 }
 0x7d6   : > { %v1375_v51 = vmul.f32 %v1373_v50, %v2586_v10 }
 0x7d8   : > { %v1377_v53 = vsub.f32 %v1365_v42, %v1375_v51 }
 0x7da   : > { %v1379_v54 = vmul.f32 %v1377_v53, %v1377_v53 }
 0x7dc   : > { %v1383_v55 = vsel %vm790_vm0, %v1379_v54, 0.0 }
 0x7dd   : > { %1384 = vadd.xlane.f32.xlu2 %v1383_v55 }
 0x848   : > { %v1382_v60 = vpop.xlane.xlu1 %1381 }
 0x849   : > { %v1386_v61 = vmul.f32 %v1382_v60, %v2586_v10 }
 0x84b   : > { %v1388_v62 = vadd.f32 1e-12, %v1386_v61 }
 0x84d   : > { %2428 = vrsqrt.f32 %v1388_v62  ;;  %vm1396_vm3 = vweird.f32 %v1388_v62 }
 0x850   : > { %v1385_v63 = vpop.xlane.xlu2 %1384 }
 0x851   : > { %v1387_v0 = vmul.f32 %v1385_v63, %v2586_v10 }
 0x853   : > { %v2429_v2 = vpop.eup %2428  ;;  %v1389_v3 = vadd.f32 1e-12, %v1387_v0 }
 0x854   : > { %v1391_v4 = vmul.f32 %v2429_v2, %v1388_v62  ;;  %vm1397_vm2 = vweird.f32 %v2429_v2 }
 0x855   : > { %2430 = vrsqrt.f32 %v1389_v3  ;;  %vm1398_vm4 = vmor %vm1396_vm3, %vm1397_vm2  ;;  %vm1406_vm6 = vweird.f32 %v1389_v3 }
 0x856   : > { %v1392_v5 = vmul.f32 %v2429_v2, %v1391_v4 }
 0x858   : > { %v1393_v7 = vmul.f32 0.5, %v1392_v5 }
 0x85a   : > { %v1394_v8 = vsub.f32 1.5, %v1393_v7 }
 0x85b   : > { %v2431_v9 = vpop.eup %2430 }
 0x85c   : > { %v1395_v11 = vmul.f32 %v2429_v2, %v1394_v8  ;;  %v1401_v13 = vmul.f32 %v2431_v9, %v1389_v3  ;;  %vm1407_vm5 = vweird.f32 %v2431_v9 }
 0x85d   : > { %vm1408_vm7 = vmor %vm1406_vm6, %vm1407_vm5 }
 0x85e   : > { %v1399_v15 = vsel %vm1398_vm4, %v2429_v2, %v1395_v11  ;;  %v1402_v17 = vmul.f32 %v2431_v9, %v1401_v13 }
 0x85f   : > { %v1410_v18 = vmul.f32 %v1399_v15, %v1376_v46 }
 0x860   : > { %v1403_v20 = vmul.f32 0.5, %v1402_v17 }
 0x861   : > { %v1415_v21 = vmul.f32 %v2389_v14, %v1410_v18 }
 0x862   : > { %v1404_v22 = vsub.f32 1.5, %v1403_v20 }
 0x863   : > { %v2819_v23 = vadd.f32 %v2390_v19, %v1415_v21 }
 0x864   : > { %v1405_v24 = vmul.f32 %v2431_v9, %v1404_v22 }
 0x865   : > { %2295 = vmatmul.msk.f32.vlgmr.msra.gmra.mxu1 %vm790_vm0, %v2819_v23 }
 0x866   : > { %v1409_v25 = vsel %vm1408_vm7, %v2431_v9, %v1405_v24 }
 0x867   : > { %v1411_v26 = vmul.f32 %v1409_v25, %v1377_v53 }
 0x869   : > { %v1416_v47 = vmul.f32 %v2389_v14, %v1411_v26 }
 0x86b   : > { %v2823_v27 = vadd.f32 %v2390_v19, %v1416_v47 }
 0x86d   : > { %2296 = vmatmul.msk.f32.gmra.mxu1 %vm790_vm0, %v2823_v27 }
 0x8e2   : > { %v1455_v29 = vpop.f32.mrf.mxu1 }
 0x8e3   : > { %v2828_v30 = vadd.f32 %v2391_v28, %v1455_v29 }
 0x8e5   : > { %1462 = vrot.lane.b32.xlu0 %v2828_v30, %s2980_s20 }
 0x8ea   : > { %v1458_v52 = vpop.f32.mrf.mxu1 }
 0x8eb   : > { %v2832_v31 = vadd.f32 %v2391_v28, %v1458_v52 }
 0x8ed   : > { %1623 = vrot.lane.b32.xlu0 %v2832_v31, %s2981_s29  ;;  %1625 = vrot.lane.b32.xlu2 %v2832_v31, %s2982_s24  ;;  %v2370_v11 = vpack.i.bf16 %v2832_v31, %v2828_v30 }
 0x8ee   : > { %1489 = vrot.lane.b32.xlu1 %v2832_v31, %s2980_s20 }
 0x8f5   : > { %1595 = vrot.lane.b32.xlu0 %v2828_v30, %s2981_s29 }
 0x8f6   : > { %1597 = vrot.lane.b32.xlu1 %v2828_v30, %s2982_s24 }
 0x947   : > { %v1626_v32 = vpop.permute.xlu2 %1625 }
 0x948   : > { %2305 = vmatpush.xpose.msk.msra.mxu3 %vm892_vm8, %v1626_v32  ;;  %v2314_v32 = vld [vmem:[%s2716_s0 + $0x38] sm:$0xff] }
 0x957   : > { %v1463_v33 = vpop.permute.xlu0 %1462 }
 0x958   : > { %2297 = vmatpush.xpose.msk.msra.mxu2 %vm892_vm8, %v1463_v33  ;;  %v2313_v33 = vld [vmem:[%s2716_s0 + $0x30] sm:$0xff] }
 0x95b   : > { %2298 = vmatmul.msk.f32.vlgmr.msra.gmra.mxu2 %vm892_vm8, %v2828_v30 }
 0x95f   : > { %v1624_v34 = vpop.permute.xlu0 %1623 }
 0x960   : > { %v1490_v35 = vpop.permute.xlu1 %1489  ;;  %2306 = vmatmul.msk.f32.vlgmr.msra.gmra.mxu3 %vm892_vm8, %v1624_v34  ;;  %v2312_v34 = vld [vmem:[%s2716_s0 + $0x28] sm:$0xff] }
 0x961   : > { %2299 = vmatpush.xpose.msk.msra.mxu0 %vm892_vm8, %v1490_v35 }
 0x964   : > { %2300 = vmatmul.msk.f32.vlgmr.msra.gmra.mxu0 %vm892_vm8, %v2832_v31 }
 0x967   : > { %v1596_v37 = vpop.permute.xlu0 %1595 }
 0x968   : > { %v1598_v36 = vpop.permute.xlu1 %1597 }
 0x969   : > { %2303 = vmatpush.xpose.msk.msrb.mxu0 %vm892_vm8, %v1598_v36 }
 0x96c   : > { %2304 = vmatmul.msk.f32.vlgmr.msrb.gmra.mxu0 %vm892_vm8, %v1596_v37 }
 0x96d   : > { %1769 = vmatpush.msra.mxu0 %v2314_v32  ;;  %v2334_v32 = vld [vmem:[%s2779_s30 + $0x78] sm:$0xff] }
 0x96f   : > { %1770 = vmatpush.msra.mxu0 %v2313_v33  ;;  %v2333_v33 = vld [vmem:[%s2779_s30 + $0x70] sm:$0xff] }
 0x971   : > { %1771 = vmatpush.msra.mxu0 %v2312_v34  ;;  %v2332_v34 = vld [vmem:[%s2779_s30 + $0x68] sm:$0xff] }
 0x9de   : > { %v1485_v38 = vpop.f32.mrf.mxu2 }
 0x9df   : > { %v1515_v39 = vmul.f32 0.25, %v1485_v38 }
 0x9e1   : > { %v1512_v40 = vpop.f32.mrf.mxu0  ;;  %v1519_v41 = vadd.f32 %v1515_v39, %v2673_v1  ;;  %v2311_v39 = vld [vmem:[%s2716_s0 + $0x20] sm:$0xff] }
 0x9e2   : > { %v1516_v42 = vmul.f32 0.25, %v1512_v40  ;;  %1772 = vmatpush.msra.mxu0 %v2311_v39  ;;  %v2327_v39 = vld [vmem:[%s2779_s30 + $0x40] sm:$0xff] }
 0x9e3   : > { %v1648_v43 = vpop.f32.mrf.mxu3  ;;  %v1521_v44 = vsel %vm950_vm9, %v1519_v41, -inf }
 0x9e4   : > { %v1652_v45 = vmul.f32 0.25, %v1648_v43  ;;  %1522 = vmax.xlane.f32.xlu2 %v1521_v44  ;;  %v1520_v46 = vadd.f32 %v1516_v42, %v2677_v6  ;;  %v2392_v44 = vld [vmem:[%s2708_s21 + $0x1] ss:$0 sm:$0xff] }
 0x9e6   : > { %v1524_v48 = vsel %vm950_vm9, %v1520_v46, -inf  ;;  %v1656_v49 = vadd.f32 %v2684_v16, %v1652_v45 }
 0x9e7   : > { %1525 = vmax.xlane.f32.xlu1 %v1524_v48 }
 0x9e8   : > { %v1660_v53 = vsel %vm950_vm9, %v1656_v49, -inf }
 0x9e9   : > { %v1620_v50 = vpop.f32.mrf.mxu0 }
 0x9ea   : > { %v1651_v51 = vmul.f32 0.25, %v1620_v50 }
 0x9ec   : > { %1661 = vmax.xlane.f32.xlu2 %v1660_v53  ;;  %v1655_v1 = vadd.f32 %v2681_v12, %v1651_v51 }
 0x9ee   : > { %v1657_v54 = vsel %vm950_vm9, %v1655_v1, -inf }
 0x9ef   : > { %1658 = vmax.xlane.f32.xlu0 %v1657_v54 }
 0xa57   : > { %v1523_v55 = vpop.xlane.xlu2 %1522 }
 0xa58   : > { %v1527_v56 = vsub.f32 %v1519_v41, %v1523_v55 }
 0xa5a   : > { %v1529_v57 = vmul.f32 1.442695, %v1527_v56  ;;  %v1526_v58 = vpop.xlane.xlu1 %1525 }
 0xa5b   : > { %v1528_v6 = vsub.f32 %v1520_v46, %v1526_v58 }
 0xa5c   : > { %2432 = vpow2.f32 %v1529_v57 }
 0xa5d   : > { %v1531_v59 = vmul.f32 1.442695, %v1528_v6 }
 0xa5f   : > { %2434 = vpow2.f32 %v1531_v59  ;;  %v1662_v60 = vpop.xlane.xlu2 %1661 }
 0xa60   : > { %v1664_v16 = vsub.f32 %v1656_v49, %v1662_v60 }
 0xa62   : > { %v2433_v61 = vpop.eup %2432  ;;  %v1667_v62 = vmul.f32 1.442695, %v1664_v16  ;;  %v1659_v63 = vpop.xlane.xlu0 %1658  ;;  %v2323_v16 = vld [vmem:[%s2757_s5 + $0x38] sm:$0xff] }
 0xa63   : > { %v1663_v0 = vsub.f32 %v1655_v1, %v1659_v63  ;;  %v1533_v2 = vsel %vm950_vm9, %v2433_v61, 0.0  ;;  %1868 = vmatpush.msrb.mxu3 %v2323_v16  ;;  %v2320_v63 = vld [vmem:[%s2757_s5 + $0x20] sm:$0xff] }
 0xa64   : > { %1534 = vadd.xlane.f32.xlu1 %v1533_v2  ;;  %2436 = vpow2.f32 %v1667_v62  ;;  %v2321_v62 = vld [vmem:[%s2757_s5 + $0x28] sm:$0xff]  ;;  %v2395_v16 = vld [vmem:[%s2773_s4 + $0x1] ss:$0 sm:$0xff] }
 0xa65   : > { %v2435_v12 = vpop.eup %2434  ;;  %v1665_v3 = vmul.f32 1.442695, %v1663_v0 }
 0xa66   : > { %v1536_v4 = vsel %vm950_vm9, %v2435_v12, 0.0 }
 0xa67   : > { %2438 = vpow2.f32 %v1665_v3  ;;  %1537 = vadd.xlane.f32.xlu0 %v1536_v4 }
 0xa6a   : > { %v2437_v5 = vpop.eup %2436 }
 0xa6b   : > { %v1672_v9 = vsel %vm950_vm9, %v2437_v5, 0.0 }
 0xa6d   : > { %v2439_v7 = vpop.eup %2438 }
 0xa6e   : > { %v1669_v8 = vsel %vm950_vm9, %v2439_v7, 0.0 }
 0xa6f   : > { %1670 = vadd.xlane.f32.xlu2 %v1669_v8  ;;  %1673 = vadd.xlane.f32.xlu0 %v1672_v9 }
 0xa7d   : > { %2371 = vrot.lane.b32.xlu1 %v2370_v11, %s2983_s27 }
 0xa87   : > { %2376 = vrot.lane.b32.xlu2 %v2370_v11, %s2984_s17 }
 0xad7   : > { %v1535_v14 = vpop.xlane.xlu1 %1534 }
 0xad8   : > { %2440 = vrcp.f32 %v1535_v14 }
 0xada   : > { %v1538_v13 = vpop.xlane.xlu0 %1537 }
 0xadb   : > { %2442 = vrcp.f32 %v1538_v13 }
 0xade   : > { %v2441_v17 = vpop.eup %2440 }
 0xadf   : > { %v1541_v25 = vmul.f32 %v2441_v17, %v2433_v61  ;;  %v2322_v61 = vld [vmem:[%s2757_s5 + $0x30] sm:$0xff] }
 0xae0   : > { %1869 = vmatpush.msrb.mxu3 %v2322_v61 }
 0xae1   : > { %v2443_v19 = vpop.eup %2442 }
 0xae2   : > { %v1671_v15 = vpop.xlane.xlu2 %1670  ;;  %v1674_v18 = vpop.xlane.xlu0 %1673  ;;  %v1542_v26 = vmul.f32 %v2443_v19, %v2435_v12  ;;  %1870 = vmatpush.msrb.mxu3 %v2321_v62 }
 0xae3   : > { %2444 = vrcp.f32 %v1671_v15 }
 0xae4   : > { %2446 = vrcp.f32 %v1674_v18  ;;  %1871 = vmatpush.msrb.mxu3 %v2320_v63  ;;  %v2393_v18 = vld [vmem:[%s2739_s25 + $0x1] ss:$0 sm:$0xff] }
 0xae9   : > { %v2445_v29 = vpop.eup %2444 }
 0xaea   : > { %v2377_v20 = vpop.permute.xlu2 %2376  ;;  %v2447_v30 = vpop.eup %2446  ;;  %v1677_v52 = vmul.f32 %v2445_v29, %v2439_v7 }
 0xaeb   : > { %v2379_v47 = vunpack.i.h.bf16 %v2377_v20  ;;  %v2378_v28 = vunpack.i.l.bf16 %v2377_v20  ;;  %v1678_v31 = vmul.f32 %v2447_v30, %v2437_v5 }
 0xaef   : > { %v2372_v21 = vpop.permute.xlu1 %2371 }
 0xaf0   : > { %v2374_v22 = vunpack.i.h.bf16 %v2372_v21  ;;  %v2373_v24 = vunpack.i.l.bf16 %v2372_v21  ;;  %v2386_v21 = vld [vmem:[%s2745_s19 + $0x1] ss:$0 sm:$0xff] }
 0xaf2   : > { %1564 = vmatpush.msrb.mxu1 %v2373_v24  ;;  %1590 = vmatpush.msrb.mxu2 %v2374_v22 }
 0xaf3   : > { %2301 = vmatmul.msk.f32.vlgmr.msrb.gmra.mxu1 %vm950_vm9, %v1541_v25  ;;  %2302 = vmatmul.msk.f32.vlgmr.msrb.gmra.mxu2 %vm950_vm9, %v1542_v26 }
 0xaf4   : > { %1700 = vmatpush.msra.mxu1 %v2378_v28  ;;  %1726 = vmatpush.msra.mxu2 %v2379_v47 }
 0xaf6   : > { %1925 = vmatpush.msrb.mxu1 %v2334_v32 }
 0xaf8   : > { %1926 = vmatpush.msrb.mxu1 %v2333_v33  ;;  %v2396_v33 = vld [vmem:[%s2798_s1 + $0x1] ss:$0 sm:$0xff] }
 0xafa   : > { %1927 = vmatpush.msrb.mxu1 %v2332_v34 }
 0xafb   : > { %2309 = vmatmul.msk.f32.vlgmr.msra.gmra.mxu1 %vm950_vm9, %v1677_v52  ;;  %2310 = vmatmul.msk.f32.vlgmr.msra.gmra.mxu2 %vm950_vm9, %v1678_v31 }
 0xb70   : > { %v1566_v35 = vpop.f32.mrf.mxu1 }
 0xb76   : > { %v1592_v36 = vpop.f32.mrf.mxu2 }
 0xb78   : > { %v1702_v37 = vpop.f32.mrf.mxu1 }
 0xb79   : > { %1733 = vrot.lane.b32.xlu0 %v1702_v37, %s2985_s26  ;;  %v2329_v37 = vld [vmem:[%s2779_s30 + $0x50] sm:$0xff] }
 0xb7e   : > { %v1728_v38 = vpop.f32.mrf.mxu2 }
 0xb7f   : > { %1735 = vrot.lane.b32.xlu1 %v1728_v38, %s2985_s26  ;;  %v2328_v38 = vld [vmem:[%s2779_s30 + $0x48] sm:$0xff] }
 0xbeb   : > { %v1734_v40 = vpop.permute.xlu0 %1733 }
 0xbec   : > { %v1739_v41 = vsel %vm892_vm8, %v1566_v35, %v1734_v40  ;;  %v2331_v35 = vld [vmem:[%s2779_s30 + $0x60] sm:$0xff] }
 0xbed   : > { %2316 = vmatmul.msk.f32.vlgmr.msra.gmra.mxu0 %vm790_vm0, %v1739_v41  ;;  %1928 = vmatpush.msrb.mxu1 %v2331_v35  ;;  %v2394_v40 = vld [vmem:[%s2751_s2 + $0x1] ss:$0 sm:$0xff]  ;;  %s2986_s2 = sshll.u32 %s2576_s23, 4 }
 0xbee   : > { %s785_s19 = scalar_lea.vmem %s2954_s16, %s2986_s2 }
 0xbf1   : > { %v1736_v42 = vpop.permute.xlu1 %1735 }
 0xbf2   : > { %v1740_v43 = vsel %vm892_vm8, %v1592_v36, %v1736_v42  ;;  %v2330_v36 = vld [vmem:[%s2779_s30 + $0x58] sm:$0xff] }
 0xbf3   : > { %1929 = vmatpush.msrb.mxu1 %v2330_v36  ;;  %v2397_v36 = vld [vmem:[%s2809_s18 + $0x1] ss:$0 sm:$0xff] }
 0xbf5   : > { %2317 = vmatmul.msk.f32.gmra.mxu0 %vm790_vm0, %v1740_v43  ;;  %1930 = vmatpush.msrb.mxu1 %v2329_v37 }
 0xbf7   : > { %1931 = vmatpush.msrb.mxu1 %v2328_v38 }
 0xbf9   : > { %1932 = vmatpush.msrb.mxu1 %v2327_v39 }
 0xc6a   : > { %v1774_v45 = vpop.f32.mrf.mxu0 }
 0xc6b   : > { %v1775_v46 = vadd.f32 %v2392_v44, %v1774_v45 }
 0xc6d   : > { %v1780_v48 = vadd.f32 %v1775_v46, %v2819_v23 }
 0xc6f   : > { %v1786_v49 = vsel %vm790_vm0, %v1780_v48, 0.0 }
 0xc70   : > { %1787 = vadd.xlane.f32.xlu2 %v1786_v49 }
 0xc72   : > { %v1777_v50 = vpop.f32.mrf.mxu0 }
 0xc73   : > { %v1778_v51 = vadd.f32 %v2392_v44, %v1777_v50 }
 0xc75   : > { %v1781_v53 = vadd.f32 %v1778_v51, %v2823_v27 }
 0xc77   : > { %v1789_v1 = vsel %vm790_vm0, %v1781_v53, 0.0 }
 0xc78   : > { %1790 = vadd.xlane.f32.xlu0 %v1789_v1 }
 0xce3   : > { %v1788_v54 = vpop.xlane.xlu2 %1787 }
 0xce4   : > { %v1792_v55 = vmul.f32 %v1788_v54, %v2586_v10 }
 0xce6   : > { %v1794_v56 = vsub.f32 %v1780_v48, %v1792_v55 }
 0xce8   : > { %v1796_v57 = vmul.f32 %v1794_v56, %v1794_v56 }
 0xcea   : > { %v1798_v23 = vsel %vm790_vm0, %v1796_v57, 0.0 }
 0xceb   : > { %v1791_v58 = vpop.xlane.xlu0 %1790  ;;  %1799 = vadd.xlane.f32.xlu1 %v1798_v23 }
 0xcec   : > { %v1793_v6 = vmul.f32 %v1791_v58, %v2586_v10 }
 0xcee   : > { %v1795_v59 = vsub.f32 %v1781_v53, %v1793_v6 }
 0xcf0   : > { %v1797_v60 = vmul.f32 %v1795_v59, %v1795_v59 }
 0xcf2   : > { %v1801_v27 = vsel %vm790_vm0, %v1797_v60, 0.0 }
 0xcf3   : > { %1802 = vadd.xlane.f32.xlu2 %v1801_v27 }
 0xd5e   : > { %v1800_v0 = vpop.xlane.xlu1 %1799 }
 0xd5f   : > { %v1804_v2 = vmul.f32 %v1800_v0, %v2586_v10 }
 0xd61   : > { %v1806_v12 = vadd.f32 1e-12, %v1804_v2 }
 0xd63   : > { %2448 = vrsqrt.f32 %v1806_v12  ;;  %vm1814_vm9 = vweird.f32 %v1806_v12 }
 0xd66   : > { %v1803_v3 = vpop.xlane.xlu2 %1802 }
 0xd67   : > { %v1805_v4 = vmul.f32 %v1803_v3, %v2586_v10 }
 0xd69   : > { %v2449_v5 = vpop.eup %2448  ;;  %v1807_v7 = vadd.f32 1e-12, %v1805_v4 }
 0xd6a   : > { %v1809_v8 = vmul.f32 %v2449_v5, %v1806_v12  ;;  %vm1815_vm8 = vweird.f32 %v2449_v5 }
 0xd6b   : > { %2450 = vrsqrt.f32 %v1807_v7  ;;  %vm1816_vm10 = vmor %vm1814_vm9, %vm1815_vm8  ;;  %vm1824_vm12 = vweird.f32 %v1807_v7 }
 0xd6c   : > { %v1810_v9 = vmul.f32 %v2449_v5, %v1809_v8 }
 0xd6e   : > { %v1811_v11 = vmul.f32 0.5, %v1810_v9 }
 0xd70   : > { %v1812_v13 = vsub.f32 1.5, %v1811_v11 }
 0xd71   : > { %v2451_v14 = vpop.eup %2450 }
 0xd72   : > { %v1813_v15 = vmul.f32 %v2449_v5, %v1812_v13  ;;  %v1819_v17 = vmul.f32 %v2451_v14, %v1807_v7  ;;  %vm1825_vm11 = vweird.f32 %v2451_v14 }
 0xd73   : > { %vm1826_vm13 = vmor %vm1824_vm12, %vm1825_vm11 }
 0xd74   : > { %v1817_v19 = vsel %vm1816_vm10, %v2449_v5, %v1813_v15  ;;  %v1820_v20 = vmul.f32 %v2451_v14, %v1819_v17 }
 0xd75   : > { %v1828_v22 = vmul.f32 %v1817_v19, %v1794_v56 }
 0xd76   : > { %v1821_v24 = vmul.f32 0.5, %v1820_v20 }
 0xd77   : > { %v1833_v25 = vmul.f32 %v2393_v18, %v1828_v22 }
 0xd78   : > { %v1822_v26 = vsub.f32 1.5, %v1821_v24 }
 0xd79   : > { %v1838_v47 = vadd.f32 %v2386_v21, %v1833_v25 }
 0xd7a   : > { %v1823_v28 = vmul.f32 %v2451_v14, %v1822_v26 }
 0xd7b   : > { %2325 = vmatmul.msk.f32.vlgmr.msrb.gmra.mxu3 %vm790_vm0, %v1838_v47 }
 0xd7c   : > { %v1827_v29 = vsel %vm1826_vm13, %v2451_v14, %v1823_v28 }
 0xd7d   : > { %v1829_v30 = vmul.f32 %v1827_v29, %v1795_v59 }
 0xd7f   : > { %v1834_v52 = vmul.f32 %v2393_v18, %v1829_v30 }
 0xd81   : > { %v1839_v31 = vadd.f32 %v2386_v21, %v1834_v52 }
 0xd83   : > { %2326 = vmatmul.msk.f32.gmra.mxu3 %vm790_vm0, %v1839_v31 }
 0xdfe   : > { %v1873_v41 = vpop.f32.mrf.mxu3 }
 0xdff   : > { %v1874_v42 = vadd.f32 %v2394_v40, %v1873_v41 }
 0xe01   : > { %v1881_v43 = vmul.f32 0.044715, %v1874_v42  ;;  %v1879_v57 = vmul.f32 0.5, %v1874_v42 }
 0xe03   : > { %v1883_v44 = vmul.f32 %v1881_v43, %v1874_v42 }
 0xe05   : > { %v1885_v45 = vmul.f32 %v1883_v44, %v1874_v42 }
 0xe06   : > { %v1876_v46 = vpop.f32.mrf.mxu3 }
 0xe07   : > { %v1887_v48 = vadd.f32 %v1885_v45, %v1874_v42  ;;  %v1877_v49 = vadd.f32 %v2394_v40, %v1876_v46 }
 0xe09   : > { %v1889_v50 = vmul.f32 0.7978846, %v1887_v48  ;;  %v1882_v51 = vmul.f32 0.044715, %v1877_v49  ;;  %v1880_v59 = vmul.f32 0.5, %v1877_v49 }
 0xe0b   : > { %2452 = vtanh.f32 %v1889_v50  ;;  %v1884_v53 = vmul.f32 %v1882_v51, %v1877_v49 }
 0xe0d   : > { %v1886_v1 = vmul.f32 %v1884_v53, %v1877_v49 }
 0xe0f   : > { %v1888_v54 = vadd.f32 %v1886_v1, %v1877_v49 }
 0xe11   : > { %v2453_v55 = vpop.eup %2452  ;;  %v1890_v56 = vmul.f32 0.7978846, %v1888_v54 }
 0xe12   : > { %v1893_v23 = vadd.f32 1.0, %v2453_v55 }
 0xe13   : > { %2454 = vtanh.f32 %v1890_v56 }
 0xe14   : > { %v1895_v58 = vmul.f32 %v1893_v23, %v1879_v57 }
 0xe16   : > { %2336 = vmatmul.msk.f32.vlgmr.msrb.gmra.mxu1 %vm1334_vm1, %v1895_v58 }
 0xe19   : > { %v2455_v6 = vpop.eup %2454 }
 0xe1a   : > { %v1894_v60 = vadd.f32 1.0, %v2455_v6 }
 0xe1c   : > { %v1896_v27 = vmul.f32 %v1894_v60, %v1880_v59 }
 0xe1e   : > { %2337 = vmatmul.msk.f32.gmra.mxu1 %vm1334_vm1, %v1896_v27 }
 0xe93   : > { %v1934_v61 = vpop.f32.mrf.mxu1 }
 0xe94   : > { %v1935_v62 = vadd.f32 %v2395_v16, %v1934_v61 }
 0xe96   : > { %v1940_v63 = vadd.f32 %v1935_v62, %v1838_v47 }
 0xe98   : > { %v1946_v0 = vsel %vm790_vm0, %v1940_v63, 0.0 }
 0xe99   : > { %1947 = vadd.xlane.f32.xlu0 %v1946_v0 }
 0xe9b   : > { %v1937_v2 = vpop.f32.mrf.mxu1 }
 0xe9c   : > { %v1938_v12 = vadd.f32 %v2395_v16, %v1937_v2 }
 0xe9e   : > { %v1941_v3 = vadd.f32 %v1938_v12, %v1839_v31 }
 0xea0   : > { %v1949_v4 = vsel %vm790_vm0, %v1941_v3, 0.0 }
 0xea1   : > { %1950 = vadd.xlane.f32.xlu1 %v1949_v4 }
 0xf0c   : > { %v1948_v5 = vpop.xlane.xlu0 %1947 }
 0xf0d   : > { %v1952_v7 = vmul.f32 %v1948_v5, %v2586_v10 }
 0xf0f   : > { %v1954_v8 = vsub.f32 %v1940_v63, %v1952_v7 }
 0xf11   : > { %v1956_v9 = vmul.f32 %v1954_v8, %v1954_v8 }
 0xf13   : > { %v1958_v11 = vsel %vm790_vm0, %v1956_v9, 0.0 }
 0xf14   : > { %1959 = vadd.xlane.f32.xlu2 %v1958_v11  ;;  %v1951_v13 = vpop.xlane.xlu1 %1950 }
 0xf15   : > { %v1953_v14 = vmul.f32 %v1951_v13, %v2586_v10 }
 0xf17   : > { %v1955_v15 = vsub.f32 %v1941_v3, %v1953_v14 }
 0xf19   : > { %v1957_v17 = vmul.f32 %v1955_v15, %v1955_v15 }
 0xf1b   : > { %v1961_v18 = vsel %vm790_vm0, %v1957_v17, 0.0 }
 0xf1c   : > { %1962 = vadd.xlane.f32.xlu0 %v1961_v18 }
 0xf87   : > { %v1960_v19 = vpop.xlane.xlu2 %1959 }
 0xf88   : > { %v1964_v20 = vmul.f32 %v1960_v19, %v2586_v10 }
 0xf8a   : > { %v1966_v21 = vadd.f32 1e-12, %v1964_v20 }
 0xf8c   : > { %2456 = vrsqrt.f32 %v1966_v21  ;;  %vm1974_vm15 = vweird.f32 %v1966_v21 }
 0xf8f   : > { %v1963_v22 = vpop.xlane.xlu0 %1962 }
 0xf90   : > { %v1965_v24 = vmul.f32 %v1963_v22, %v2586_v10 }
 0xf92   : > { %v2457_v25 = vpop.eup %2456  ;;  %v1967_v26 = vadd.f32 1e-12, %v1965_v24 }
 0xf93   : > { %v1969_v47 = vmul.f32 %v2457_v25, %v1966_v21  ;;  %vm1975_vm14 = vweird.f32 %v2457_v25 }
 0xf94   : > { %2458 = vrsqrt.f32 %v1967_v26  ;;  %vm1976_vm1 = vmor %vm1974_vm15, %vm1975_vm14  ;;  %vm1984_vm3 = vweird.f32 %v1967_v26 }
 0xf95   : > { %v1970_v28 = vmul.f32 %v2457_v25, %v1969_v47 }
 0xf97   : > { %v1971_v29 = vmul.f32 0.5, %v1970_v28 }
 0xf99   : > { %v1972_v30 = vsub.f32 1.5, %v1971_v29 }
 0xf9a   : > { %v2459_v52 = vpop.eup %2458 }
 0xf9b   : > { %v1973_v31 = vmul.f32 %v2457_v25, %v1972_v30  ;;  %v1979_v32 = vmul.f32 %v2459_v52, %v1967_v26  ;;  %vm1985_vm2 = vweird.f32 %v2459_v52 }
 0xf9c   : > { %vm1986_vm4 = vmor %vm1984_vm3, %vm1985_vm2 }
 0xf9d   : > { %v1977_v34 = vsel %vm1976_vm1, %v2457_v25, %v1973_v31  ;;  %v1980_v35 = vmul.f32 %v2459_v52, %v1979_v32 }
 0xf9e   : > { %v1988_v10 = vmul.f32 %v1977_v34, %v1954_v8 }
 0xf9f   : > { %v1981_v37 = vmul.f32 0.5, %v1980_v35 }
 0xfa0   : > { %v1993_v38 = vmul.f32 %v2396_v33, %v1988_v10 }
 0xfa1   : > { %v1982_v39 = vsub.f32 1.5, %v1981_v37 }
 0xfa2   : > { %v1998_v40 = vadd.f32 %v2397_v36, %v1993_v38 }
 0xfa3   : > { %v1983_v41 = vmul.f32 %v2459_v52, %v1982_v39 }
 0xfa4   : > { %2000 = vst.msk [vmem:[%s785_s19] sm:$0xff] %vm790_vm0, %v1998_v40 }
 0xfa5   : > { %v1987_v42 = vsel %vm1986_vm4, %v2459_v52, %v1983_v41 }
 0xfa6   : > { %v1989_v43 = vmul.f32 %v1987_v42, %v1955_v15 }
 0xfa8   : > { %v1994_v44 = vmul.f32 %v2396_v33, %v1989_v43  ;;  %2005 = sbr.rel (%p2340_p4) target bundleno = 4028 (0xfbc), region = 88 }
 0xfaa   : > { %v1999_v45 = vadd.f32 %v2397_v36, %v1994_v44 }
 0xfac   : > { %2001 = vst.msk [vmem:[%s785_s19 + $0x8] sm:$0xff] %vm790_vm0, %v1999_v45 }
 0xfad   : > { %v2006_v46 = vld [vmem:[%s785_s19] sm:$0xff] }
 0xfae   : > { %2460 = vtanh.f32 %v2006_v46 }
 0xfb3   : > { %v2007_v48 = vld [vmem:[%s785_s19 + $0x8] sm:$0xff] }
 0xfb4   : > { %2462 = vtanh.f32 %v2007_v48  ;;  %v2461_v49 = vpop.eup %2460 }
 0xfb5   : > { %2010 = vst.msk [vmem:[%s785_s19] sm:$0xff] %vm790_vm0, %v2461_v49 }
 0xfba   : > { %v2463_v50 = vpop.eup %2462 }
 0xfbb   : > { %2011 = vst.msk [vmem:[%s785_s19 + $0x8] sm:$0xff] %vm790_vm0, %v2463_v50 }
 0xfbc PF: > { %s2987_s23 = sld [smem:[#allocation2_spill]] }
 0xfc2   : > { %s26_s21 = sadd.s32 1, %s2987_s23  }
 0xfc3   : > { %p23_p5 = scmp.ge.s32.totalorder %s26_s21, 4  }
 0xfc5   :  { %25 = sbr.rel (!%p23_p5) target bundleno = 7 (0x7), region = 176 }

</bundles_post_ra>
